<compile_context>
chip_gen: v6e
topology: v6e:2x2x1
jax: 0.10.0
libtpu: 0.0.40
codegen_flags: <defaults>
</compile_context>

<pallas_src>
import functools

import numpy as np
import jax
import jax.numpy as jnp
from jax.experimental import pallas as pl
from jax.experimental.pallas import tpu as pltpu

# ----------------------------- configuration -------------------------------
B, TMAX, LMAX = 2, 16, 8          # batch, encoder length, decoder length
IDIM, ODIM = 32, 8                # encoder feature dim, output feature dim
DUNITS, PRENET_UNITS = 32, 16     # decoder LSTM units, prenet units
ATT_DIM = 16                      # attention projection dim (AttAdd)
DLAYERS = 2
POSTNET_CHANS, POSTNET_FILTS, POSTNET_LAYERS = 16, 5, 5
DROPOUT, ZONEOUT = 0.5, 0.1
ATT_SCALING = 2.0
BN_EPS = 1e-5
REDUCTION_FACTOR = 1


# ------------------------------ fused kernel -------------------------------
def decoder_kernel(hs_ref, mask_ref, prev_ref, dm1_ref, dm2_ref,
                   Wenc_ref, benc_ref, wg_ref, bg_ref,
                   Wp1_ref, Wp2_ref,
                   Wih0a_ref, Wih0p_ref, b0_ref,
                   Wz0f_ref, W1f_ref, b1_ref,
                   Wout_ref, bout_ref,
                   pw0_ref, pb0_ref, pw1_ref, pb1_ref, pw2_ref, pb2_ref,
                   pw3_ref, pb3_ref, pw4_ref, pb4_ref,
                   fused_ref,
                   *, dunits, zoneout, odim):
    Bk, T, Di = hs_ref.shape
    L = fused_ref.shape[1]
    A = Wenc_ref.shape[1]
    Du = dunits
    NG = 4 * Du                     # 128 -> lane-aligned gate slab
    O = odim
    zo = zoneout

    hs = hs_ref[...]                                    # (B, T, Di)
    mask = mask_ref[...]                                # (B, T) 1=valid 0=pad

    # encoder projection of attention (mlp_enc), shared by all steps: (B, T, A)
    encp = (jnp.dot(hs.reshape(Bk * T, Di), Wenc_ref[...],
                    preferred_element_type=jnp.float32)
            + benc_ref[...]).reshape(Bk, T, A)

    # ---- prenet hoisted out of the serial loop (teacher forcing) ----
    # prev_ref is B-major flattened: row b*L+t holds ys[b, t-1] (zeros at t=0).
    p = jnp.maximum(jnp.dot(prev_ref[...], Wp1_ref[...],
                            preferred_element_type=jnp.float32), 0.0) * dm1_ref[...]
    p = jnp.maximum(jnp.dot(p, Wp2_ref[...],
                            preferred_element_type=jnp.float32), 0.0) * dm2_ref[...]
    # prenet contribution to LSTM-0 gates (+ fused bias), all steps at once
    pregates = (jnp.dot(p, Wih0p_ref[...], preferred_element_type=jnp.float32)
                + b0_ref[...]).reshape(Bk, L, NG)

    wg = wg_ref[...]          # (1, 1, A), gvec weight pre-scaled by att_scaling
    bg = bg_ref[...]          # (1, 1),   gvec bias   pre-scaled by att_scaling

    # LSTM/zoneout state carried in values across the fully unrolled loop.
    z0 = jnp.zeros((Bk, Du), jnp.float32)
    c0 = jnp.zeros((Bk, Du), jnp.float32)
    z1 = jnp.zeros((Bk, Du), jnp.float32)
    c1 = jnp.zeros((Bk, Du), jnp.float32)
    zc_rows = []              # per-step [z1 | att_c] for the hoisted out proj

    for t in range(L):        # static, fully unrolled (L is tiny)
        # fused z0 projection [Whh0 | Wdec]: one MXU pass, aligned slices
        zz = jnp.dot(z0, Wz0f_ref[...], preferred_element_type=jnp.float32)
        hh0 = zz[:, :NG]                                            # (B, 4*Du)
        dec_proj = zz[:, NG:NG + A]                                 # (B, A)

        # ---- attention (ESPnet AttAdd); gvec as VPU mul + lane reduce ----
        et = jnp.tanh(encp + dec_proj[:, None, :])                  # (B, T, A)
        en = jnp.sum(et * wg, axis=-1) + bg                         # (B, T)
        en = jnp.where(mask > 0.0, en, -1e30)
        en = en - jnp.max(en, axis=1, keepdims=True)
        w = jnp.exp(en)                                             # masked -> 0
        # note: a fully-masked row (hlens==0) would give uniform weights here
        w = w * pl.reciprocal(jnp.sum(w, axis=1, keepdims=True), approx=True)
        att_c = jnp.sum(hs * w[:, :, None], axis=1)                 # (B, Di)

        # ---- LSTM layer 0 (+ eval-mode deterministic zoneout) ----
        g0 = (jnp.dot(att_c, Wih0a_ref[...], preferred_element_type=jnp.float32)
              + hh0 + pregates[:, t, :])
        s0 = jax.nn.sigmoid(g0)                     # one dense EUP pass
        gg0 = jnp.tanh(g0[:, 2 * Du:3 * Du])
        c0n = s0[:, Du:2 * Du] * c0 + s0[:, :Du] * gg0
        h0n = s0[:, 3 * Du:4 * Du] * jnp.tanh(c0n)
        z0n = zo * z0 + (1.0 - zo) * h0n
        c0 = zo * c0 + (1.0 - zo) * c0n

        # ---- LSTM layer 1: fused [z0new | z1_old] @ [Wih1; Whh1] ----
        zjoint = jnp.concatenate([z0n, z1], axis=-1)                # (B, 2*Du)
        g1 = (jnp.dot(zjoint, W1f_ref[...], preferred_element_type=jnp.float32)
              + b1_ref[...])
        s1 = jax.nn.sigmoid(g1)
        gg1 = jnp.tanh(g1[:, 2 * Du:3 * Du])
        c1n = s1[:, Du:2 * Du] * c1 + s1[:, :Du] * gg1
        h1n = s1[:, 3 * Du:4 * Du] * jnp.tanh(c1n)
        z1n = zo * z1 + (1.0 - zo) * h1n
        c1 = zo * c1 + (1.0 - zo) * c1n

        z0, z1 = z0n, z1n
        zc_rows.append(jnp.concatenate([z1n, att_c], axis=-1))      # (B, Du+Di)
        # prev_att_w cumulation omitted: AttAdd ignores prev_att_w.

    # ---- hoisted feat_out | prob_out: one batched matmul for all steps ----
    zc = jnp.stack(zc_rows, axis=1)                                 # (B, L, Du+Di)
    out = (jnp.dot(zc.reshape(Bk * L, Du + Di), Wout_ref[...],
                   preferred_element_type=jnp.float32)
           + bout_ref[...]).reshape(Bk, L, O + 1)
    before3 = out[:, :, :O]                                         # (B, L, O)
    logits3 = out[:, :, O:O + 1]                                    # (B, L, 1)

    # ---- fused postnet: block-Toeplitz dense matmuls (BN folded) + residual
    before_flat = before3.reshape(Bk, L * O)                        # (B, L*O)
    x = before_flat
    pnet = [(pw0_ref, pb0_ref), (pw1_ref, pb1_ref), (pw2_ref, pb2_ref),
            (pw3_ref, pb3_ref), (pw4_ref, pb4_ref)]
    for li, (pw, pb) in enumerate(pnet):
        x = jnp.dot(x, pw[...], preferred_element_type=jnp.float32) + pb[...]
        if li != len(pnet) - 1:
            x = jnp.tanh(x)
        # postnet nn.Dropout is inactive in eval mode -> no-op.
    after3 = (before_flat + x).reshape(Bk, L, O)                    # (B, L, O)

    # single fused lane-dense output: [after | before | logits]
    fused_ref[...] = jnp.concatenate([after3, before3, logits3], axis=-1)


def _vmem_specs(n):
    return [pl.BlockSpec(memory_space=pltpu.MemorySpace.VMEM) for _ in range(n)]


def decoder_core(hs, mask, prev_flat, dm1, dm2, kp):
    kernel = functools.partial(decoder_kernel, dunits=DUNITS, zoneout=ZONEOUT,
                               odim=ODIM)
    inputs = (hs, mask, prev_flat, dm1, dm2,
              kp['Wenc'], kp['benc'], kp['wg_s'], kp['bg_s'],
              kp['Wp1'], kp['Wp2'],
              kp['Wih0_att'], kp['Wih0_pre'], kp['b0'],
              kp['Wz0f'], kp['W1f'], kp['b1'],
              kp['Wout'], kp['bout'],
              *kp['postnet_flat'])
    out_shape = jax.ShapeDtypeStruct((B, LMAX, 2 * ODIM + 1), jnp.float32)
    return pl.pallas_call(
        kernel,
        out_shape=out_shape,
        in_specs=_vmem_specs(len(inputs)),
        out_specs=pl.BlockSpec(memory_space=pltpu.MemorySpace.VMEM),
    )(*inputs)
    # TODO(synk): on v7x add grid=(B,) with
    # dimension_semantics=("parallel",) and B-blocked specs to use the second
    # TensorCore; keep the single-invocation form on v5e/v6e (1 TC).


# ------------------------------ full forward -------------------------------
def decoder_forward(hs, hlens, ys, kernel_params, dropout_key):
    """hs: (B, Tmax, idim), hlens: (B,), ys: (B, Lmax, odim) ->
    (after_outs, before_outs, logits) shaped (B,Lmax,odim),(B,Lmax,odim),(B,Lmax)."""
    mask = (jnp.arange(TMAX)[None, :] < hlens[:, None]).astype(jnp.float32)

    # teacher forcing: prev_out at step t is ys[t-1] (zeros at t=0); B-major flat.
    prev = jnp.concatenate(
        [jnp.zeros((B, 1, ODIM), jnp.float32), ys[:, :-1]], axis=1)
    prev_flat = prev.reshape(B * LMAX, ODIM)

    # always-on prenet dropout masks (F.dropout semantics), pre-scaled by 1/keep
    keep = 1.0 - DROPOUT
    k1, k2 = jax.random.split(dropout_key)
    dm1 = jax.random.bernoulli(k1, keep, (B * LMAX, PRENET_UNITS)
                               ).astype(jnp.float32) / keep
    dm2 = jax.random.bernoulli(k2, keep, (B * LMAX, PRENET_UNITS)
                               ).astype(jnp.float32) / keep

    fused = decoder_core(hs, mask, prev_flat, dm1, dm2, kernel_params)
    after_outs = fused[..., :ODIM]
    before_outs = fused[..., ODIM:2 * ODIM]
    logits = fused[..., 2 * ODIM]
    # output_activation_fn is None -> identity
    return after_outs, before_outs, logits


# --------------------------- parameter construction ------------------------
def init_params(key):
    keys = iter(jax.random.split(key, 64))

    def w(shape, s=0.1):
        return (s * jax.random.normal(next(keys), shape)).astype(jnp.float32)

    raw = {}
    # attention (AttAdd): mlp_enc (bias), mlp_dec (no bias), gvec (bias)
    raw['Wenc'] = w((IDIM, ATT_DIM)); raw['benc'] = w((1, ATT_DIM))
    raw['Wdec'] = w((DUNITS, ATT_DIM))
    raw['Wg'] = w((ATT_DIM, 1)); raw['bg'] = w((1, 1))
    # prenet (Linear no bias)
    raw['Wp1'] = w((ODIM, PRENET_UNITS))
    raw['Wp2'] = w((PRENET_UNITS, PRENET_UNITS))
    # LSTM cells, gate order (i, f, g, o); bias = bias_ih + bias_hh
    raw['Wih0'] = w((IDIM + PRENET_UNITS, 4 * DUNITS))
    raw['Whh0'] = w((DUNITS, 4 * DUNITS))
    raw['b0'] = w((1, 4 * DUNITS))
    raw['Wih1'] = w((DUNITS, 4 * DUNITS))
    raw['Whh1'] = w((DUNITS, 4 * DUNITS))
    raw['b1'] = w((1, 4 * DUNITS))
    # feat_out (no bias), prob_out (bias); input = concat([z_last, att_c])
    raw['Wfeat'] = w((DUNITS + IDIM, ODIM * REDUCTION_FACTOR))
    raw['Wprob'] = w((DUNITS + IDIM, REDUCTION_FACTOR))
    raw['bprob'] = w((1, REDUCTION_FACTOR))

    # postnet: Conv1d(no bias) weights as (K, Cin, Cout) + eval-mode BN stats
    postnet = []
    for layer in range(POSTNET_LAYERS):
        cin = ODIM if layer == 0 else POSTNET_CHANS
        cout = ODIM if layer == POSTNET_LAYERS - 1 else POSTNET_CHANS
        gamma = jnp.ones((cout,), jnp.float32)
        beta = jnp.zeros((cout,), jnp.float32)
        rmean = jnp.zeros((cout,), jnp.float32)
        rvar = jnp.ones((cout,), jnp.float32)
        scale = gamma / jnp.sqrt(rvar + BN_EPS)
        shift = beta - rmean * scale
        postnet.append((w((POSTNET_FILTS, cin, cout)), scale, shift))
    raw['postnet'] = postnet
    return raw


def _conv_to_toeplitz(wconv, scale, L):
    """Fold BN scale into conv weight and expand to a dense block-Toeplitz
    matrix acting on a (B, L*Cin) slab -> (B, L*Cout)."""
    wnp = np.asarray(wconv) * np.asarray(scale)[None, None, :]      # (K,Cin,Cout)
    K, cin, cout = wnp.shape
    pad = (K - 1) // 2
    W = np.zeros((L * cin, L * cout), np.float32)
    for lo in range(L):
        for k in range(K):
            li = lo + k - pad
            if 0 <= li < L:
                W[li * cin:(li + 1) * cin, lo * cout:(lo + 1) * cout] = wnp[k]
    return jnp.asarray(W)


def prepare_kernel_params(raw):
    """Host-side fusion/splitting of the PyTorch-equivalent parameters."""
    kp = {}
    kp['Wenc'] = raw['Wenc']; kp['benc'] = raw['benc']
    # fold AttAdd scaling into gvec weight/bias
    kp['wg_s'] = (ATT_SCALING * raw['Wg']).reshape(1, 1, ATT_DIM)
    kp['bg_s'] = (ATT_SCALING * raw['bg']).reshape(1, 1)
    kp['Wp1'] = raw['Wp1']; kp['Wp2'] = raw['Wp2']
    # split LSTM-0 input weight by [att_c | prenet] (no in-kernel concat)
    kp['Wih0_att'] = raw['Wih0'][:IDIM]
    kp['Wih0_pre'] = raw['Wih0'][IDIM:]
    kp['b0'] = raw['b0']
    # fuse z0 projections: [Whh0 | Wdec] -> one matmul per step
    kp['Wz0f'] = jnp.concatenate([raw['Whh0'], raw['Wdec']], axis=1)
    # fuse LSTM-1 matmuls: [z0 | z1] @ [Wih1; Whh1]
    kp['W1f'] = jnp.concatenate([raw['Wih1'], raw['Whh1']], axis=0)
    kp['b1'] = raw['b1']
    # fuse feat_out + prob_out (applied once, after the loop)
    kp['Wout'] = jnp.concatenate([raw['Wfeat'], raw['Wprob']], axis=1)  # (D+Di, O+1)
    kp['bout'] = jnp.concatenate(
        [jnp.zeros((1, ODIM), jnp.float32), raw['bprob']], axis=1)
    # postnet: fold eval-mode BN into conv weights, dense block-Toeplitz form
    flat = []
    for (wconv, scale, shift) in raw['postnet']:
        cout = wconv.shape[2]
        wtoe = _conv_to_toeplitz(wconv, scale, LMAX)                 # (L*Cin, L*Cout)
        btoe = jnp.asarray(np.tile(np.asarray(shift), LMAX)).reshape(1, LMAX * cout)
        flat.extend([wtoe, btoe])
    kp['postnet_flat'] = tuple(flat)
    return kp


# ---------------------------------- main -----------------------------------
if __name__ == "__main__":
    key = jax.random.PRNGKey(0)
    k_hs, k_ys, k_param, k_drop = jax.random.split(key, 4)

    hs = jax.random.normal(k_hs, (B, TMAX, IDIM), jnp.float32)
    hlens = jnp.array([TMAX, TMAX - 4], jnp.int32)
    ys = jax.random.normal(k_ys, (B, LMAX, ODIM), jnp.float32)
    params = prepare_kernel_params(init_params(k_param))

    after_outs, before_outs, logits = decoder_forward(hs, hlens, ys, params, k_drop)
    jax.block_until_ready((after_outs, before_outs, logits))

    assert after_outs.shape == (B, LMAX, ODIM)
    assert before_outs.shape == (B, LMAX, ODIM)
    assert logits.shape == (B, LMAX)
    print("KERNEL_OK")
</pallas_src>

<mosaic_0001>
module attributes {stable_mosaic.version = 11 : i64} {
  func.func @decoder_kernel(%arg0: memref<2x16x32xf32, #tpu.memory_space<vmem>>, %arg1: memref<2x16xf32, #tpu.memory_space<vmem>>, %arg2: memref<16x8xf32, #tpu.memory_space<vmem>>, %arg3: memref<16x16xf32, #tpu.memory_space<vmem>>, %arg4: memref<16x16xf32, #tpu.memory_space<vmem>>, %arg5: memref<32x16xf32, #tpu.memory_space<vmem>>, %arg6: memref<1x16xf32, #tpu.memory_space<vmem>>, %arg7: memref<1x1x16xf32, #tpu.memory_space<vmem>>, %arg8: memref<1x1xf32, #tpu.memory_space<vmem>>, %arg9: memref<8x16xf32, #tpu.memory_space<vmem>>, %arg10: memref<16x16xf32, #tpu.memory_space<vmem>>, %arg11: memref<32x128xf32, #tpu.memory_space<vmem>>, %arg12: memref<16x128xf32, #tpu.memory_space<vmem>>, %arg13: memref<1x128xf32, #tpu.memory_space<vmem>>, %arg14: memref<32x144xf32, #tpu.memory_space<vmem>>, %arg15: memref<64x128xf32, #tpu.memory_space<vmem>>, %arg16: memref<1x128xf32, #tpu.memory_space<vmem>>, %arg17: memref<64x9xf32, #tpu.memory_space<vmem>>, %arg18: memref<1x9xf32, #tpu.memory_space<vmem>>, %arg19: memref<64x128xf32, #tpu.memory_space<vmem>>, %arg20: memref<1x128xf32, #tpu.memory_space<vmem>>, %arg21: memref<128x128xf32, #tpu.memory_space<vmem>>, %arg22: memref<1x128xf32, #tpu.memory_space<vmem>>, %arg23: memref<128x128xf32, #tpu.memory_space<vmem>>, %arg24: memref<1x128xf32, #tpu.memory_space<vmem>>, %arg25: memref<128x128xf32, #tpu.memory_space<vmem>>, %arg26: memref<1x128xf32, #tpu.memory_space<vmem>>, %arg27: memref<128x64xf32, #tpu.memory_space<vmem>>, %arg28: memref<1x64xf32, #tpu.memory_space<vmem>>, %arg29: memref<2x8x17xf32, #tpu.memory_space<vmem>>) attributes {dimension_semantics = [], scalar_prefetch = 0 : i64, scratch_operands = 0 : i64, tpu.core_type = #tpu.core_type<tc>} {
    %c0 = arith.constant 0 : index
    %c0_0 = arith.constant 0 : index
    %c0_1 = arith.constant 0 : index
    %0 = vector.load %arg0[%c0, %c0_0, %c0_1] : memref<2x16x32xf32, #tpu.memory_space<vmem>>, vector<2x16x32xf32>
    %c0_2 = arith.constant 0 : index
    %c0_3 = arith.constant 0 : index
    %1 = vector.load %arg1[%c0_2, %c0_3] : memref<2x16xf32, #tpu.memory_space<vmem>>, vector<2x16xf32>
    %2 = vector.shape_cast %0 : vector<2x16x32xf32> to vector<32x32xf32>
    %c0_4 = arith.constant 0 : index
    %c0_5 = arith.constant 0 : index
    %3 = vector.load %arg5[%c0_4, %c0_5] : memref<32x16xf32, #tpu.memory_space<vmem>>, vector<32x16xf32>
    %cst = arith.constant dense<0.000000e+00> : vector<32x16xf32>
    %4 = tpu.matmul %2, %3, %cst {dimension_numbers = #tpu.dot_dimension_numbers<[1], [0], [0], [1], [0, 0, 1, 1], [], []>} : vector<32x32xf32>, vector<32x16xf32>, vector<32x16xf32> -> vector<32x16xf32>
    %c0_6 = arith.constant 0 : index
    %c0_7 = arith.constant 0 : index
    %5 = vector.load %arg6[%c0_6, %c0_7] : memref<1x16xf32, #tpu.memory_space<vmem>>, vector<1x16xf32>
    %6 = vector.broadcast %5 : vector<1x16xf32> to vector<32x16xf32>
    %7 = arith.addf %4, %6 : vector<32x16xf32>
    %8 = vector.shape_cast %7 : vector<32x16xf32> to vector<2x16x16xf32>
    %c0_8 = arith.constant 0 : index
    %c0_9 = arith.constant 0 : index
    %9 = vector.load %arg2[%c0_8, %c0_9] : memref<16x8xf32, #tpu.memory_space<vmem>>, vector<16x8xf32>
    %c0_10 = arith.constant 0 : index
    %c0_11 = arith.constant 0 : index
    %10 = vector.load %arg9[%c0_10, %c0_11] : memref<8x16xf32, #tpu.memory_space<vmem>>, vector<8x16xf32>
    %cst_12 = arith.constant dense<0.000000e+00> : vector<16x16xf32>
    %11 = tpu.matmul %9, %10, %cst_12 {dimension_numbers = #tpu.dot_dimension_numbers<[1], [0], [0], [1], [0, 0, 1, 1], [], []>} : vector<16x8xf32>, vector<8x16xf32>, vector<16x16xf32> -> vector<16x16xf32>
    %cst_13 = arith.constant 0.000000e+00 : f32
    %12 = vector.broadcast %cst_13 : f32 to vector<16x16xf32>
    %13 = arith.maximumf %11, %12 : vector<16x16xf32>
    %c0_14 = arith.constant 0 : index
    %c0_15 = arith.constant 0 : index
    %14 = vector.load %arg3[%c0_14, %c0_15] : memref<16x16xf32, #tpu.memory_space<vmem>>, vector<16x16xf32>
    %15 = arith.mulf %13, %14 : vector<16x16xf32>
    %c0_16 = arith.constant 0 : index
    %c0_17 = arith.constant 0 : index
    %16 = vector.load %arg10[%c0_16, %c0_17] : memref<16x16xf32, #tpu.memory_space<vmem>>, vector<16x16xf32>
    %cst_18 = arith.constant dense<0.000000e+00> : vector<16x16xf32>
    %17 = tpu.matmul %15, %16, %cst_18 {dimension_numbers = #tpu.dot_dimension_numbers<[1], [0], [0], [1], [0, 0, 1, 1], [], []>} : vector<16x16xf32>, vector<16x16xf32>, vector<16x16xf32> -> vector<16x16xf32>
    %cst_19 = arith.constant 0.000000e+00 : f32
    %18 = vector.broadcast %cst_19 : f32 to vector<16x16xf32>
    %19 = arith.maximumf %17, %18 : vector<16x16xf32>
    %c0_20 = arith.constant 0 : index
    %c0_21 = arith.constant 0 : index
    %20 = vector.load %arg4[%c0_20, %c0_21] : memref<16x16xf32, #tpu.memory_space<vmem>>, vector<16x16xf32>
    %21 = arith.mulf %19, %20 : vector<16x16xf32>
    %c0_22 = arith.constant 0 : index
    %c0_23 = arith.constant 0 : index
    %22 = vector.load %arg12[%c0_22, %c0_23] : memref<16x128xf32, #tpu.memory_space<vmem>>, vector<16x128xf32>
    %cst_24 = arith.constant dense<0.000000e+00> : vector<16x128xf32>
    %23 = tpu.matmul %21, %22, %cst_24 {dimension_numbers = #tpu.dot_dimension_numbers<[1], [0], [0], [1], [0, 0, 1, 1], [], []>} : vector<16x16xf32>, vector<16x128xf32>, vector<16x128xf32> -> vector<16x128xf32>
    %c0_25 = arith.constant 0 : index
    %c0_26 = arith.constant 0 : index
    %24 = vector.load %arg13[%c0_25, %c0_26] : memref<1x128xf32, #tpu.memory_space<vmem>>, vector<1x128xf32>
    %25 = vector.broadcast %24 : vector<1x128xf32> to vector<16x128xf32>
    %26 = arith.addf %23, %25 : vector<16x128xf32>
    %27 = vector.shape_cast %26 : vector<16x128xf32> to vector<2x8x128xf32>
    %c0_27 = arith.constant 0 : index
    %c0_28 = arith.constant 0 : index
    %c0_29 = arith.constant 0 : index
    %28 = vector.load %arg7[%c0_27, %c0_28, %c0_29] : memref<1x1x16xf32, #tpu.memory_space<vmem>>, vector<1x1x16xf32>
    %c0_30 = arith.constant 0 : index
    %c0_31 = arith.constant 0 : index
    %29 = vector.load %arg8[%c0_30, %c0_31] : memref<1x1xf32, #tpu.memory_space<vmem>>, vector<1x1xf32>
    %cst_32 = arith.constant 0.000000e+00 : f32
    %30 = vector.broadcast %cst_32 : f32 to vector<2x32xf32>
    %cst_33 = arith.constant 0.000000e+00 : f32
    %31 = vector.broadcast %cst_33 : f32 to vector<2x32xf32>
    %cst_34 = arith.constant 0.000000e+00 : f32
    %32 = vector.broadcast %cst_34 : f32 to vector<2x32xf32>
    %cst_35 = arith.constant 0.000000e+00 : f32
    %33 = vector.broadcast %cst_35 : f32 to vector<2x32xf32>
    %c0_36 = arith.constant 0 : index
    %c0_37 = arith.constant 0 : index
    %34 = vector.load %arg14[%c0_36, %c0_37] : memref<32x144xf32, #tpu.memory_space<vmem>>, vector<32x144xf32>
    %cst_38 = arith.constant dense<0.000000e+00> : vector<2x144xf32>
    %35 = tpu.matmul %30, %34, %cst_38 {dimension_numbers = #tpu.dot_dimension_numbers<[1], [0], [0], [1], [0, 0, 1, 1], [], []>} : vector<2x32xf32>, vector<32x144xf32>, vector<2x144xf32> -> vector<2x144xf32>
    %36 = vector.extract_strided_slice %35 {offsets = [0, 0], sizes = [2, 128], strides = [1, 1]} : vector<2x144xf32> to vector<2x128xf32>
    %37 = vector.extract_strided_slice %35 {offsets = [0, 128], sizes = [2, 16], strides = [1, 1]} : vector<2x144xf32> to vector<2x16xf32>
    %38 = vector.shape_cast %37 : vector<2x16xf32> to vector<2x1x16xf32>
    %39 = vector.broadcast %38 : vector<2x1x16xf32> to vector<2x16x16xf32>
    %40 = arith.addf %8, %39 : vector<2x16x16xf32>
    %41 = math.tanh %40 : vector<2x16x16xf32>
    %42 = vector.broadcast %28 : vector<1x1x16xf32> to vector<2x16x16xf32>
    %43 = arith.mulf %41, %42 : vector<2x16x16xf32>
    %cst_39 = arith.constant dense<0.000000e+00> : vector<2x16xf32>
    %44 = vector.multi_reduction <add>, %43, %cst_39 [2] : vector<2x16x16xf32> to vector<2x16xf32>
    %45 = vector.broadcast %29 : vector<1x1xf32> to vector<2x16xf32>
    %46 = arith.addf %44, %45 : vector<2x16xf32>
    %cst_40 = arith.constant 0.000000e+00 : f32
    %47 = vector.broadcast %cst_40 : f32 to vector<2x16xf32>
    %48 = arith.cmpf ogt, %1, %47 : vector<2x16xf32>
    %cst_41 = arith.constant -1.000000e+30 : f32
    %49 = vector.broadcast %cst_41 : f32 to vector<2x16xf32>
    %50 = arith.select %48, %46, %49 : vector<2x16xi1>, vector<2x16xf32>
    %cst_42 = arith.constant dense<0xFF800000> : vector<2xf32>
    %51 = vector.multi_reduction <maximumf>, %50, %cst_42 [1] : vector<2x16xf32> to vector<2xf32>
    %52 = vector.shape_cast %51 : vector<2xf32> to vector<2x1xf32>
    %53 = vector.broadcast %52 : vector<2x1xf32> to vector<2x16xf32>
    %54 = arith.subf %50, %53 : vector<2x16xf32>
    %55 = math.exp %54 : vector<2x16xf32>
    %cst_43 = arith.constant dense<0.000000e+00> : vector<2xf32>
    %56 = vector.multi_reduction <add>, %55, %cst_43 [1] : vector<2x16xf32> to vector<2xf32>
    %57 = vector.shape_cast %56 : vector<2xf32> to vector<2x1xf32>
    %58 = tpu.reciprocal %57 {approx = true} : vector<2x1xf32> -> vector<2x1xf32>
    %59 = vector.broadcast %58 : vector<2x1xf32> to vector<2x16xf32>
    %60 = arith.mulf %55, %59 : vector<2x16xf32>
    %61 = vector.shape_cast %60 : vector<2x16xf32> to vector<2x16x1xf32>
    %62 = vector.broadcast %61 : vector<2x16x1xf32> to vector<2x16x32xf32>
    %63 = arith.mulf %0, %62 : vector<2x16x32xf32>
    %cst_44 = arith.constant dense<0.000000e+00> : vector<2x32xf32>
    %64 = vector.multi_reduction <add>, %63, %cst_44 [1] : vector<2x16x32xf32> to vector<2x32xf32>
    %c0_45 = arith.constant 0 : index
    %c0_46 = arith.constant 0 : index
    %65 = vector.load %arg11[%c0_45, %c0_46] : memref<32x128xf32, #tpu.memory_space<vmem>>, vector<32x128xf32>
    %cst_47 = arith.constant dense<0.000000e+00> : vector<2x128xf32>
    %66 = tpu.matmul %64, %65, %cst_47 {dimension_numbers = #tpu.dot_dimension_numbers<[1], [0], [0], [1], [0, 0, 1, 1], [], []>} : vector<2x32xf32>, vector<32x128xf32>, vector<2x128xf32> -> vector<2x128xf32>
    %67 = arith.addf %66, %36 : vector<2x128xf32>
    %68 = vector.extract_strided_slice %27 {offsets = [0, 0, 0], sizes = [2, 1, 128], strides = [1, 1, 1]} : vector<2x8x128xf32> to vector<2x1x128xf32>
    %69 = vector.shape_cast %68 : vector<2x1x128xf32> to vector<2x128xf32>
    %70 = arith.addf %67, %69 : vector<2x128xf32>
    %71 = arith.negf %70 : vector<2x128xf32>
    %72 = math.exp %71 : vector<2x128xf32>
    %cst_48 = arith.constant 1.000000e+00 : f32
    %73 = vector.broadcast %cst_48 : f32 to vector<2x128xf32>
    %74 = arith.addf %73, %72 : vector<2x128xf32>
    %75 = arith.divf %73, %74 : vector<2x128xf32>
    %76 = vector.extract_strided_slice %70 {offsets = [0, 64], sizes = [2, 32], strides = [1, 1]} : vector<2x128xf32> to vector<2x32xf32>
    %77 = math.tanh %76 : vector<2x32xf32>
    %78 = vector.extract_strided_slice %75 {offsets = [0, 32], sizes = [2, 32], strides = [1, 1]} : vector<2x128xf32> to vector<2x32xf32>
    %79 = arith.mulf %78, %31 : vector<2x32xf32>
    %80 = vector.extract_strided_slice %75 {offsets = [0, 0], sizes = [2, 32], strides = [1, 1]} : vector<2x128xf32> to vector<2x32xf32>
    %81 = arith.mulf %80, %77 : vector<2x32xf32>
    %82 = arith.addf %79, %81 : vector<2x32xf32>
    %83 = vector.extract_strided_slice %75 {offsets = [0, 96], sizes = [2, 32], strides = [1, 1]} : vector<2x128xf32> to vector<2x32xf32>
    %84 = math.tanh %82 : vector<2x32xf32>
    %85 = arith.mulf %83, %84 : vector<2x32xf32>
    %cst_49 = arith.constant 1.000000e-01 : f32
    %86 = vector.broadcast %cst_49 : f32 to vector<2x32xf32>
    %87 = arith.mulf %86, %30 : vector<2x32xf32>
    %cst_50 = arith.constant 0.899999976 : f32
    %88 = vector.broadcast %cst_50 : f32 to vector<2x32xf32>
    %89 = arith.mulf %88, %85 : vector<2x32xf32>
    %90 = arith.addf %87, %89 : vector<2x32xf32>
    %cst_51 = arith.constant 1.000000e-01 : f32
    %91 = vector.broadcast %cst_51 : f32 to vector<2x32xf32>
    %92 = arith.mulf %91, %31 : vector<2x32xf32>
    %cst_52 = arith.constant 0.899999976 : f32
    %93 = vector.broadcast %cst_52 : f32 to vector<2x32xf32>
    %94 = arith.mulf %93, %82 : vector<2x32xf32>
    %95 = arith.addf %92, %94 : vector<2x32xf32>
    %96 = tpu.concatenate %90, %32 in 1 : vector<2x32xf32>, vector<2x32xf32> -> vector<2x64xf32>
    %c0_53 = arith.constant 0 : index
    %c0_54 = arith.constant 0 : index
    %97 = vector.load %arg15[%c0_53, %c0_54] : memref<64x128xf32, #tpu.memory_space<vmem>>, vector<64x128xf32>
    %cst_55 = arith.constant dense<0.000000e+00> : vector<2x128xf32>
    %98 = tpu.matmul %96, %97, %cst_55 {dimension_numbers = #tpu.dot_dimension_numbers<[1], [0], [0], [1], [0, 0, 1, 1], [], []>} : vector<2x64xf32>, vector<64x128xf32>, vector<2x128xf32> -> vector<2x128xf32>
    %c0_56 = arith.constant 0 : index
    %c0_57 = arith.constant 0 : index
    %99 = vector.load %arg16[%c0_56, %c0_57] : memref<1x128xf32, #tpu.memory_space<vmem>>, vector<1x128xf32>
    %100 = vector.broadcast %99 : vector<1x128xf32> to vector<2x128xf32>
    %101 = arith.addf %98, %100 : vector<2x128xf32>
    %102 = arith.negf %101 : vector<2x128xf32>
    %103 = math.exp %102 : vector<2x128xf32>
    %cst_58 = arith.constant 1.000000e+00 : f32
    %104 = vector.broadcast %cst_58 : f32 to vector<2x128xf32>
    %105 = arith.addf %104, %103 : vector<2x128xf32>
    %106 = arith.divf %104, %105 : vector<2x128xf32>
    %107 = vector.extract_strided_slice %101 {offsets = [0, 64], sizes = [2, 32], strides = [1, 1]} : vector<2x128xf32> to vector<2x32xf32>
    %108 = math.tanh %107 : vector<2x32xf32>
    %109 = vector.extract_strided_slice %106 {offsets = [0, 32], sizes = [2, 32], strides = [1, 1]} : vector<2x128xf32> to vector<2x32xf32>
    %110 = arith.mulf %109, %33 : vector<2x32xf32>
    %111 = vector.extract_strided_slice %106 {offsets = [0, 0], sizes = [2, 32], strides = [1, 1]} : vector<2x128xf32> to vector<2x32xf32>
    %112 = arith.mulf %111, %108 : vector<2x32xf32>
    %113 = arith.addf %110, %112 : vector<2x32xf32>
    %114 = vector.extract_strided_slice %106 {offsets = [0, 96], sizes = [2, 32], strides = [1, 1]} : vector<2x128xf32> to vector<2x32xf32>
    %115 = math.tanh %113 : vector<2x32xf32>
    %116 = arith.mulf %114, %115 : vector<2x32xf32>
    %cst_59 = arith.constant 1.000000e-01 : f32
    %117 = vector.broadcast %cst_59 : f32 to vector<2x32xf32>
    %118 = arith.mulf %117, %32 : vector<2x32xf32>
    %cst_60 = arith.constant 0.899999976 : f32
    %119 = vector.broadcast %cst_60 : f32 to vector<2x32xf32>
    %120 = arith.mulf %119, %116 : vector<2x32xf32>
    %121 = arith.addf %118, %120 : vector<2x32xf32>
    %cst_61 = arith.constant 1.000000e-01 : f32
    %122 = vector.broadcast %cst_61 : f32 to vector<2x32xf32>
    %123 = arith.mulf %122, %33 : vector<2x32xf32>
    %cst_62 = arith.constant 0.899999976 : f32
    %124 = vector.broadcast %cst_62 : f32 to vector<2x32xf32>
    %125 = arith.mulf %124, %113 : vector<2x32xf32>
    %126 = arith.addf %123, %125 : vector<2x32xf32>
    %127 = tpu.concatenate %121, %64 in 1 : vector<2x32xf32>, vector<2x32xf32> -> vector<2x64xf32>
    %c0_63 = arith.constant 0 : index
    %c0_64 = arith.constant 0 : index
    %128 = vector.load %arg14[%c0_63, %c0_64] : memref<32x144xf32, #tpu.memory_space<vmem>>, vector<32x144xf32>
    %cst_65 = arith.constant dense<0.000000e+00> : vector<2x144xf32>
    %129 = tpu.matmul %90, %128, %cst_65 {dimension_numbers = #tpu.dot_dimension_numbers<[1], [0], [0], [1], [0, 0, 1, 1], [], []>} : vector<2x32xf32>, vector<32x144xf32>, vector<2x144xf32> -> vector<2x144xf32>
    %130 = vector.extract_strided_slice %129 {offsets = [0, 0], sizes = [2, 128], strides = [1, 1]} : vector<2x144xf32> to vector<2x128xf32>
    %131 = vector.extract_strided_slice %129 {offsets = [0, 128], sizes = [2, 16], strides = [1, 1]} : vector<2x144xf32> to vector<2x16xf32>
    %132 = vector.shape_cast %131 : vector<2x16xf32> to vector<2x1x16xf32>
    %133 = vector.broadcast %132 : vector<2x1x16xf32> to vector<2x16x16xf32>
    %134 = arith.addf %8, %133 : vector<2x16x16xf32>
    %135 = math.tanh %134 : vector<2x16x16xf32>
    %136 = vector.broadcast %28 : vector<1x1x16xf32> to vector<2x16x16xf32>
    %137 = arith.mulf %135, %136 : vector<2x16x16xf32>
    %cst_66 = arith.constant dense<0.000000e+00> : vector<2x16xf32>
    %138 = vector.multi_reduction <add>, %137, %cst_66 [2] : vector<2x16x16xf32> to vector<2x16xf32>
    %139 = vector.broadcast %29 : vector<1x1xf32> to vector<2x16xf32>
    %140 = arith.addf %138, %139 : vector<2x16xf32>
    %cst_67 = arith.constant 0.000000e+00 : f32
    %141 = vector.broadcast %cst_67 : f32 to vector<2x16xf32>
    %142 = arith.cmpf ogt, %1, %141 : vector<2x16xf32>
    %cst_68 = arith.constant -1.000000e+30 : f32
    %143 = vector.broadcast %cst_68 : f32 to vector<2x16xf32>
    %144 = arith.select %142, %140, %143 : vector<2x16xi1>, vector<2x16xf32>
    %cst_69 = arith.constant dense<0xFF800000> : vector<2xf32>
    %145 = vector.multi_reduction <maximumf>, %144, %cst_69 [1] : vector<2x16xf32> to vector<2xf32>
    %146 = vector.shape_cast %145 : vector<2xf32> to vector<2x1xf32>
    %147 = vector.broadcast %146 : vector<2x1xf32> to vector<2x16xf32>
    %148 = arith.subf %144, %147 : vector<2x16xf32>
    %149 = math.exp %148 : vector<2x16xf32>
    %cst_70 = arith.constant dense<0.000000e+00> : vector<2xf32>
    %150 = vector.multi_reduction <add>, %149, %cst_70 [1] : vector<2x16xf32> to vector<2xf32>
    %151 = vector.shape_cast %150 : vector<2xf32> to vector<2x1xf32>
    %152 = tpu.reciprocal %151 {approx = true} : vector<2x1xf32> -> vector<2x1xf32>
    %153 = vector.broadcast %152 : vector<2x1xf32> to vector<2x16xf32>
    %154 = arith.mulf %149, %153 : vector<2x16xf32>
    %155 = vector.shape_cast %154 : vector<2x16xf32> to vector<2x16x1xf32>
    %156 = vector.broadcast %155 : vector<2x16x1xf32> to vector<2x16x32xf32>
    %157 = arith.mulf %0, %156 : vector<2x16x32xf32>
    %cst_71 = arith.constant dense<0.000000e+00> : vector<2x32xf32>
    %158 = vector.multi_reduction <add>, %157, %cst_71 [1] : vector<2x16x32xf32> to vector<2x32xf32>
    %c0_72 = arith.constant 0 : index
    %c0_73 = arith.constant 0 : index
    %159 = vector.load %arg11[%c0_72, %c0_73] : memref<32x128xf32, #tpu.memory_space<vmem>>, vector<32x128xf32>
    %cst_74 = arith.constant dense<0.000000e+00> : vector<2x128xf32>
    %160 = tpu.matmul %158, %159, %cst_74 {dimension_numbers = #tpu.dot_dimension_numbers<[1], [0], [0], [1], [0, 0, 1, 1], [], []>} : vector<2x32xf32>, vector<32x128xf32>, vector<2x128xf32> -> vector<2x128xf32>
    %161 = arith.addf %160, %130 : vector<2x128xf32>
    %162 = vector.extract_strided_slice %27 {offsets = [0, 1, 0], sizes = [2, 1, 128], strides = [1, 1, 1]} : vector<2x8x128xf32> to vector<2x1x128xf32>
    %163 = vector.shape_cast %162 : vector<2x1x128xf32> to vector<2x128xf32>
    %164 = arith.addf %161, %163 : vector<2x128xf32>
    %165 = arith.negf %164 : vector<2x128xf32>
    %166 = math.exp %165 : vector<2x128xf32>
    %cst_75 = arith.constant 1.000000e+00 : f32
    %167 = vector.broadcast %cst_75 : f32 to vector<2x128xf32>
    %168 = arith.addf %167, %166 : vector<2x128xf32>
    %169 = arith.divf %167, %168 : vector<2x128xf32>
    %170 = vector.extract_strided_slice %164 {offsets = [0, 64], sizes = [2, 32], strides = [1, 1]} : vector<2x128xf32> to vector<2x32xf32>
    %171 = math.tanh %170 : vector<2x32xf32>
    %172 = vector.extract_strided_slice %169 {offsets = [0, 32], sizes = [2, 32], strides = [1, 1]} : vector<2x128xf32> to vector<2x32xf32>
    %173 = arith.mulf %172, %95 : vector<2x32xf32>
    %174 = vector.extract_strided_slice %169 {offsets = [0, 0], sizes = [2, 32], strides = [1, 1]} : vector<2x128xf32> to vector<2x32xf32>
    %175 = arith.mulf %174, %171 : vector<2x32xf32>
    %176 = arith.addf %173, %175 : vector<2x32xf32>
    %177 = vector.extract_strided_slice %169 {offsets = [0, 96], sizes = [2, 32], strides = [1, 1]} : vector<2x128xf32> to vector<2x32xf32>
    %178 = math.tanh %176 : vector<2x32xf32>
    %179 = arith.mulf %177, %178 : vector<2x32xf32>
    %cst_76 = arith.constant 1.000000e-01 : f32
    %180 = vector.broadcast %cst_76 : f32 to vector<2x32xf32>
    %181 = arith.mulf %180, %90 : vector<2x32xf32>
    %cst_77 = arith.constant 0.899999976 : f32
    %182 = vector.broadcast %cst_77 : f32 to vector<2x32xf32>
    %183 = arith.mulf %182, %179 : vector<2x32xf32>
    %184 = arith.addf %181, %183 : vector<2x32xf32>
    %cst_78 = arith.constant 1.000000e-01 : f32
    %185 = vector.broadcast %cst_78 : f32 to vector<2x32xf32>
    %186 = arith.mulf %185, %95 : vector<2x32xf32>
    %cst_79 = arith.constant 0.899999976 : f32
    %187 = vector.broadcast %cst_79 : f32 to vector<2x32xf32>
    %188 = arith.mulf %187, %176 : vector<2x32xf32>
    %189 = arith.addf %186, %188 : vector<2x32xf32>
    %190 = tpu.concatenate %184, %121 in 1 : vector<2x32xf32>, vector<2x32xf32> -> vector<2x64xf32>
    %c0_80 = arith.constant 0 : index
    %c0_81 = arith.constant 0 : index
    %191 = vector.load %arg15[%c0_80, %c0_81] : memref<64x128xf32, #tpu.memory_space<vmem>>, vector<64x128xf32>
    %cst_82 = arith.constant dense<0.000000e+00> : vector<2x128xf32>
    %192 = tpu.matmul %190, %191, %cst_82 {dimension_numbers = #tpu.dot_dimension_numbers<[1], [0], [0], [1], [0, 0, 1, 1], [], []>} : vector<2x64xf32>, vector<64x128xf32>, vector<2x128xf32> -> vector<2x128xf32>
    %c0_83 = arith.constant 0 : index
    %c0_84 = arith.constant 0 : index
    %193 = vector.load %arg16[%c0_83, %c0_84] : memref<1x128xf32, #tpu.memory_space<vmem>>, vector<1x128xf32>
    %194 = vector.broadcast %193 : vector<1x128xf32> to vector<2x128xf32>
    %195 = arith.addf %192, %194 : vector<2x128xf32>
    %196 = arith.negf %195 : vector<2x128xf32>
    %197 = math.exp %196 : vector<2x128xf32>
    %cst_85 = arith.constant 1.000000e+00 : f32
    %198 = vector.broadcast %cst_85 : f32 to vector<2x128xf32>
    %199 = arith.addf %198, %197 : vector<2x128xf32>
    %200 = arith.divf %198, %199 : vector<2x128xf32>
    %201 = vector.extract_strided_slice %195 {offsets = [0, 64], sizes = [2, 32], strides = [1, 1]} : vector<2x128xf32> to vector<2x32xf32>
    %202 = math.tanh %201 : vector<2x32xf32>
    %203 = vector.extract_strided_slice %200 {offsets = [0, 32], sizes = [2, 32], strides = [1, 1]} : vector<2x128xf32> to vector<2x32xf32>
    %204 = arith.mulf %203, %126 : vector<2x32xf32>
    %205 = vector.extract_strided_slice %200 {offsets = [0, 0], sizes = [2, 32], strides = [1, 1]} : vector<2x128xf32> to vector<2x32xf32>
    %206 = arith.mulf %205, %202 : vector<2x32xf32>
    %207 = arith.addf %204, %206 : vector<2x32xf32>
    %208 = vector.extract_strided_slice %200 {offsets = [0, 96], sizes = [2, 32], strides = [1, 1]} : vector<2x128xf32> to vector<2x32xf32>
    %209 = math.tanh %207 : vector<2x32xf32>
    %210 = arith.mulf %208, %209 : vector<2x32xf32>
    %cst_86 = arith.constant 1.000000e-01 : f32
    %211 = vector.broadcast %cst_86 : f32 to vector<2x32xf32>
    %212 = arith.mulf %211, %121 : vector<2x32xf32>
    %cst_87 = arith.constant 0.899999976 : f32
    %213 = vector.broadcast %cst_87 : f32 to vector<2x32xf32>
    %214 = arith.mulf %213, %210 : vector<2x32xf32>
    %215 = arith.addf %212, %214 : vector<2x32xf32>
    %cst_88 = arith.constant 1.000000e-01 : f32
    %216 = vector.broadcast %cst_88 : f32 to vector<2x32xf32>
    %217 = arith.mulf %216, %126 : vector<2x32xf32>
    %cst_89 = arith.constant 0.899999976 : f32
    %218 = vector.broadcast %cst_89 : f32 to vector<2x32xf32>
    %219 = arith.mulf %218, %207 : vector<2x32xf32>
    %220 = arith.addf %217, %219 : vector<2x32xf32>
    %221 = tpu.concatenate %215, %158 in 1 : vector<2x32xf32>, vector<2x32xf32> -> vector<2x64xf32>
    %c0_90 = arith.constant 0 : index
    %c0_91 = arith.constant 0 : index
    %222 = vector.load %arg14[%c0_90, %c0_91] : memref<32x144xf32, #tpu.memory_space<vmem>>, vector<32x144xf32>
    %cst_92 = arith.constant dense<0.000000e+00> : vector<2x144xf32>
    %223 = tpu.matmul %184, %222, %cst_92 {dimension_numbers = #tpu.dot_dimension_numbers<[1], [0], [0], [1], [0, 0, 1, 1], [], []>} : vector<2x32xf32>, vector<32x144xf32>, vector<2x144xf32> -> vector<2x144xf32>
    %224 = vector.extract_strided_slice %223 {offsets = [0, 0], sizes = [2, 128], strides = [1, 1]} : vector<2x144xf32> to vector<2x128xf32>
    %225 = vector.extract_strided_slice %223 {offsets = [0, 128], sizes = [2, 16], strides = [1, 1]} : vector<2x144xf32> to vector<2x16xf32>
    %226 = vector.shape_cast %225 : vector<2x16xf32> to vector<2x1x16xf32>
    %227 = vector.broadcast %226 : vector<2x1x16xf32> to vector<2x16x16xf32>
    %228 = arith.addf %8, %227 : vector<2x16x16xf32>
    %229 = math.tanh %228 : vector<2x16x16xf32>
    %230 = vector.broadcast %28 : vector<1x1x16xf32> to vector<2x16x16xf32>
    %231 = arith.mulf %229, %230 : vector<2x16x16xf32>
    %cst_93 = arith.constant dense<0.000000e+00> : vector<2x16xf32>
    %232 = vector.multi_reduction <add>, %231, %cst_93 [2] : vector<2x16x16xf32> to vector<2x16xf32>
    %233 = vector.broadcast %29 : vector<1x1xf32> to vector<2x16xf32>
    %234 = arith.addf %232, %233 : vector<2x16xf32>
    %cst_94 = arith.constant 0.000000e+00 : f32
    %235 = vector.broadcast %cst_94 : f32 to vector<2x16xf32>
    %236 = arith.cmpf ogt, %1, %235 : vector<2x16xf32>
    %cst_95 = arith.constant -1.000000e+30 : f32
    %237 = vector.broadcast %cst_95 : f32 to vector<2x16xf32>
    %238 = arith.select %236, %234, %237 : vector<2x16xi1>, vector<2x16xf32>
    %cst_96 = arith.constant dense<0xFF800000> : vector<2xf32>
    %239 = vector.multi_reduction <maximumf>, %238, %cst_96 [1] : vector<2x16xf32> to vector<2xf32>
    %240 = vector.shape_cast %239 : vector<2xf32> to vector<2x1xf32>
    %241 = vector.broadcast %240 : vector<2x1xf32> to vector<2x16xf32>
    %242 = arith.subf %238, %241 : vector<2x16xf32>
    %243 = math.exp %242 : vector<2x16xf32>
    %cst_97 = arith.constant dense<0.000000e+00> : vector<2xf32>
    %244 = vector.multi_reduction <add>, %243, %cst_97 [1] : vector<2x16xf32> to vector<2xf32>
    %245 = vector.shape_cast %244 : vector<2xf32> to vector<2x1xf32>
    %246 = tpu.reciprocal %245 {approx = true} : vector<2x1xf32> -> vector<2x1xf32>
    %247 = vector.broadcast %246 : vector<2x1xf32> to vector<2x16xf32>
    %248 = arith.mulf %243, %247 : vector<2x16xf32>
    %249 = vector.shape_cast %248 : vector<2x16xf32> to vector<2x16x1xf32>
    %250 = vector.broadcast %249 : vector<2x16x1xf32> to vector<2x16x32xf32>
    %251 = arith.mulf %0, %250 : vector<2x16x32xf32>
    %cst_98 = arith.constant dense<0.000000e+00> : vector<2x32xf32>
    %252 = vector.multi_reduction <add>, %251, %cst_98 [1] : vector<2x16x32xf32> to vector<2x32xf32>
    %c0_99 = arith.constant 0 : index
    %c0_100 = arith.constant 0 : index
    %253 = vector.load %arg11[%c0_99, %c0_100] : memref<32x128xf32, #tpu.memory_space<vmem>>, vector<32x128xf32>
    %cst_101 = arith.constant dense<0.000000e+00> : vector<2x128xf32>
    %254 = tpu.matmul %252, %253, %cst_101 {dimension_numbers = #tpu.dot_dimension_numbers<[1], [0], [0], [1], [0, 0, 1, 1], [], []>} : vector<2x32xf32>, vector<32x128xf32>, vector<2x128xf32> -> vector<2x128xf32>
    %255 = arith.addf %254, %224 : vector<2x128xf32>
    %256 = vector.extract_strided_slice %27 {offsets = [0, 2, 0], sizes = [2, 1, 128], strides = [1, 1, 1]} : vector<2x8x128xf32> to vector<2x1x128xf32>
    %257 = vector.shape_cast %256 : vector<2x1x128xf32> to vector<2x128xf32>
    %258 = arith.addf %255, %257 : vector<2x128xf32>
    %259 = arith.negf %258 : vector<2x128xf32>
    %260 = math.exp %259 : vector<2x128xf32>
    %cst_102 = arith.constant 1.000000e+00 : f32
    %261 = vector.broadcast %cst_102 : f32 to vector<2x128xf32>
    %262 = arith.addf %261, %260 : vector<2x128xf32>
    %263 = arith.divf %261, %262 : vector<2x128xf32>
    %264 = vector.extract_strided_slice %258 {offsets = [0, 64], sizes = [2, 32], strides = [1, 1]} : vector<2x128xf32> to vector<2x32xf32>
    %265 = math.tanh %264 : vector<2x32xf32>
    %266 = vector.extract_strided_slice %263 {offsets = [0, 32], sizes = [2, 32], strides = [1, 1]} : vector<2x128xf32> to vector<2x32xf32>
    %267 = arith.mulf %266, %189 : vector<2x32xf32>
    %268 = vector.extract_strided_slice %263 {offsets = [0, 0], sizes = [2, 32], strides = [1, 1]} : vector<2x128xf32> to vector<2x32xf32>
    %269 = arith.mulf %268, %265 : vector<2x32xf32>
    %270 = arith.addf %267, %269 : vector<2x32xf32>
    %271 = vector.extract_strided_slice %263 {offsets = [0, 96], sizes = [2, 32], strides = [1, 1]} : vector<2x128xf32> to vector<2x32xf32>
    %272 = math.tanh %270 : vector<2x32xf32>
    %273 = arith.mulf %271, %272 : vector<2x32xf32>
    %cst_103 = arith.constant 1.000000e-01 : f32
    %274 = vector.broadcast %cst_103 : f32 to vector<2x32xf32>
    %275 = arith.mulf %274, %184 : vector<2x32xf32>
    %cst_104 = arith.constant 0.899999976 : f32
    %276 = vector.broadcast %cst_104 : f32 to vector<2x32xf32>
    %277 = arith.mulf %276, %273 : vector<2x32xf32>
    %278 = arith.addf %275, %277 : vector<2x32xf32>
    %cst_105 = arith.constant 1.000000e-01 : f32
    %279 = vector.broadcast %cst_105 : f32 to vector<2x32xf32>
    %280 = arith.mulf %279, %189 : vector<2x32xf32>
    %cst_106 = arith.constant 0.899999976 : f32
    %281 = vector.broadcast %cst_106 : f32 to vector<2x32xf32>
    %282 = arith.mulf %281, %270 : vector<2x32xf32>
    %283 = arith.addf %280, %282 : vector<2x32xf32>
    %284 = tpu.concatenate %278, %215 in 1 : vector<2x32xf32>, vector<2x32xf32> -> vector<2x64xf32>
    %c0_107 = arith.constant 0 : index
    %c0_108 = arith.constant 0 : index
    %285 = vector.load %arg15[%c0_107, %c0_108] : memref<64x128xf32, #tpu.memory_space<vmem>>, vector<64x128xf32>
    %cst_109 = arith.constant dense<0.000000e+00> : vector<2x128xf32>
    %286 = tpu.matmul %284, %285, %cst_109 {dimension_numbers = #tpu.dot_dimension_numbers<[1], [0], [0], [1], [0, 0, 1, 1], [], []>} : vector<2x64xf32>, vector<64x128xf32>, vector<2x128xf32> -> vector<2x128xf32>
    %c0_110 = arith.constant 0 : index
    %c0_111 = arith.constant 0 : index
    %287 = vector.load %arg16[%c0_110, %c0_111] : memref<1x128xf32, #tpu.memory_space<vmem>>, vector<1x128xf32>
    %288 = vector.broadcast %287 : vector<1x128xf32> to vector<2x128xf32>
    %289 = arith.addf %286, %288 : vector<2x128xf32>
    %290 = arith.negf %289 : vector<2x128xf32>
    %291 = math.exp %290 : vector<2x128xf32>
    %cst_112 = arith.constant 1.000000e+00 : f32
    %292 = vector.broadcast %cst_112 : f32 to vector<2x128xf32>
    %293 = arith.addf %292, %291 : vector<2x128xf32>
    %294 = arith.divf %292, %293 : vector<2x128xf32>
    %295 = vector.extract_strided_slice %289 {offsets = [0, 64], sizes = [2, 32], strides = [1, 1]} : vector<2x128xf32> to vector<2x32xf32>
    %296 = math.tanh %295 : vector<2x32xf32>
    %297 = vector.extract_strided_slice %294 {offsets = [0, 32], sizes = [2, 32], strides = [1, 1]} : vector<2x128xf32> to vector<2x32xf32>
    %298 = arith.mulf %297, %220 : vector<2x32xf32>
    %299 = vector.extract_strided_slice %294 {offsets = [0, 0], sizes = [2, 32], strides = [1, 1]} : vector<2x128xf32> to vector<2x32xf32>
    %300 = arith.mulf %299, %296 : vector<2x32xf32>
    %301 = arith.addf %298, %300 : vector<2x32xf32>
    %302 = vector.extract_strided_slice %294 {offsets = [0, 96], sizes = [2, 32], strides = [1, 1]} : vector<2x128xf32> to vector<2x32xf32>
    %303 = math.tanh %301 : vector<2x32xf32>
    %304 = arith.mulf %302, %303 : vector<2x32xf32>
    %cst_113 = arith.constant 1.000000e-01 : f32
    %305 = vector.broadcast %cst_113 : f32 to vector<2x32xf32>
    %306 = arith.mulf %305, %215 : vector<2x32xf32>
    %cst_114 = arith.constant 0.899999976 : f32
    %307 = vector.broadcast %cst_114 : f32 to vector<2x32xf32>
    %308 = arith.mulf %307, %304 : vector<2x32xf32>
    %309 = arith.addf %306, %308 : vector<2x32xf32>
    %cst_115 = arith.constant 1.000000e-01 : f32
    %310 = vector.broadcast %cst_115 : f32 to vector<2x32xf32>
    %311 = arith.mulf %310, %220 : vector<2x32xf32>
    %cst_116 = arith.constant 0.899999976 : f32
    %312 = vector.broadcast %cst_116 : f32 to vector<2x32xf32>
    %313 = arith.mulf %312, %301 : vector<2x32xf32>
    %314 = arith.addf %311, %313 : vector<2x32xf32>
    %315 = tpu.concatenate %309, %252 in 1 : vector<2x32xf32>, vector<2x32xf32> -> vector<2x64xf32>
    %c0_117 = arith.constant 0 : index
    %c0_118 = arith.constant 0 : index
    %316 = vector.load %arg14[%c0_117, %c0_118] : memref<32x144xf32, #tpu.memory_space<vmem>>, vector<32x144xf32>
    %cst_119 = arith.constant dense<0.000000e+00> : vector<2x144xf32>
    %317 = tpu.matmul %278, %316, %cst_119 {dimension_numbers = #tpu.dot_dimension_numbers<[1], [0], [0], [1], [0, 0, 1, 1], [], []>} : vector<2x32xf32>, vector<32x144xf32>, vector<2x144xf32> -> vector<2x144xf32>
    %318 = vector.extract_strided_slice %317 {offsets = [0, 0], sizes = [2, 128], strides = [1, 1]} : vector<2x144xf32> to vector<2x128xf32>
    %319 = vector.extract_strided_slice %317 {offsets = [0, 128], sizes = [2, 16], strides = [1, 1]} : vector<2x144xf32> to vector<2x16xf32>
    %320 = vector.shape_cast %319 : vector<2x16xf32> to vector<2x1x16xf32>
    %321 = vector.broadcast %320 : vector<2x1x16xf32> to vector<2x16x16xf32>
    %322 = arith.addf %8, %321 : vector<2x16x16xf32>
    %323 = math.tanh %322 : vector<2x16x16xf32>
    %324 = vector.broadcast %28 : vector<1x1x16xf32> to vector<2x16x16xf32>
    %325 = arith.mulf %323, %324 : vector<2x16x16xf32>
    %cst_120 = arith.constant dense<0.000000e+00> : vector<2x16xf32>
    %326 = vector.multi_reduction <add>, %325, %cst_120 [2] : vector<2x16x16xf32> to vector<2x16xf32>
    %327 = vector.broadcast %29 : vector<1x1xf32> to vector<2x16xf32>
    %328 = arith.addf %326, %327 : vector<2x16xf32>
    %cst_121 = arith.constant 0.000000e+00 : f32
    %329 = vector.broadcast %cst_121 : f32 to vector<2x16xf32>
    %330 = arith.cmpf ogt, %1, %329 : vector<2x16xf32>
    %cst_122 = arith.constant -1.000000e+30 : f32
    %331 = vector.broadcast %cst_122 : f32 to vector<2x16xf32>
    %332 = arith.select %330, %328, %331 : vector<2x16xi1>, vector<2x16xf32>
    %cst_123 = arith.constant dense<0xFF800000> : vector<2xf32>
    %333 = vector.multi_reduction <maximumf>, %332, %cst_123 [1] : vector<2x16xf32> to vector<2xf32>
    %334 = vector.shape_cast %333 : vector<2xf32> to vector<2x1xf32>
    %335 = vector.broadcast %334 : vector<2x1xf32> to vector<2x16xf32>
    %336 = arith.subf %332, %335 : vector<2x16xf32>
    %337 = math.exp %336 : vector<2x16xf32>
    %cst_124 = arith.constant dense<0.000000e+00> : vector<2xf32>
    %338 = vector.multi_reduction <add>, %337, %cst_124 [1] : vector<2x16xf32> to vector<2xf32>
    %339 = vector.shape_cast %338 : vector<2xf32> to vector<2x1xf32>
    %340 = tpu.reciprocal %339 {approx = true} : vector<2x1xf32> -> vector<2x1xf32>
    %341 = vector.broadcast %340 : vector<2x1xf32> to vector<2x16xf32>
    %342 = arith.mulf %337, %341 : vector<2x16xf32>
    %343 = vector.shape_cast %342 : vector<2x16xf32> to vector<2x16x1xf32>
    %344 = vector.broadcast %343 : vector<2x16x1xf32> to vector<2x16x32xf32>
    %345 = arith.mulf %0, %344 : vector<2x16x32xf32>
    %cst_125 = arith.constant dense<0.000000e+00> : vector<2x32xf32>
    %346 = vector.multi_reduction <add>, %345, %cst_125 [1] : vector<2x16x32xf32> to vector<2x32xf32>
    %c0_126 = arith.constant 0 : index
    %c0_127 = arith.constant 0 : index
    %347 = vector.load %arg11[%c0_126, %c0_127] : memref<32x128xf32, #tpu.memory_space<vmem>>, vector<32x128xf32>
    %cst_128 = arith.constant dense<0.000000e+00> : vector<2x128xf32>
    %348 = tpu.matmul %346, %347, %cst_128 {dimension_numbers = #tpu.dot_dimension_numbers<[1], [0], [0], [1], [0, 0, 1, 1], [], []>} : vector<2x32xf32>, vector<32x128xf32>, vector<2x128xf32> -> vector<2x128xf32>
    %349 = arith.addf %348, %318 : vector<2x128xf32>
    %350 = vector.extract_strided_slice %27 {offsets = [0, 3, 0], sizes = [2, 1, 128], strides = [1, 1, 1]} : vector<2x8x128xf32> to vector<2x1x128xf32>
    %351 = vector.shape_cast %350 : vector<2x1x128xf32> to vector<2x128xf32>
    %352 = arith.addf %349, %351 : vector<2x128xf32>
    %353 = arith.negf %352 : vector<2x128xf32>
    %354 = math.exp %353 : vector<2x128xf32>
    %cst_129 = arith.constant 1.000000e+00 : f32
    %355 = vector.broadcast %cst_129 : f32 to vector<2x128xf32>
    %356 = arith.addf %355, %354 : vector<2x128xf32>
    %357 = arith.divf %355, %356 : vector<2x128xf32>
    %358 = vector.extract_strided_slice %352 {offsets = [0, 64], sizes = [2, 32], strides = [1, 1]} : vector<2x128xf32> to vector<2x32xf32>
    %359 = math.tanh %358 : vector<2x32xf32>
    %360 = vector.extract_strided_slice %357 {offsets = [0, 32], sizes = [2, 32], strides = [1, 1]} : vector<2x128xf32> to vector<2x32xf32>
    %361 = arith.mulf %360, %283 : vector<2x32xf32>
    %362 = vector.extract_strided_slice %357 {offsets = [0, 0], sizes = [2, 32], strides = [1, 1]} : vector<2x128xf32> to vector<2x32xf32>
    %363 = arith.mulf %362, %359 : vector<2x32xf32>
    %364 = arith.addf %361, %363 : vector<2x32xf32>
    %365 = vector.extract_strided_slice %357 {offsets = [0, 96], sizes = [2, 32], strides = [1, 1]} : vector<2x128xf32> to vector<2x32xf32>
    %366 = math.tanh %364 : vector<2x32xf32>
    %367 = arith.mulf %365, %366 : vector<2x32xf32>
    %cst_130 = arith.constant 1.000000e-01 : f32
    %368 = vector.broadcast %cst_130 : f32 to vector<2x32xf32>
    %369 = arith.mulf %368, %278 : vector<2x32xf32>
    %cst_131 = arith.constant 0.899999976 : f32
    %370 = vector.broadcast %cst_131 : f32 to vector<2x32xf32>
    %371 = arith.mulf %370, %367 : vector<2x32xf32>
    %372 = arith.addf %369, %371 : vector<2x32xf32>
    %cst_132 = arith.constant 1.000000e-01 : f32
    %373 = vector.broadcast %cst_132 : f32 to vector<2x32xf32>
    %374 = arith.mulf %373, %283 : vector<2x32xf32>
    %cst_133 = arith.constant 0.899999976 : f32
    %375 = vector.broadcast %cst_133 : f32 to vector<2x32xf32>
    %376 = arith.mulf %375, %364 : vector<2x32xf32>
    %377 = arith.addf %374, %376 : vector<2x32xf32>
    %378 = tpu.concatenate %372, %309 in 1 : vector<2x32xf32>, vector<2x32xf32> -> vector<2x64xf32>
    %c0_134 = arith.constant 0 : index
    %c0_135 = arith.constant 0 : index
    %379 = vector.load %arg15[%c0_134, %c0_135] : memref<64x128xf32, #tpu.memory_space<vmem>>, vector<64x128xf32>
    %cst_136 = arith.constant dense<0.000000e+00> : vector<2x128xf32>
    %380 = tpu.matmul %378, %379, %cst_136 {dimension_numbers = #tpu.dot_dimension_numbers<[1], [0], [0], [1], [0, 0, 1, 1], [], []>} : vector<2x64xf32>, vector<64x128xf32>, vector<2x128xf32> -> vector<2x128xf32>
    %c0_137 = arith.constant 0 : index
    %c0_138 = arith.constant 0 : index
    %381 = vector.load %arg16[%c0_137, %c0_138] : memref<1x128xf32, #tpu.memory_space<vmem>>, vector<1x128xf32>
    %382 = vector.broadcast %381 : vector<1x128xf32> to vector<2x128xf32>
    %383 = arith.addf %380, %382 : vector<2x128xf32>
    %384 = arith.negf %383 : vector<2x128xf32>
    %385 = math.exp %384 : vector<2x128xf32>
    %cst_139 = arith.constant 1.000000e+00 : f32
    %386 = vector.broadcast %cst_139 : f32 to vector<2x128xf32>
    %387 = arith.addf %386, %385 : vector<2x128xf32>
    %388 = arith.divf %386, %387 : vector<2x128xf32>
    %389 = vector.extract_strided_slice %383 {offsets = [0, 64], sizes = [2, 32], strides = [1, 1]} : vector<2x128xf32> to vector<2x32xf32>
    %390 = math.tanh %389 : vector<2x32xf32>
    %391 = vector.extract_strided_slice %388 {offsets = [0, 32], sizes = [2, 32], strides = [1, 1]} : vector<2x128xf32> to vector<2x32xf32>
    %392 = arith.mulf %391, %314 : vector<2x32xf32>
    %393 = vector.extract_strided_slice %388 {offsets = [0, 0], sizes = [2, 32], strides = [1, 1]} : vector<2x128xf32> to vector<2x32xf32>
    %394 = arith.mulf %393, %390 : vector<2x32xf32>
    %395 = arith.addf %392, %394 : vector<2x32xf32>
    %396 = vector.extract_strided_slice %388 {offsets = [0, 96], sizes = [2, 32], strides = [1, 1]} : vector<2x128xf32> to vector<2x32xf32>
    %397 = math.tanh %395 : vector<2x32xf32>
    %398 = arith.mulf %396, %397 : vector<2x32xf32>
    %cst_140 = arith.constant 1.000000e-01 : f32
    %399 = vector.broadcast %cst_140 : f32 to vector<2x32xf32>
    %400 = arith.mulf %399, %309 : vector<2x32xf32>
    %cst_141 = arith.constant 0.899999976 : f32
    %401 = vector.broadcast %cst_141 : f32 to vector<2x32xf32>
    %402 = arith.mulf %401, %398 : vector<2x32xf32>
    %403 = arith.addf %400, %402 : vector<2x32xf32>
    %cst_142 = arith.constant 1.000000e-01 : f32
    %404 = vector.broadcast %cst_142 : f32 to vector<2x32xf32>
    %405 = arith.mulf %404, %314 : vector<2x32xf32>
    %cst_143 = arith.constant 0.899999976 : f32
    %406 = vector.broadcast %cst_143 : f32 to vector<2x32xf32>
    %407 = arith.mulf %406, %395 : vector<2x32xf32>
    %408 = arith.addf %405, %407 : vector<2x32xf32>
    %409 = tpu.concatenate %403, %346 in 1 : vector<2x32xf32>, vector<2x32xf32> -> vector<2x64xf32>
    %c0_144 = arith.constant 0 : index
    %c0_145 = arith.constant 0 : index
    %410 = vector.load %arg14[%c0_144, %c0_145] : memref<32x144xf32, #tpu.memory_space<vmem>>, vector<32x144xf32>
    %cst_146 = arith.constant dense<0.000000e+00> : vector<2x144xf32>
    %411 = tpu.matmul %372, %410, %cst_146 {dimension_numbers = #tpu.dot_dimension_numbers<[1], [0], [0], [1], [0, 0, 1, 1], [], []>} : vector<2x32xf32>, vector<32x144xf32>, vector<2x144xf32> -> vector<2x144xf32>
    %412 = vector.extract_strided_slice %411 {offsets = [0, 0], sizes = [2, 128], strides = [1, 1]} : vector<2x144xf32> to vector<2x128xf32>
    %413 = vector.extract_strided_slice %411 {offsets = [0, 128], sizes = [2, 16], strides = [1, 1]} : vector<2x144xf32> to vector<2x16xf32>
    %414 = vector.shape_cast %413 : vector<2x16xf32> to vector<2x1x16xf32>
    %415 = vector.broadcast %414 : vector<2x1x16xf32> to vector<2x16x16xf32>
    %416 = arith.addf %8, %415 : vector<2x16x16xf32>
    %417 = math.tanh %416 : vector<2x16x16xf32>
    %418 = vector.broadcast %28 : vector<1x1x16xf32> to vector<2x16x16xf32>
    %419 = arith.mulf %417, %418 : vector<2x16x16xf32>
    %cst_147 = arith.constant dense<0.000000e+00> : vector<2x16xf32>
    %420 = vector.multi_reduction <add>, %419, %cst_147 [2] : vector<2x16x16xf32> to vector<2x16xf32>
    %421 = vector.broadcast %29 : vector<1x1xf32> to vector<2x16xf32>
    %422 = arith.addf %420, %421 : vector<2x16xf32>
    %cst_148 = arith.constant 0.000000e+00 : f32
    %423 = vector.broadcast %cst_148 : f32 to vector<2x16xf32>
    %424 = arith.cmpf ogt, %1, %423 : vector<2x16xf32>
    %cst_149 = arith.constant -1.000000e+30 : f32
    %425 = vector.broadcast %cst_149 : f32 to vector<2x16xf32>
    %426 = arith.select %424, %422, %425 : vector<2x16xi1>, vector<2x16xf32>
    %cst_150 = arith.constant dense<0xFF800000> : vector<2xf32>
    %427 = vector.multi_reduction <maximumf>, %426, %cst_150 [1] : vector<2x16xf32> to vector<2xf32>
    %428 = vector.shape_cast %427 : vector<2xf32> to vector<2x1xf32>
    %429 = vector.broadcast %428 : vector<2x1xf32> to vector<2x16xf32>
    %430 = arith.subf %426, %429 : vector<2x16xf32>
    %431 = math.exp %430 : vector<2x16xf32>
    %cst_151 = arith.constant dense<0.000000e+00> : vector<2xf32>
    %432 = vector.multi_reduction <add>, %431, %cst_151 [1] : vector<2x16xf32> to vector<2xf32>
    %433 = vector.shape_cast %432 : vector<2xf32> to vector<2x1xf32>
    %434 = tpu.reciprocal %433 {approx = true} : vector<2x1xf32> -> vector<2x1xf32>
    %435 = vector.broadcast %434 : vector<2x1xf32> to vector<2x16xf32>
    %436 = arith.mulf %431, %435 : vector<2x16xf32>
    %437 = vector.shape_cast %436 : vector<2x16xf32> to vector<2x16x1xf32>
    %438 = vector.broadcast %437 : vector<2x16x1xf32> to vector<2x16x32xf32>
    %439 = arith.mulf %0, %438 : vector<2x16x32xf32>
    %cst_152 = arith.constant dense<0.000000e+00> : vector<2x32xf32>
    %440 = vector.multi_reduction <add>, %439, %cst_152 [1] : vector<2x16x32xf32> to vector<2x32xf32>
    %c0_153 = arith.constant 0 : index
    %c0_154 = arith.constant 0 : index
    %441 = vector.load %arg11[%c0_153, %c0_154] : memref<32x128xf32, #tpu.memory_space<vmem>>, vector<32x128xf32>
    %cst_155 = arith.constant dense<0.000000e+00> : vector<2x128xf32>
    %442 = tpu.matmul %440, %441, %cst_155 {dimension_numbers = #tpu.dot_dimension_numbers<[1], [0], [0], [1], [0, 0, 1, 1], [], []>} : vector<2x32xf32>, vector<32x128xf32>, vector<2x128xf32> -> vector<2x128xf32>
    %443 = arith.addf %442, %412 : vector<2x128xf32>
    %444 = vector.extract_strided_slice %27 {offsets = [0, 4, 0], sizes = [2, 1, 128], strides = [1, 1, 1]} : vector<2x8x128xf32> to vector<2x1x128xf32>
    %445 = vector.shape_cast %444 : vector<2x1x128xf32> to vector<2x128xf32>
    %446 = arith.addf %443, %445 : vector<2x128xf32>
    %447 = arith.negf %446 : vector<2x128xf32>
    %448 = math.exp %447 : vector<2x128xf32>
    %cst_156 = arith.constant 1.000000e+00 : f32
    %449 = vector.broadcast %cst_156 : f32 to vector<2x128xf32>
    %450 = arith.addf %449, %448 : vector<2x128xf32>
    %451 = arith.divf %449, %450 : vector<2x128xf32>
    %452 = vector.extract_strided_slice %446 {offsets = [0, 64], sizes = [2, 32], strides = [1, 1]} : vector<2x128xf32> to vector<2x32xf32>
    %453 = math.tanh %452 : vector<2x32xf32>
    %454 = vector.extract_strided_slice %451 {offsets = [0, 32], sizes = [2, 32], strides = [1, 1]} : vector<2x128xf32> to vector<2x32xf32>
    %455 = arith.mulf %454, %377 : vector<2x32xf32>
    %456 = vector.extract_strided_slice %451 {offsets = [0, 0], sizes = [2, 32], strides = [1, 1]} : vector<2x128xf32> to vector<2x32xf32>
    %457 = arith.mulf %456, %453 : vector<2x32xf32>
    %458 = arith.addf %455, %457 : vector<2x32xf32>
    %459 = vector.extract_strided_slice %451 {offsets = [0, 96], sizes = [2, 32], strides = [1, 1]} : vector<2x128xf32> to vector<2x32xf32>
    %460 = math.tanh %458 : vector<2x32xf32>
    %461 = arith.mulf %459, %460 : vector<2x32xf32>
    %cst_157 = arith.constant 1.000000e-01 : f32
    %462 = vector.broadcast %cst_157 : f32 to vector<2x32xf32>
    %463 = arith.mulf %462, %372 : vector<2x32xf32>
    %cst_158 = arith.constant 0.899999976 : f32
    %464 = vector.broadcast %cst_158 : f32 to vector<2x32xf32>
    %465 = arith.mulf %464, %461 : vector<2x32xf32>
    %466 = arith.addf %463, %465 : vector<2x32xf32>
    %cst_159 = arith.constant 1.000000e-01 : f32
    %467 = vector.broadcast %cst_159 : f32 to vector<2x32xf32>
    %468 = arith.mulf %467, %377 : vector<2x32xf32>
    %cst_160 = arith.constant 0.899999976 : f32
    %469 = vector.broadcast %cst_160 : f32 to vector<2x32xf32>
    %470 = arith.mulf %469, %458 : vector<2x32xf32>
    %471 = arith.addf %468, %470 : vector<2x32xf32>
    %472 = tpu.concatenate %466, %403 in 1 : vector<2x32xf32>, vector<2x32xf32> -> vector<2x64xf32>
    %c0_161 = arith.constant 0 : index
    %c0_162 = arith.constant 0 : index
    %473 = vector.load %arg15[%c0_161, %c0_162] : memref<64x128xf32, #tpu.memory_space<vmem>>, vector<64x128xf32>
    %cst_163 = arith.constant dense<0.000000e+00> : vector<2x128xf32>
    %474 = tpu.matmul %472, %473, %cst_163 {dimension_numbers = #tpu.dot_dimension_numbers<[1], [0], [0], [1], [0, 0, 1, 1], [], []>} : vector<2x64xf32>, vector<64x128xf32>, vector<2x128xf32> -> vector<2x128xf32>
    %c0_164 = arith.constant 0 : index
    %c0_165 = arith.constant 0 : index
    %475 = vector.load %arg16[%c0_164, %c0_165] : memref<1x128xf32, #tpu.memory_space<vmem>>, vector<1x128xf32>
    %476 = vector.broadcast %475 : vector<1x128xf32> to vector<2x128xf32>
    %477 = arith.addf %474, %476 : vector<2x128xf32>
    %478 = arith.negf %477 : vector<2x128xf32>
    %479 = math.exp %478 : vector<2x128xf32>
    %cst_166 = arith.constant 1.000000e+00 : f32
    %480 = vector.broadcast %cst_166 : f32 to vector<2x128xf32>
    %481 = arith.addf %480, %479 : vector<2x128xf32>
    %482 = arith.divf %480, %481 : vector<2x128xf32>
    %483 = vector.extract_strided_slice %477 {offsets = [0, 64], sizes = [2, 32], strides = [1, 1]} : vector<2x128xf32> to vector<2x32xf32>
    %484 = math.tanh %483 : vector<2x32xf32>
    %485 = vector.extract_strided_slice %482 {offsets = [0, 32], sizes = [2, 32], strides = [1, 1]} : vector<2x128xf32> to vector<2x32xf32>
    %486 = arith.mulf %485, %408 : vector<2x32xf32>
    %487 = vector.extract_strided_slice %482 {offsets = [0, 0], sizes = [2, 32], strides = [1, 1]} : vector<2x128xf32> to vector<2x32xf32>
    %488 = arith.mulf %487, %484 : vector<2x32xf32>
    %489 = arith.addf %486, %488 : vector<2x32xf32>
    %490 = vector.extract_strided_slice %482 {offsets = [0, 96], sizes = [2, 32], strides = [1, 1]} : vector<2x128xf32> to vector<2x32xf32>
    %491 = math.tanh %489 : vector<2x32xf32>
    %492 = arith.mulf %490, %491 : vector<2x32xf32>
    %cst_167 = arith.constant 1.000000e-01 : f32
    %493 = vector.broadcast %cst_167 : f32 to vector<2x32xf32>
    %494 = arith.mulf %493, %403 : vector<2x32xf32>
    %cst_168 = arith.constant 0.899999976 : f32
    %495 = vector.broadcast %cst_168 : f32 to vector<2x32xf32>
    %496 = arith.mulf %495, %492 : vector<2x32xf32>
    %497 = arith.addf %494, %496 : vector<2x32xf32>
    %cst_169 = arith.constant 1.000000e-01 : f32
    %498 = vector.broadcast %cst_169 : f32 to vector<2x32xf32>
    %499 = arith.mulf %498, %408 : vector<2x32xf32>
    %cst_170 = arith.constant 0.899999976 : f32
    %500 = vector.broadcast %cst_170 : f32 to vector<2x32xf32>
    %501 = arith.mulf %500, %489 : vector<2x32xf32>
    %502 = arith.addf %499, %501 : vector<2x32xf32>
    %503 = tpu.concatenate %497, %440 in 1 : vector<2x32xf32>, vector<2x32xf32> -> vector<2x64xf32>
    %c0_171 = arith.constant 0 : index
    %c0_172 = arith.constant 0 : index
    %504 = vector.load %arg14[%c0_171, %c0_172] : memref<32x144xf32, #tpu.memory_space<vmem>>, vector<32x144xf32>
    %cst_173 = arith.constant dense<0.000000e+00> : vector<2x144xf32>
    %505 = tpu.matmul %466, %504, %cst_173 {dimension_numbers = #tpu.dot_dimension_numbers<[1], [0], [0], [1], [0, 0, 1, 1], [], []>} : vector<2x32xf32>, vector<32x144xf32>, vector<2x144xf32> -> vector<2x144xf32>
    %506 = vector.extract_strided_slice %505 {offsets = [0, 0], sizes = [2, 128], strides = [1, 1]} : vector<2x144xf32> to vector<2x128xf32>
    %507 = vector.extract_strided_slice %505 {offsets = [0, 128], sizes = [2, 16], strides = [1, 1]} : vector<2x144xf32> to vector<2x16xf32>
    %508 = vector.shape_cast %507 : vector<2x16xf32> to vector<2x1x16xf32>
    %509 = vector.broadcast %508 : vector<2x1x16xf32> to vector<2x16x16xf32>
    %510 = arith.addf %8, %509 : vector<2x16x16xf32>
    %511 = math.tanh %510 : vector<2x16x16xf32>
    %512 = vector.broadcast %28 : vector<1x1x16xf32> to vector<2x16x16xf32>
    %513 = arith.mulf %511, %512 : vector<2x16x16xf32>
    %cst_174 = arith.constant dense<0.000000e+00> : vector<2x16xf32>
    %514 = vector.multi_reduction <add>, %513, %cst_174 [2] : vector<2x16x16xf32> to vector<2x16xf32>
    %515 = vector.broadcast %29 : vector<1x1xf32> to vector<2x16xf32>
    %516 = arith.addf %514, %515 : vector<2x16xf32>
    %cst_175 = arith.constant 0.000000e+00 : f32
    %517 = vector.broadcast %cst_175 : f32 to vector<2x16xf32>
    %518 = arith.cmpf ogt, %1, %517 : vector<2x16xf32>
    %cst_176 = arith.constant -1.000000e+30 : f32
    %519 = vector.broadcast %cst_176 : f32 to vector<2x16xf32>
    %520 = arith.select %518, %516, %519 : vector<2x16xi1>, vector<2x16xf32>
    %cst_177 = arith.constant dense<0xFF800000> : vector<2xf32>
    %521 = vector.multi_reduction <maximumf>, %520, %cst_177 [1] : vector<2x16xf32> to vector<2xf32>
    %522 = vector.shape_cast %521 : vector<2xf32> to vector<2x1xf32>
    %523 = vector.broadcast %522 : vector<2x1xf32> to vector<2x16xf32>
    %524 = arith.subf %520, %523 : vector<2x16xf32>
    %525 = math.exp %524 : vector<2x16xf32>
    %cst_178 = arith.constant dense<0.000000e+00> : vector<2xf32>
    %526 = vector.multi_reduction <add>, %525, %cst_178 [1] : vector<2x16xf32> to vector<2xf32>
    %527 = vector.shape_cast %526 : vector<2xf32> to vector<2x1xf32>
    %528 = tpu.reciprocal %527 {approx = true} : vector<2x1xf32> -> vector<2x1xf32>
    %529 = vector.broadcast %528 : vector<2x1xf32> to vector<2x16xf32>
    %530 = arith.mulf %525, %529 : vector<2x16xf32>
    %531 = vector.shape_cast %530 : vector<2x16xf32> to vector<2x16x1xf32>
    %532 = vector.broadcast %531 : vector<2x16x1xf32> to vector<2x16x32xf32>
    %533 = arith.mulf %0, %532 : vector<2x16x32xf32>
    %cst_179 = arith.constant dense<0.000000e+00> : vector<2x32xf32>
    %534 = vector.multi_reduction <add>, %533, %cst_179 [1] : vector<2x16x32xf32> to vector<2x32xf32>
    %c0_180 = arith.constant 0 : index
    %c0_181 = arith.constant 0 : index
    %535 = vector.load %arg11[%c0_180, %c0_181] : memref<32x128xf32, #tpu.memory_space<vmem>>, vector<32x128xf32>
    %cst_182 = arith.constant dense<0.000000e+00> : vector<2x128xf32>
    %536 = tpu.matmul %534, %535, %cst_182 {dimension_numbers = #tpu.dot_dimension_numbers<[1], [0], [0], [1], [0, 0, 1, 1], [], []>} : vector<2x32xf32>, vector<32x128xf32>, vector<2x128xf32> -> vector<2x128xf32>
    %537 = arith.addf %536, %506 : vector<2x128xf32>
    %538 = vector.extract_strided_slice %27 {offsets = [0, 5, 0], sizes = [2, 1, 128], strides = [1, 1, 1]} : vector<2x8x128xf32> to vector<2x1x128xf32>
    %539 = vector.shape_cast %538 : vector<2x1x128xf32> to vector<2x128xf32>
    %540 = arith.addf %537, %539 : vector<2x128xf32>
    %541 = arith.negf %540 : vector<2x128xf32>
    %542 = math.exp %541 : vector<2x128xf32>
    %cst_183 = arith.constant 1.000000e+00 : f32
    %543 = vector.broadcast %cst_183 : f32 to vector<2x128xf32>
    %544 = arith.addf %543, %542 : vector<2x128xf32>
    %545 = arith.divf %543, %544 : vector<2x128xf32>
    %546 = vector.extract_strided_slice %540 {offsets = [0, 64], sizes = [2, 32], strides = [1, 1]} : vector<2x128xf32> to vector<2x32xf32>
    %547 = math.tanh %546 : vector<2x32xf32>
    %548 = vector.extract_strided_slice %545 {offsets = [0, 32], sizes = [2, 32], strides = [1, 1]} : vector<2x128xf32> to vector<2x32xf32>
    %549 = arith.mulf %548, %471 : vector<2x32xf32>
    %550 = vector.extract_strided_slice %545 {offsets = [0, 0], sizes = [2, 32], strides = [1, 1]} : vector<2x128xf32> to vector<2x32xf32>
    %551 = arith.mulf %550, %547 : vector<2x32xf32>
    %552 = arith.addf %549, %551 : vector<2x32xf32>
    %553 = vector.extract_strided_slice %545 {offsets = [0, 96], sizes = [2, 32], strides = [1, 1]} : vector<2x128xf32> to vector<2x32xf32>
    %554 = math.tanh %552 : vector<2x32xf32>
    %555 = arith.mulf %553, %554 : vector<2x32xf32>
    %cst_184 = arith.constant 1.000000e-01 : f32
    %556 = vector.broadcast %cst_184 : f32 to vector<2x32xf32>
    %557 = arith.mulf %556, %466 : vector<2x32xf32>
    %cst_185 = arith.constant 0.899999976 : f32
    %558 = vector.broadcast %cst_185 : f32 to vector<2x32xf32>
    %559 = arith.mulf %558, %555 : vector<2x32xf32>
    %560 = arith.addf %557, %559 : vector<2x32xf32>
    %cst_186 = arith.constant 1.000000e-01 : f32
    %561 = vector.broadcast %cst_186 : f32 to vector<2x32xf32>
    %562 = arith.mulf %561, %471 : vector<2x32xf32>
    %cst_187 = arith.constant 0.899999976 : f32
    %563 = vector.broadcast %cst_187 : f32 to vector<2x32xf32>
    %564 = arith.mulf %563, %552 : vector<2x32xf32>
    %565 = arith.addf %562, %564 : vector<2x32xf32>
    %566 = tpu.concatenate %560, %497 in 1 : vector<2x32xf32>, vector<2x32xf32> -> vector<2x64xf32>
    %c0_188 = arith.constant 0 : index
    %c0_189 = arith.constant 0 : index
    %567 = vector.load %arg15[%c0_188, %c0_189] : memref<64x128xf32, #tpu.memory_space<vmem>>, vector<64x128xf32>
    %cst_190 = arith.constant dense<0.000000e+00> : vector<2x128xf32>
    %568 = tpu.matmul %566, %567, %cst_190 {dimension_numbers = #tpu.dot_dimension_numbers<[1], [0], [0], [1], [0, 0, 1, 1], [], []>} : vector<2x64xf32>, vector<64x128xf32>, vector<2x128xf32> -> vector<2x128xf32>
    %c0_191 = arith.constant 0 : index
    %c0_192 = arith.constant 0 : index
    %569 = vector.load %arg16[%c0_191, %c0_192] : memref<1x128xf32, #tpu.memory_space<vmem>>, vector<1x128xf32>
    %570 = vector.broadcast %569 : vector<1x128xf32> to vector<2x128xf32>
    %571 = arith.addf %568, %570 : vector<2x128xf32>
    %572 = arith.negf %571 : vector<2x128xf32>
    %573 = math.exp %572 : vector<2x128xf32>
    %cst_193 = arith.constant 1.000000e+00 : f32
    %574 = vector.broadcast %cst_193 : f32 to vector<2x128xf32>
    %575 = arith.addf %574, %573 : vector<2x128xf32>
    %576 = arith.divf %574, %575 : vector<2x128xf32>
    %577 = vector.extract_strided_slice %571 {offsets = [0, 64], sizes = [2, 32], strides = [1, 1]} : vector<2x128xf32> to vector<2x32xf32>
    %578 = math.tanh %577 : vector<2x32xf32>
    %579 = vector.extract_strided_slice %576 {offsets = [0, 32], sizes = [2, 32], strides = [1, 1]} : vector<2x128xf32> to vector<2x32xf32>
    %580 = arith.mulf %579, %502 : vector<2x32xf32>
    %581 = vector.extract_strided_slice %576 {offsets = [0, 0], sizes = [2, 32], strides = [1, 1]} : vector<2x128xf32> to vector<2x32xf32>
    %582 = arith.mulf %581, %578 : vector<2x32xf32>
    %583 = arith.addf %580, %582 : vector<2x32xf32>
    %584 = vector.extract_strided_slice %576 {offsets = [0, 96], sizes = [2, 32], strides = [1, 1]} : vector<2x128xf32> to vector<2x32xf32>
    %585 = math.tanh %583 : vector<2x32xf32>
    %586 = arith.mulf %584, %585 : vector<2x32xf32>
    %cst_194 = arith.constant 1.000000e-01 : f32
    %587 = vector.broadcast %cst_194 : f32 to vector<2x32xf32>
    %588 = arith.mulf %587, %497 : vector<2x32xf32>
    %cst_195 = arith.constant 0.899999976 : f32
    %589 = vector.broadcast %cst_195 : f32 to vector<2x32xf32>
    %590 = arith.mulf %589, %586 : vector<2x32xf32>
    %591 = arith.addf %588, %590 : vector<2x32xf32>
    %cst_196 = arith.constant 1.000000e-01 : f32
    %592 = vector.broadcast %cst_196 : f32 to vector<2x32xf32>
    %593 = arith.mulf %592, %502 : vector<2x32xf32>
    %cst_197 = arith.constant 0.899999976 : f32
    %594 = vector.broadcast %cst_197 : f32 to vector<2x32xf32>
    %595 = arith.mulf %594, %583 : vector<2x32xf32>
    %596 = arith.addf %593, %595 : vector<2x32xf32>
    %597 = tpu.concatenate %591, %534 in 1 : vector<2x32xf32>, vector<2x32xf32> -> vector<2x64xf32>
    %c0_198 = arith.constant 0 : index
    %c0_199 = arith.constant 0 : index
    %598 = vector.load %arg14[%c0_198, %c0_199] : memref<32x144xf32, #tpu.memory_space<vmem>>, vector<32x144xf32>
    %cst_200 = arith.constant dense<0.000000e+00> : vector<2x144xf32>
    %599 = tpu.matmul %560, %598, %cst_200 {dimension_numbers = #tpu.dot_dimension_numbers<[1], [0], [0], [1], [0, 0, 1, 1], [], []>} : vector<2x32xf32>, vector<32x144xf32>, vector<2x144xf32> -> vector<2x144xf32>
    %600 = vector.extract_strided_slice %599 {offsets = [0, 0], sizes = [2, 128], strides = [1, 1]} : vector<2x144xf32> to vector<2x128xf32>
    %601 = vector.extract_strided_slice %599 {offsets = [0, 128], sizes = [2, 16], strides = [1, 1]} : vector<2x144xf32> to vector<2x16xf32>
    %602 = vector.shape_cast %601 : vector<2x16xf32> to vector<2x1x16xf32>
    %603 = vector.broadcast %602 : vector<2x1x16xf32> to vector<2x16x16xf32>
    %604 = arith.addf %8, %603 : vector<2x16x16xf32>
    %605 = math.tanh %604 : vector<2x16x16xf32>
    %606 = vector.broadcast %28 : vector<1x1x16xf32> to vector<2x16x16xf32>
    %607 = arith.mulf %605, %606 : vector<2x16x16xf32>
    %cst_201 = arith.constant dense<0.000000e+00> : vector<2x16xf32>
    %608 = vector.multi_reduction <add>, %607, %cst_201 [2] : vector<2x16x16xf32> to vector<2x16xf32>
    %609 = vector.broadcast %29 : vector<1x1xf32> to vector<2x16xf32>
    %610 = arith.addf %608, %609 : vector<2x16xf32>
    %cst_202 = arith.constant 0.000000e+00 : f32
    %611 = vector.broadcast %cst_202 : f32 to vector<2x16xf32>
    %612 = arith.cmpf ogt, %1, %611 : vector<2x16xf32>
    %cst_203 = arith.constant -1.000000e+30 : f32
    %613 = vector.broadcast %cst_203 : f32 to vector<2x16xf32>
    %614 = arith.select %612, %610, %613 : vector<2x16xi1>, vector<2x16xf32>
    %cst_204 = arith.constant dense<0xFF800000> : vector<2xf32>
    %615 = vector.multi_reduction <maximumf>, %614, %cst_204 [1] : vector<2x16xf32> to vector<2xf32>
    %616 = vector.shape_cast %615 : vector<2xf32> to vector<2x1xf32>
    %617 = vector.broadcast %616 : vector<2x1xf32> to vector<2x16xf32>
    %618 = arith.subf %614, %617 : vector<2x16xf32>
    %619 = math.exp %618 : vector<2x16xf32>
    %cst_205 = arith.constant dense<0.000000e+00> : vector<2xf32>
    %620 = vector.multi_reduction <add>, %619, %cst_205 [1] : vector<2x16xf32> to vector<2xf32>
    %621 = vector.shape_cast %620 : vector<2xf32> to vector<2x1xf32>
    %622 = tpu.reciprocal %621 {approx = true} : vector<2x1xf32> -> vector<2x1xf32>
    %623 = vector.broadcast %622 : vector<2x1xf32> to vector<2x16xf32>
    %624 = arith.mulf %619, %623 : vector<2x16xf32>
    %625 = vector.shape_cast %624 : vector<2x16xf32> to vector<2x16x1xf32>
    %626 = vector.broadcast %625 : vector<2x16x1xf32> to vector<2x16x32xf32>
    %627 = arith.mulf %0, %626 : vector<2x16x32xf32>
    %cst_206 = arith.constant dense<0.000000e+00> : vector<2x32xf32>
    %628 = vector.multi_reduction <add>, %627, %cst_206 [1] : vector<2x16x32xf32> to vector<2x32xf32>
    %c0_207 = arith.constant 0 : index
    %c0_208 = arith.constant 0 : index
    %629 = vector.load %arg11[%c0_207, %c0_208] : memref<32x128xf32, #tpu.memory_space<vmem>>, vector<32x128xf32>
    %cst_209 = arith.constant dense<0.000000e+00> : vector<2x128xf32>
    %630 = tpu.matmul %628, %629, %cst_209 {dimension_numbers = #tpu.dot_dimension_numbers<[1], [0], [0], [1], [0, 0, 1, 1], [], []>} : vector<2x32xf32>, vector<32x128xf32>, vector<2x128xf32> -> vector<2x128xf32>
    %631 = arith.addf %630, %600 : vector<2x128xf32>
    %632 = vector.extract_strided_slice %27 {offsets = [0, 6, 0], sizes = [2, 1, 128], strides = [1, 1, 1]} : vector<2x8x128xf32> to vector<2x1x128xf32>
    %633 = vector.shape_cast %632 : vector<2x1x128xf32> to vector<2x128xf32>
    %634 = arith.addf %631, %633 : vector<2x128xf32>
    %635 = arith.negf %634 : vector<2x128xf32>
    %636 = math.exp %635 : vector<2x128xf32>
    %cst_210 = arith.constant 1.000000e+00 : f32
    %637 = vector.broadcast %cst_210 : f32 to vector<2x128xf32>
    %638 = arith.addf %637, %636 : vector<2x128xf32>
    %639 = arith.divf %637, %638 : vector<2x128xf32>
    %640 = vector.extract_strided_slice %634 {offsets = [0, 64], sizes = [2, 32], strides = [1, 1]} : vector<2x128xf32> to vector<2x32xf32>
    %641 = math.tanh %640 : vector<2x32xf32>
    %642 = vector.extract_strided_slice %639 {offsets = [0, 32], sizes = [2, 32], strides = [1, 1]} : vector<2x128xf32> to vector<2x32xf32>
    %643 = arith.mulf %642, %565 : vector<2x32xf32>
    %644 = vector.extract_strided_slice %639 {offsets = [0, 0], sizes = [2, 32], strides = [1, 1]} : vector<2x128xf32> to vector<2x32xf32>
    %645 = arith.mulf %644, %641 : vector<2x32xf32>
    %646 = arith.addf %643, %645 : vector<2x32xf32>
    %647 = vector.extract_strided_slice %639 {offsets = [0, 96], sizes = [2, 32], strides = [1, 1]} : vector<2x128xf32> to vector<2x32xf32>
    %648 = math.tanh %646 : vector<2x32xf32>
    %649 = arith.mulf %647, %648 : vector<2x32xf32>
    %cst_211 = arith.constant 1.000000e-01 : f32
    %650 = vector.broadcast %cst_211 : f32 to vector<2x32xf32>
    %651 = arith.mulf %650, %560 : vector<2x32xf32>
    %cst_212 = arith.constant 0.899999976 : f32
    %652 = vector.broadcast %cst_212 : f32 to vector<2x32xf32>
    %653 = arith.mulf %652, %649 : vector<2x32xf32>
    %654 = arith.addf %651, %653 : vector<2x32xf32>
    %cst_213 = arith.constant 1.000000e-01 : f32
    %655 = vector.broadcast %cst_213 : f32 to vector<2x32xf32>
    %656 = arith.mulf %655, %565 : vector<2x32xf32>
    %cst_214 = arith.constant 0.899999976 : f32
    %657 = vector.broadcast %cst_214 : f32 to vector<2x32xf32>
    %658 = arith.mulf %657, %646 : vector<2x32xf32>
    %659 = arith.addf %656, %658 : vector<2x32xf32>
    %660 = tpu.concatenate %654, %591 in 1 : vector<2x32xf32>, vector<2x32xf32> -> vector<2x64xf32>
    %c0_215 = arith.constant 0 : index
    %c0_216 = arith.constant 0 : index
    %661 = vector.load %arg15[%c0_215, %c0_216] : memref<64x128xf32, #tpu.memory_space<vmem>>, vector<64x128xf32>
    %cst_217 = arith.constant dense<0.000000e+00> : vector<2x128xf32>
    %662 = tpu.matmul %660, %661, %cst_217 {dimension_numbers = #tpu.dot_dimension_numbers<[1], [0], [0], [1], [0, 0, 1, 1], [], []>} : vector<2x64xf32>, vector<64x128xf32>, vector<2x128xf32> -> vector<2x128xf32>
    %c0_218 = arith.constant 0 : index
    %c0_219 = arith.constant 0 : index
    %663 = vector.load %arg16[%c0_218, %c0_219] : memref<1x128xf32, #tpu.memory_space<vmem>>, vector<1x128xf32>
    %664 = vector.broadcast %663 : vector<1x128xf32> to vector<2x128xf32>
    %665 = arith.addf %662, %664 : vector<2x128xf32>
    %666 = arith.negf %665 : vector<2x128xf32>
    %667 = math.exp %666 : vector<2x128xf32>
    %cst_220 = arith.constant 1.000000e+00 : f32
    %668 = vector.broadcast %cst_220 : f32 to vector<2x128xf32>
    %669 = arith.addf %668, %667 : vector<2x128xf32>
    %670 = arith.divf %668, %669 : vector<2x128xf32>
    %671 = vector.extract_strided_slice %665 {offsets = [0, 64], sizes = [2, 32], strides = [1, 1]} : vector<2x128xf32> to vector<2x32xf32>
    %672 = math.tanh %671 : vector<2x32xf32>
    %673 = vector.extract_strided_slice %670 {offsets = [0, 32], sizes = [2, 32], strides = [1, 1]} : vector<2x128xf32> to vector<2x32xf32>
    %674 = arith.mulf %673, %596 : vector<2x32xf32>
    %675 = vector.extract_strided_slice %670 {offsets = [0, 0], sizes = [2, 32], strides = [1, 1]} : vector<2x128xf32> to vector<2x32xf32>
    %676 = arith.mulf %675, %672 : vector<2x32xf32>
    %677 = arith.addf %674, %676 : vector<2x32xf32>
    %678 = vector.extract_strided_slice %670 {offsets = [0, 96], sizes = [2, 32], strides = [1, 1]} : vector<2x128xf32> to vector<2x32xf32>
    %679 = math.tanh %677 : vector<2x32xf32>
    %680 = arith.mulf %678, %679 : vector<2x32xf32>
    %cst_221 = arith.constant 1.000000e-01 : f32
    %681 = vector.broadcast %cst_221 : f32 to vector<2x32xf32>
    %682 = arith.mulf %681, %591 : vector<2x32xf32>
    %cst_222 = arith.constant 0.899999976 : f32
    %683 = vector.broadcast %cst_222 : f32 to vector<2x32xf32>
    %684 = arith.mulf %683, %680 : vector<2x32xf32>
    %685 = arith.addf %682, %684 : vector<2x32xf32>
    %cst_223 = arith.constant 1.000000e-01 : f32
    %686 = vector.broadcast %cst_223 : f32 to vector<2x32xf32>
    %687 = arith.mulf %686, %596 : vector<2x32xf32>
    %cst_224 = arith.constant 0.899999976 : f32
    %688 = vector.broadcast %cst_224 : f32 to vector<2x32xf32>
    %689 = arith.mulf %688, %677 : vector<2x32xf32>
    %690 = arith.addf %687, %689 : vector<2x32xf32>
    %691 = tpu.concatenate %685, %628 in 1 : vector<2x32xf32>, vector<2x32xf32> -> vector<2x64xf32>
    %c0_225 = arith.constant 0 : index
    %c0_226 = arith.constant 0 : index
    %692 = vector.load %arg14[%c0_225, %c0_226] : memref<32x144xf32, #tpu.memory_space<vmem>>, vector<32x144xf32>
    %cst_227 = arith.constant dense<0.000000e+00> : vector<2x144xf32>
    %693 = tpu.matmul %654, %692, %cst_227 {dimension_numbers = #tpu.dot_dimension_numbers<[1], [0], [0], [1], [0, 0, 1, 1], [], []>} : vector<2x32xf32>, vector<32x144xf32>, vector<2x144xf32> -> vector<2x144xf32>
    %694 = vector.extract_strided_slice %693 {offsets = [0, 0], sizes = [2, 128], strides = [1, 1]} : vector<2x144xf32> to vector<2x128xf32>
    %695 = vector.extract_strided_slice %693 {offsets = [0, 128], sizes = [2, 16], strides = [1, 1]} : vector<2x144xf32> to vector<2x16xf32>
    %696 = vector.shape_cast %695 : vector<2x16xf32> to vector<2x1x16xf32>
    %697 = vector.broadcast %696 : vector<2x1x16xf32> to vector<2x16x16xf32>
    %698 = arith.addf %8, %697 : vector<2x16x16xf32>
    %699 = math.tanh %698 : vector<2x16x16xf32>
    %700 = vector.broadcast %28 : vector<1x1x16xf32> to vector<2x16x16xf32>
    %701 = arith.mulf %699, %700 : vector<2x16x16xf32>
    %cst_228 = arith.constant dense<0.000000e+00> : vector<2x16xf32>
    %702 = vector.multi_reduction <add>, %701, %cst_228 [2] : vector<2x16x16xf32> to vector<2x16xf32>
    %703 = vector.broadcast %29 : vector<1x1xf32> to vector<2x16xf32>
    %704 = arith.addf %702, %703 : vector<2x16xf32>
    %cst_229 = arith.constant 0.000000e+00 : f32
    %705 = vector.broadcast %cst_229 : f32 to vector<2x16xf32>
    %706 = arith.cmpf ogt, %1, %705 : vector<2x16xf32>
    %cst_230 = arith.constant -1.000000e+30 : f32
    %707 = vector.broadcast %cst_230 : f32 to vector<2x16xf32>
    %708 = arith.select %706, %704, %707 : vector<2x16xi1>, vector<2x16xf32>
    %cst_231 = arith.constant dense<0xFF800000> : vector<2xf32>
    %709 = vector.multi_reduction <maximumf>, %708, %cst_231 [1] : vector<2x16xf32> to vector<2xf32>
    %710 = vector.shape_cast %709 : vector<2xf32> to vector<2x1xf32>
    %711 = vector.broadcast %710 : vector<2x1xf32> to vector<2x16xf32>
    %712 = arith.subf %708, %711 : vector<2x16xf32>
    %713 = math.exp %712 : vector<2x16xf32>
    %cst_232 = arith.constant dense<0.000000e+00> : vector<2xf32>
    %714 = vector.multi_reduction <add>, %713, %cst_232 [1] : vector<2x16xf32> to vector<2xf32>
    %715 = vector.shape_cast %714 : vector<2xf32> to vector<2x1xf32>
    %716 = tpu.reciprocal %715 {approx = true} : vector<2x1xf32> -> vector<2x1xf32>
    %717 = vector.broadcast %716 : vector<2x1xf32> to vector<2x16xf32>
    %718 = arith.mulf %713, %717 : vector<2x16xf32>
    %719 = vector.shape_cast %718 : vector<2x16xf32> to vector<2x16x1xf32>
    %720 = vector.broadcast %719 : vector<2x16x1xf32> to vector<2x16x32xf32>
    %721 = arith.mulf %0, %720 : vector<2x16x32xf32>
    %cst_233 = arith.constant dense<0.000000e+00> : vector<2x32xf32>
    %722 = vector.multi_reduction <add>, %721, %cst_233 [1] : vector<2x16x32xf32> to vector<2x32xf32>
    %c0_234 = arith.constant 0 : index
    %c0_235 = arith.constant 0 : index
    %723 = vector.load %arg11[%c0_234, %c0_235] : memref<32x128xf32, #tpu.memory_space<vmem>>, vector<32x128xf32>
    %cst_236 = arith.constant dense<0.000000e+00> : vector<2x128xf32>
    %724 = tpu.matmul %722, %723, %cst_236 {dimension_numbers = #tpu.dot_dimension_numbers<[1], [0], [0], [1], [0, 0, 1, 1], [], []>} : vector<2x32xf32>, vector<32x128xf32>, vector<2x128xf32> -> vector<2x128xf32>
    %725 = arith.addf %724, %694 : vector<2x128xf32>
    %726 = vector.extract_strided_slice %27 {offsets = [0, 7, 0], sizes = [2, 1, 128], strides = [1, 1, 1]} : vector<2x8x128xf32> to vector<2x1x128xf32>
    %727 = vector.shape_cast %726 : vector<2x1x128xf32> to vector<2x128xf32>
    %728 = arith.addf %725, %727 : vector<2x128xf32>
    %729 = arith.negf %728 : vector<2x128xf32>
    %730 = math.exp %729 : vector<2x128xf32>
    %cst_237 = arith.constant 1.000000e+00 : f32
    %731 = vector.broadcast %cst_237 : f32 to vector<2x128xf32>
    %732 = arith.addf %731, %730 : vector<2x128xf32>
    %733 = arith.divf %731, %732 : vector<2x128xf32>
    %734 = vector.extract_strided_slice %728 {offsets = [0, 64], sizes = [2, 32], strides = [1, 1]} : vector<2x128xf32> to vector<2x32xf32>
    %735 = math.tanh %734 : vector<2x32xf32>
    %736 = vector.extract_strided_slice %733 {offsets = [0, 32], sizes = [2, 32], strides = [1, 1]} : vector<2x128xf32> to vector<2x32xf32>
    %737 = arith.mulf %736, %659 : vector<2x32xf32>
    %738 = vector.extract_strided_slice %733 {offsets = [0, 0], sizes = [2, 32], strides = [1, 1]} : vector<2x128xf32> to vector<2x32xf32>
    %739 = arith.mulf %738, %735 : vector<2x32xf32>
    %740 = arith.addf %737, %739 : vector<2x32xf32>
    %741 = vector.extract_strided_slice %733 {offsets = [0, 96], sizes = [2, 32], strides = [1, 1]} : vector<2x128xf32> to vector<2x32xf32>
    %742 = math.tanh %740 : vector<2x32xf32>
    %743 = arith.mulf %741, %742 : vector<2x32xf32>
    %cst_238 = arith.constant 1.000000e-01 : f32
    %744 = vector.broadcast %cst_238 : f32 to vector<2x32xf32>
    %745 = arith.mulf %744, %654 : vector<2x32xf32>
    %cst_239 = arith.constant 0.899999976 : f32
    %746 = vector.broadcast %cst_239 : f32 to vector<2x32xf32>
    %747 = arith.mulf %746, %743 : vector<2x32xf32>
    %748 = arith.addf %745, %747 : vector<2x32xf32>
    %749 = tpu.concatenate %748, %685 in 1 : vector<2x32xf32>, vector<2x32xf32> -> vector<2x64xf32>
    %c0_240 = arith.constant 0 : index
    %c0_241 = arith.constant 0 : index
    %750 = vector.load %arg15[%c0_240, %c0_241] : memref<64x128xf32, #tpu.memory_space<vmem>>, vector<64x128xf32>
    %cst_242 = arith.constant dense<0.000000e+00> : vector<2x128xf32>
    %751 = tpu.matmul %749, %750, %cst_242 {dimension_numbers = #tpu.dot_dimension_numbers<[1], [0], [0], [1], [0, 0, 1, 1], [], []>} : vector<2x64xf32>, vector<64x128xf32>, vector<2x128xf32> -> vector<2x128xf32>
    %c0_243 = arith.constant 0 : index
    %c0_244 = arith.constant 0 : index
    %752 = vector.load %arg16[%c0_243, %c0_244] : memref<1x128xf32, #tpu.memory_space<vmem>>, vector<1x128xf32>
    %753 = vector.broadcast %752 : vector<1x128xf32> to vector<2x128xf32>
    %754 = arith.addf %751, %753 : vector<2x128xf32>
    %755 = arith.negf %754 : vector<2x128xf32>
    %756 = math.exp %755 : vector<2x128xf32>
    %cst_245 = arith.constant 1.000000e+00 : f32
    %757 = vector.broadcast %cst_245 : f32 to vector<2x128xf32>
    %758 = arith.addf %757, %756 : vector<2x128xf32>
    %759 = arith.divf %757, %758 : vector<2x128xf32>
    %760 = vector.extract_strided_slice %754 {offsets = [0, 64], sizes = [2, 32], strides = [1, 1]} : vector<2x128xf32> to vector<2x32xf32>
    %761 = math.tanh %760 : vector<2x32xf32>
    %762 = vector.extract_strided_slice %759 {offsets = [0, 32], sizes = [2, 32], strides = [1, 1]} : vector<2x128xf32> to vector<2x32xf32>
    %763 = arith.mulf %762, %690 : vector<2x32xf32>
    %764 = vector.extract_strided_slice %759 {offsets = [0, 0], sizes = [2, 32], strides = [1, 1]} : vector<2x128xf32> to vector<2x32xf32>
    %765 = arith.mulf %764, %761 : vector<2x32xf32>
    %766 = arith.addf %763, %765 : vector<2x32xf32>
    %767 = vector.extract_strided_slice %759 {offsets = [0, 96], sizes = [2, 32], strides = [1, 1]} : vector<2x128xf32> to vector<2x32xf32>
    %768 = math.tanh %766 : vector<2x32xf32>
    %769 = arith.mulf %767, %768 : vector<2x32xf32>
    %cst_246 = arith.constant 1.000000e-01 : f32
    %770 = vector.broadcast %cst_246 : f32 to vector<2x32xf32>
    %771 = arith.mulf %770, %685 : vector<2x32xf32>
    %cst_247 = arith.constant 0.899999976 : f32
    %772 = vector.broadcast %cst_247 : f32 to vector<2x32xf32>
    %773 = arith.mulf %772, %769 : vector<2x32xf32>
    %774 = arith.addf %771, %773 : vector<2x32xf32>
    %775 = tpu.concatenate %774, %722 in 1 : vector<2x32xf32>, vector<2x32xf32> -> vector<2x64xf32>
    %776 = vector.shape_cast %127 : vector<2x64xf32> to vector<2x1x64xf32>
    %777 = vector.shape_cast %221 : vector<2x64xf32> to vector<2x1x64xf32>
    %778 = vector.shape_cast %315 : vector<2x64xf32> to vector<2x1x64xf32>
    %779 = vector.shape_cast %409 : vector<2x64xf32> to vector<2x1x64xf32>
    %780 = vector.shape_cast %503 : vector<2x64xf32> to vector<2x1x64xf32>
    %781 = vector.shape_cast %597 : vector<2x64xf32> to vector<2x1x64xf32>
    %782 = vector.shape_cast %691 : vector<2x64xf32> to vector<2x1x64xf32>
    %783 = vector.shape_cast %775 : vector<2x64xf32> to vector<2x1x64xf32>
    %784 = tpu.concatenate %776, %777, %778, %779, %780, %781, %782, %783 in 1 : vector<2x1x64xf32>, vector<2x1x64xf32>, vector<2x1x64xf32>, vector<2x1x64xf32>, vector<2x1x64xf32>, vector<2x1x64xf32>, vector<2x1x64xf32>, vector<2x1x64xf32> -> vector<2x8x64xf32>
    %785 = vector.shape_cast %784 : vector<2x8x64xf32> to vector<16x64xf32>
    %c0_248 = arith.constant 0 : index
    %c0_249 = arith.constant 0 : index
    %786 = vector.load %arg17[%c0_248, %c0_249] : memref<64x9xf32, #tpu.memory_space<vmem>>, vector<64x9xf32>
    %cst_250 = arith.constant dense<0.000000e+00> : vector<16x9xf32>
    %787 = tpu.matmul %785, %786, %cst_250 {dimension_numbers = #tpu.dot_dimension_numbers<[1], [0], [0], [1], [0, 0, 1, 1], [], []>} : vector<16x64xf32>, vector<64x9xf32>, vector<16x9xf32> -> vector<16x9xf32>
    %c0_251 = arith.constant 0 : index
    %c0_252 = arith.constant 0 : index
    %788 = vector.load %arg18[%c0_251, %c0_252] : memref<1x9xf32, #tpu.memory_space<vmem>>, vector<1x9xf32>
    %789 = vector.broadcast %788 : vector<1x9xf32> to vector<16x9xf32>
    %790 = arith.addf %787, %789 : vector<16x9xf32>
    %791 = vector.shape_cast %790 : vector<16x9xf32> to vector<2x8x9xf32>
    %792 = vector.extract_strided_slice %791 {offsets = [0, 0, 0], sizes = [2, 8, 8], strides = [1, 1, 1]} : vector<2x8x9xf32> to vector<2x8x8xf32>
    %793 = vector.extract_strided_slice %791 {offsets = [0, 0, 8], sizes = [2, 8, 1], strides = [1, 1, 1]} : vector<2x8x9xf32> to vector<2x8x1xf32>
    %794 = vector.shape_cast %792 : vector<2x8x8xf32> to vector<2x64xf32>
    %c0_253 = arith.constant 0 : index
    %c0_254 = arith.constant 0 : index
    %795 = vector.load %arg19[%c0_253, %c0_254] : memref<64x128xf32, #tpu.memory_space<vmem>>, vector<64x128xf32>
    %cst_255 = arith.constant dense<0.000000e+00> : vector<2x128xf32>
    %796 = tpu.matmul %794, %795, %cst_255 {dimension_numbers = #tpu.dot_dimension_numbers<[1], [0], [0], [1], [0, 0, 1, 1], [], []>} : vector<2x64xf32>, vector<64x128xf32>, vector<2x128xf32> -> vector<2x128xf32>
    %c0_256 = arith.constant 0 : index
    %c0_257 = arith.constant 0 : index
    %797 = vector.load %arg20[%c0_256, %c0_257] : memref<1x128xf32, #tpu.memory_space<vmem>>, vector<1x128xf32>
    %798 = vector.broadcast %797 : vector<1x128xf32> to vector<2x128xf32>
    %799 = arith.addf %796, %798 : vector<2x128xf32>
    %800 = math.tanh %799 : vector<2x128xf32>
    %c0_258 = arith.constant 0 : index
    %c0_259 = arith.constant 0 : index
    %801 = vector.load %arg21[%c0_258, %c0_259] : memref<128x128xf32, #tpu.memory_space<vmem>>, vector<128x128xf32>
    %cst_260 = arith.constant dense<0.000000e+00> : vector<2x128xf32>
    %802 = tpu.matmul %800, %801, %cst_260 {dimension_numbers = #tpu.dot_dimension_numbers<[1], [0], [0], [1], [0, 0, 1, 1], [], []>} : vector<2x128xf32>, vector<128x128xf32>, vector<2x128xf32> -> vector<2x128xf32>
    %c0_261 = arith.constant 0 : index
    %c0_262 = arith.constant 0 : index
    %803 = vector.load %arg22[%c0_261, %c0_262] : memref<1x128xf32, #tpu.memory_space<vmem>>, vector<1x128xf32>
    %804 = vector.broadcast %803 : vector<1x128xf32> to vector<2x128xf32>
    %805 = arith.addf %802, %804 : vector<2x128xf32>
    %806 = math.tanh %805 : vector<2x128xf32>
    %c0_263 = arith.constant 0 : index
    %c0_264 = arith.constant 0 : index
    %807 = vector.load %arg23[%c0_263, %c0_264] : memref<128x128xf32, #tpu.memory_space<vmem>>, vector<128x128xf32>
    %cst_265 = arith.constant dense<0.000000e+00> : vector<2x128xf32>
    %808 = tpu.matmul %806, %807, %cst_265 {dimension_numbers = #tpu.dot_dimension_numbers<[1], [0], [0], [1], [0, 0, 1, 1], [], []>} : vector<2x128xf32>, vector<128x128xf32>, vector<2x128xf32> -> vector<2x128xf32>
    %c0_266 = arith.constant 0 : index
    %c0_267 = arith.constant 0 : index
    %809 = vector.load %arg24[%c0_266, %c0_267] : memref<1x128xf32, #tpu.memory_space<vmem>>, vector<1x128xf32>
    %810 = vector.broadcast %809 : vector<1x128xf32> to vector<2x128xf32>
    %811 = arith.addf %808, %810 : vector<2x128xf32>
    %812 = math.tanh %811 : vector<2x128xf32>
    %c0_268 = arith.constant 0 : index
    %c0_269 = arith.constant 0 : index
    %813 = vector.load %arg25[%c0_268, %c0_269] : memref<128x128xf32, #tpu.memory_space<vmem>>, vector<128x128xf32>
    %cst_270 = arith.constant dense<0.000000e+00> : vector<2x128xf32>
    %814 = tpu.matmul %812, %813, %cst_270 {dimension_numbers = #tpu.dot_dimension_numbers<[1], [0], [0], [1], [0, 0, 1, 1], [], []>} : vector<2x128xf32>, vector<128x128xf32>, vector<2x128xf32> -> vector<2x128xf32>
    %c0_271 = arith.constant 0 : index
    %c0_272 = arith.constant 0 : index
    %815 = vector.load %arg26[%c0_271, %c0_272] : memref<1x128xf32, #tpu.memory_space<vmem>>, vector<1x128xf32>
    %816 = vector.broadcast %815 : vector<1x128xf32> to vector<2x128xf32>
    %817 = arith.addf %814, %816 : vector<2x128xf32>
    %818 = math.tanh %817 : vector<2x128xf32>
    %c0_273 = arith.constant 0 : index
    %c0_274 = arith.constant 0 : index
    %819 = vector.load %arg27[%c0_273, %c0_274] : memref<128x64xf32, #tpu.memory_space<vmem>>, vector<128x64xf32>
    %cst_275 = arith.constant dense<0.000000e+00> : vector<2x64xf32>
    %820 = tpu.matmul %818, %819, %cst_275 {dimension_numbers = #tpu.dot_dimension_numbers<[1], [0], [0], [1], [0, 0, 1, 1], [], []>} : vector<2x128xf32>, vector<128x64xf32>, vector<2x64xf32> -> vector<2x64xf32>
    %c0_276 = arith.constant 0 : index
    %c0_277 = arith.constant 0 : index
    %821 = vector.load %arg28[%c0_276, %c0_277] : memref<1x64xf32, #tpu.memory_space<vmem>>, vector<1x64xf32>
    %822 = vector.broadcast %821 : vector<1x64xf32> to vector<2x64xf32>
    %823 = arith.addf %820, %822 : vector<2x64xf32>
    %824 = arith.addf %794, %823 : vector<2x64xf32>
    %825 = vector.shape_cast %824 : vector<2x64xf32> to vector<2x8x8xf32>
    %826 = tpu.concatenate %825, %792, %793 in 2 : vector<2x8x8xf32>, vector<2x8x8xf32>, vector<2x8x1xf32> -> vector<2x8x17xf32>
    %c0_278 = arith.constant 0 : index
    %c0_279 = arith.constant 0 : index
    %c0_280 = arith.constant 0 : index
    %827 = vector.load %arg29[%c0_278, %c0_279, %c0_280] : memref<2x8x17xf32, #tpu.memory_space<vmem>>, vector<2x8x17xf32>
    tpu.vector_store %arg29[%c0_278, %c0_279, %c0_280], %826 {strides = array<i32>} : memref<2x8x17xf32, #tpu.memory_space<vmem>>, vector<2x8x17xf32>,
    return
  }
}

</mosaic_0001>

<bundles_post_ra>
// kernel: tpu_custom_call.1
= control target key start
LH: loop header
LB: loop body
LE: loop exit
PB: predicated region body
PF: predicated region fallthrough
CT: control target
= control target key end

     0   :  { %s6858_s6 = smov 1   ;;  %s6859_s10 = smov 2   ;;  %s8547_s0 = inlined_call_operand.smem [shape: u32[30], index: -1, kind: input, shape index: {}] }
   0x1   :  { %s6936_s5 = sld [smem:[%s8547_s0]]   ;;  %s6860_s14 = smov 3  }
   0x2   :  { %s6941_s9 = sld [smem:[%s8547_s0 + %s6858_s6]]   ;;  %s6861_s18 = smov 4  }
   0x3   :  { %s6946_s13 = sld [smem:[%s8547_s0 + %s6859_s10]]   ;;  %s6862_s22 = smov 5  }
   0x4   :  { %s6951_s17 = sld [smem:[%s8547_s0 + %s6860_s14]]   ;;  %s6863_s26 = smov 6  }
   0x5   :  { %s6956_s21 = sld [smem:[%s8547_s0 + %s6861_s18]]   ;;  %s6864_s30 = smov 7  }
   0x6   :  { %s6961_s25 = sld [smem:[%s8547_s0 + %s6862_s22]]   ;;  %s6865_s4 = smov 8  }
   0x7   :  { %s6966_s29 = sld [smem:[%s8547_s0 + %s6863_s26]]   ;;  %s6866_s10 = smov 9  }
   0x8   :  { %8564 = sst [smem:[#allocation41_spill]] %s6941_s9  ;;  %s6867_s15 = smov 10  }
   0x9   :  { %8565 = sst [smem:[#allocation42_spill]] %s6946_s13  ;;  %s6868_s20 = smov 11  }
   0xa   :  { %s6971_s3 = sld [smem:[%s8547_s0 + %s6864_s30]]   ;;  %s6869_s26 = smov 12  }
   0xb   :  { %s5370_s8 = sld [smem:[%s8547_s0 + %s6865_s4]]   ;;  %s6870_s1 = smov 13  }
   0xc   :  { %8566 = sst [smem:[#allocation43_spill]] %s6961_s25  ;;  %s6871_s7 = smov 14  }
   0xd   :  { %8567 = sst [smem:[#allocation44_spill]] %s6966_s29  ;;  %s6873_s22 = smov 16  }
   0xe   :  { %s6979_s14 = sld [smem:[%s8547_s0 + %s6866_s10]]   ;;  %s6874_s28 = smov 17  }
   0xf   :  { %s6984_s19 = sld [smem:[%s8547_s0 + %s6867_s15]]   ;;  %s6872_s15 = smov 15  }
  0x10   :  { %8568 = sst [smem:[#allocation45_spill]] %s6971_s3 }
  0x11   :  { %s6989_s24 = sld [smem:[%s8547_s0 + %s6868_s20]]   ;;  %v64_v0 = vstv %s5370_s8  ;;  %s6875_s8 = smov 18  }
  0x12   :  { %s6994_s30 = sld [smem:[%s8547_s0 + %s6869_s26]]   ;;  %65 = vst [vmem:[#allocation2] sm:$0x1] %v64_v0 }
  0x13   :  { %s6999_s6 = sld [smem:[%s8547_s0 + %s6870_s1]]  }
  0x14   :  { %s7004_s12 = sld [smem:[%s8547_s0 + %s6871_s7]]  }
  0x15   :  { %s7009_s20 = sld [smem:[%s8547_s0 + %s6872_s15]]   ;;  %s6876_s15 = smov 19  }
  0x16   :  { %s7014_s27 = sld [smem:[%s8547_s0 + %s6873_s22]]   ;;  %s6877_s22 = smov 20  }
  0x17   :  { %s7019_s4 = sld [smem:[%s8547_s0 + %s6874_s28]]   ;;  %s6878_s28 = smov 21  }
  0x18   :  { %s7024_s11 = sld [smem:[%s8547_s0 + %s6875_s8]]   ;;  %s6879_s8 = smov 22  }
  0x19   :  { %s7029_s9 = sld [smem:[%s8547_s0 + %s6876_s15]]   ;;  %s6880_s15 = smov 23  }
  0x1a   :  { %s7034_s3 = sld [smem:[%s8547_s0 + %s6877_s22]]   ;;  %s6881_s22 = smov 24  }
  0x1b   :  { %s7044_s29 = sld [smem:[%s8547_s0 + %s6879_s8]]   ;;  %s6883_s8 = smov 26  }
  0x1c   :  { %s7049_s25 = sld [smem:[%s8547_s0 + %s6880_s15]]   ;;  %s6884_s15 = smov 27  }
  0x1d   :  { %8569 = sst [smem:[#allocation46_spill]] %s7019_s4 }
  0x1e   :  { %s7039_s4 = sld [smem:[%s8547_s0 + %s6878_s28]]   ;;  %s6882_s28 = smov 25  }
  0x1f   :  { %8570 = sst [smem:[#allocation47_spill]] %s7029_s9 }
  0x20   :  { %s7054_s13 = sld [smem:[%s8547_s0 + %s6881_s22]]   ;;  %s6885_s22 = smov 28  }
  0x21   :  { %8572 = sst [smem:[#allocation49_spill]] %s7044_s29 }
  0x22   :  { %8573 = sst [smem:[#allocation50_spill]] %s7049_s25 }
  0x23   :  { %s7064_s29 = sld [smem:[%s8547_s0 + %s6883_s8]]  }
  0x24   :  { %8571 = sst [smem:[#allocation48_spill]] %s7039_s4 }
  0x25   :  { %s7059_s4 = sld [smem:[%s8547_s0 + %s6882_s28]]   ;;  %s6886_s28 = smov 29  }
  0x26   :  { %s7069_s25 = sld [smem:[%s8547_s0 + %s6884_s15]]  }
  0x27   :  { %s7074_s9 = sld [smem:[%s8547_s0 + %s6885_s22]]  }
  0x2b   :  { %8574 = sst [smem:[#allocation51_spill]] %s7059_s4 }
  0x2c   :  { %s7079_s4 = sld [smem:[%s8547_s0 + %s6886_s28]]  }
  0x2d   :  { %66 = vsyncpa [#allocation4], 0 }
  0x2e   :  { %67 = vsyncpa [#allocation7], 0 }
  0x2f   :  { %68 = vsyncpa [#allocation10], 0 }
  0x30   :  { %69 = vsyncpa [#allocation13], 0 }
  0x31   :  { %70 = vsyncpa [#allocation16], 0 }
  0x32   :  { %71 = vsyncpa [#allocation19], 0 }
  0x33   :  { %72 = vsyncpa [#allocation22], 0 }
  0x34   :  { %73 = vsyncpa [#allocation25], 0 }
  0x35   :  { %74 = vsyncpa [#allocation28], 0 }
  0x36   :  { %75 = vsyncpa [#allocation5], 0  ;;  %s6887_s8 = smov [#allocation6]   ;;  %s6888_s10 = smov [#allocation9]  }
  0x37   :  { %s97_s7 = sshll.u32 %s6887_s8, 4  ;;  %s130_s15 = sshll.u32 %s6888_s10, 4  ;;  %s98_s7 = int_to_ptr.vmem [resolvable:$true] %s97_s7  ;;  %s131_s15 = int_to_ptr.vmem [resolvable:$true] %s130_s15 }
  0x38   :  { %s6486_s16 = scalar_lea.vmem %s98_s7, 256  ;;  %p6491_p1 = scmp.lt.s32.totalorder %s98_s7, %s98_s7 }
  0x39   :  { %p6487_p0 = scmp.ne.s32.totalorder %s98_s7, %s6486_s16  ;;  %p6492_p2 = scmp.lt.s32.totalorder %s6486_s16, %s6486_s16 }
  0x3b   :  { %p6493_p3 = por %p6492_p2, %p6491_p1 }
  0x3d   :  { %p6494_p4 = pnand %p6493_p3, %p6487_p0 }
  0x3f   :  { %6497 = shalt.err (!%p6494_p4)
}
  0x40   :  { %s6889_s0 = smov 128   ;;  %s6890_s18 = smov 8  }
  0x41   :  { %103 = dma.hbm_to_vmem [thread:$0]  %s6951_s17, 256, %s98_s7, [#allocation7], %s6889_s0, %s6889_s0, %s6890_s18  }
  0x42   :  { %s6506_s22 = scalar_lea.vmem %s131_s15, 128  ;;  %p6511_p6 = scmp.lt.s32.totalorder %s131_s15, %s131_s15 }
  0x43   :  { %p6507_p5 = scmp.ne.s32.totalorder %s131_s15, %s6506_s22  ;;  %p6512_p7 = scmp.lt.s32.totalorder %s6506_s22, %s6506_s22 }
  0x45   :  { %p6513_p8 = por %p6512_p7, %p6511_p6 }
  0x47   :  { %p6514_p9 = pnand %p6513_p8, %p6507_p5 }
  0x49   :  { %6517 = shalt.err (!%p6514_p9)
}
  0x4a   :  { %133 = dma.hbm_to_vmem [thread:$0]  %s6979_s14, 128, %s131_s15, [#allocation10]  }
  0x4b   :  { %s6891_s23 = smov [#allocation12]   ;;  %s6892_s28 = smov [#allocation15]  }
  0x4c   :  { %s151_s26 = sshll.u32 %s6891_s23, 4  ;;  %s176_s1 = sshll.u32 %s6892_s28, 4  ;;  %s152_s26 = int_to_ptr.vmem [resolvable:$true] %s151_s26  ;;  %s177_s1 = int_to_ptr.vmem [resolvable:$true] %s176_s1 }
  0x4d   :  { %s6526_s2 = scalar_lea.vmem %s152_s26, 512  ;;  %p6531_p11 = scmp.lt.s32.totalorder %s152_s26, %s152_s26 }
  0x4e   :  { %p6527_p10 = scmp.ne.s32.totalorder %s152_s26, %s6526_s2  ;;  %p6532_p12 = scmp.lt.s32.totalorder %s6526_s2, %s6526_s2 }
  0x50   :  { %p6533_p13 = por %p6532_p12, %p6531_p11 }
  0x52   :  { %p6534_p0 = pnand %p6533_p13, %p6527_p10 }
  0x54   :  { %6537 = shalt.err (!%p6534_p0)
}
  0x55   :  { %157 = dma.hbm_to_vmem [thread:$0]  %s6989_s24, 512, %s152_s26, [#allocation13], %s6889_s0, %s6889_s0, %s6890_s18  }
  0x56   :  { %s6546_s17 = scalar_lea.vmem %s177_s1, 16  ;;  %s6550_s14 = scalar_lea.vmem %s177_s1, 32 }
  0x57   :  { %p6547_p1 = scmp.ne.s32.totalorder %s177_s1, %s6546_s17  ;;  %p6551_p2 = scmp.lt.s32.totalorder %s177_s1, %s177_s1 }
  0x58   :  { %p6552_p3 = scmp.lt.s32.totalorder %s6550_s14, %s6546_s17 }
  0x5a   :  { %p6553_p4 = por %p6552_p3, %p6551_p2 }
  0x5c   :  { %p6554_p5 = pnand %p6553_p4, %p6547_p1 }
  0x5e   :  { %6557 = shalt.err (!%p6554_p5)
}
  0x5f   :  { %179 = dma.hbm_to_vmem [thread:$0]  %s6999_s6, 16, %s177_s1, [#allocation16]  }
  0x60   :  { %s6893_s8 = smov [#allocation18]   ;;  %s6894_s10 = smov [#allocation21]  }
  0x61   :  { %s197_s7 = sshll.u32 %s6893_s8, 4  ;;  %s222_s15 = sshll.u32 %s6894_s10, 4  ;;  %s198_s7 = int_to_ptr.vmem [resolvable:$true] %s197_s7  ;;  %s223_s15 = int_to_ptr.vmem [resolvable:$true] %s222_s15 }
  0x62   :  { %s6566_s16 = scalar_lea.vmem %s198_s7, 1024  ;;  %p6571_p7 = scmp.lt.s32.totalorder %s198_s7, %s198_s7 }
  0x63   :  { %p6567_p6 = scmp.ne.s32.totalorder %s198_s7, %s6566_s16  ;;  %p6572_p8 = scmp.lt.s32.totalorder %s6566_s16, %s6566_s16 }
  0x65   :  { %p6573_p9 = por %p6572_p8, %p6571_p7 }
  0x67   :  { %p6574_p10 = pnand %p6573_p9, %p6567_p6 }
  0x69   :  { %6577 = shalt.err (!%p6574_p10)
}
  0x6a   :  { %203 = dma.hbm_to_vmem [thread:$0]  %s7009_s20, 1024, %s198_s7, [#allocation19], %s6889_s0, %s6889_s0, %s6890_s18  }
  0x6b   :  { %s6586_s24 = scalar_lea.vmem %s223_s15, 16  ;;  %s6590_s6 = scalar_lea.vmem %s223_s15, 32 }
  0x6c   :  { %p6587_p11 = scmp.ne.s32.totalorder %s223_s15, %s6586_s24  ;;  %p6591_p12 = scmp.lt.s32.totalorder %s223_s15, %s223_s15 }
  0x6d   :  { %p6592_p13 = scmp.lt.s32.totalorder %s6590_s6, %s6586_s24 }
  0x6f   :  { %p6593_p0 = por %p6592_p13, %p6591_p12 }
  0x71   :  { %p6594_p1 = pnand %p6593_p0, %p6587_p11 }
  0x73   :  { %6597 = shalt.err (!%p6594_p1)
}
  0x74   :  { %225 = dma.hbm_to_vmem [thread:$0]  %s7024_s11, 16, %s223_s15, [#allocation22]  }
  0x75   :  { %s6895_s22 = smov [#allocation24]   ;;  %s6896_s26 = smov [#allocation27]  }
  0x76   :  { %s244_s23 = sshll.u32 %s6895_s22, 4  ;;  %s268_s28 = sshll.u32 %s6896_s26, 4  ;;  %s245_s23 = int_to_ptr.vmem [resolvable:$true] %s244_s23  ;;  %s269_s28 = int_to_ptr.vmem [resolvable:$true] %s268_s28 }
  0x77   :  { %s6606_s1 = scalar_lea.vmem %s245_s23, 16  ;;  %s6610_s2 = scalar_lea.vmem %s245_s23, 32 }
  0x78   :  { %p6607_p2 = scmp.ne.s32.totalorder %s245_s23, %s6606_s1  ;;  %p6611_p3 = scmp.lt.s32.totalorder %s245_s23, %s245_s23 }
  0x79   :  { %p6612_p4 = scmp.lt.s32.totalorder %s6610_s2, %s6606_s1 }
  0x7b   :  { %p6613_p5 = por %p6612_p4, %p6611_p3 }
  0x7d   :  { %p6614_p6 = pnand %p6613_p5, %p6607_p2 }
  0x7f   :  { %6617 = shalt.err (!%p6614_p6)
}
  0x80   :  { %247 = dma.hbm_to_vmem [thread:$0]  %s7034_s3, 16, %s245_s23, [#allocation25]  }
  0x81   :  { %s6626_s20 = scalar_lea.vmem %s269_s28, 16  ;;  %s6630_s17 = scalar_lea.vmem %s269_s28, 32 }
  0x82   :  { %p6627_p7 = scmp.ne.s32.totalorder %s269_s28, %s6626_s20  ;;  %p6631_p8 = scmp.lt.s32.totalorder %s269_s28, %s269_s28 }
  0x83   :  { %p6632_p9 = scmp.lt.s32.totalorder %s6630_s17, %s6626_s20 }
  0x85   :  { %p6633_p10 = por %p6632_p9, %p6631_p8 }
  0x87   :  { %p6634_p11 = pnand %p6633_p10, %p6627_p7 }
  0x89   :  { %6637 = shalt.err (!%p6634_p11)
}
  0x8a   :  { %271 = dma.hbm_to_vmem [thread:$0]  %s7054_s13, 16, %s269_s28, [#allocation28]  }
  0x8b   :  { %s6897_s11 = smov [#allocation3]   ;;  %s6898_s8 = smov [#allocation8]  }
  0x8c   :  { %s81_s14 = sshll.u32 %s6897_s11, 4  ;;  %s109_s7 = sshll.u32 %s6898_s8, 4  ;;  %s82_s14 = int_to_ptr.vmem [resolvable:$true] %s81_s14  ;;  %s110_s7 = int_to_ptr.vmem [resolvable:$true] %s109_s7 }
  0x8d   :  { %s6646_s10 = scalar_lea.vmem %s82_s14, 512  ;;  %p6651_p13 = scmp.lt.s32.totalorder %s82_s14, %s82_s14 }
  0x8e   :  { %p6647_p12 = scmp.ne.s32.totalorder %s82_s14, %s6646_s10  ;;  %p6652_p0 = scmp.lt.s32.totalorder %s6646_s10, %s6646_s10 }
  0x90   :  { %p6653_p1 = por %p6652_p0, %p6651_p13 }
  0x92   :  { %p6654_p2 = pnand %p6653_p1, %p6647_p12 }
  0x94   :  { %6657 = shalt.err (!%p6654_p2)
}
  0x95   :  { %87 = dma.hbm_to_vmem [thread:$0]  %s6936_s5, 512, %s82_s14, [#allocation4], %s6889_s0, %s6889_s0, %s6890_s18  }
  0x96   :  { %s6666_s3 = scalar_lea.vmem %s110_s7, 256  ;;  %p6671_p4 = scmp.lt.s32.totalorder %s110_s7, %s110_s7 }
  0x97   :  { %p6667_p3 = scmp.ne.s32.totalorder %s110_s7, %s6666_s3  ;;  %p6672_p5 = scmp.lt.s32.totalorder %s6666_s3, %s6666_s3 }
  0x99   :  { %p6673_p6 = por %p6672_p5, %p6671_p4 }
  0x9b   :  { %p6674_p7 = pnand %p6673_p6, %p6667_p3 }
  0x9d   :  { %6677 = shalt.err (!%p6674_p7)
}
  0x9e   :  { %115 = dma.hbm_to_vmem [thread:$0]  %s6956_s21, 256, %s110_s7, [#allocation7], %s6889_s0, %s6889_s0, %s6890_s18  }
  0x9f   :  { %s6899_s13 = smov [#allocation11]   ;;  %s6900_s16 = smov [#allocation14]  }
  0xa0   :  { %s139_s15 = sshll.u32 %s6899_s13, 4  ;;  %s163_s24 = sshll.u32 %s6900_s16, 4  ;;  %s140_s15 = int_to_ptr.vmem [resolvable:$true] %s139_s15  ;;  %s164_s24 = int_to_ptr.vmem [resolvable:$true] %s163_s24 }
  0xa1   :  { %s6686_s6 = scalar_lea.vmem %s140_s15, 256  ;;  %p6691_p9 = scmp.lt.s32.totalorder %s140_s15, %s140_s15 }
  0xa2   :  { %p6687_p8 = scmp.ne.s32.totalorder %s140_s15, %s6686_s6  ;;  %p6692_p10 = scmp.lt.s32.totalorder %s6686_s6, %s6686_s6 }
  0xa4   :  { %p6693_p11 = por %p6692_p10, %p6691_p9 }
  0xa6   :  { %p6694_p12 = pnand %p6693_p11, %p6687_p8 }
  0xa8   :  { %6697 = shalt.err (!%p6694_p12)
}
  0xa9   :  { %145 = dma.hbm_to_vmem [thread:$0]  %s6984_s19, 256, %s140_s15, [#allocation10], %s6889_s0, %s6889_s0, %s6890_s18  }
  0xaa   :  { %s6706_s5 = scalar_lea.vmem %s164_s24, 256  ;;  %p6711_p0 = scmp.lt.s32.totalorder %s164_s24, %s164_s24 }
  0xab   :  { %p6707_p13 = scmp.ne.s32.totalorder %s164_s24, %s6706_s5  ;;  %p6712_p1 = scmp.lt.s32.totalorder %s6706_s5, %s6706_s5 }
  0xad   :  { %p6713_p2 = por %p6712_p1, %p6711_p0 }
  0xaf   :  { %p6714_p3 = pnand %p6713_p2, %p6707_p13 }
  0xb1   :  { %6717 = shalt.err (!%p6714_p3)
}
  0xb2   :  { %169 = dma.hbm_to_vmem [thread:$0]  %s6994_s30, 256, %s164_s24, [#allocation13], %s6889_s0, %s6889_s0, %s6890_s18  }
  0xb3   :  { %s6901_s21 = smov [#allocation17]  }
  0xb4   :  { %s185_s22 = sshll.u32 %s6901_s21, 4  ;;  %s186_s22 = int_to_ptr.vmem [resolvable:$true] %s185_s22 }
  0xb5   :  { %s6726_s23 = scalar_lea.vmem %s186_s22, 1024  ;;  %p6731_p5 = scmp.lt.s32.totalorder %s186_s22, %s186_s22 }
  0xb6   :  { %p6727_p4 = scmp.ne.s32.totalorder %s186_s22, %s6726_s23  ;;  %p6732_p6 = scmp.lt.s32.totalorder %s6726_s23, %s6726_s23 }
  0xb8   :  { %p6733_p7 = por %p6732_p6, %p6731_p5 }
  0xba   :  { %p6734_p8 = pnand %p6733_p7, %p6727_p4 }
  0xbc   :  { %6737 = shalt.err (!%p6734_p8)
}
  0xbd   :  { %s6902_s19 = smov 256   ;;  %s6903_s26 = smov 16  }
  0xbe   :  { %191 = dma.hbm_to_vmem [thread:$0]  %s7004_s12, 1024, %s186_s22, [#allocation16], %s6902_s19, %s6902_s19, %s6903_s26  }
  0xbf   :  { %s6904_s28 = smov [#allocation20]   ;;  %s6905_s2 = smov [#allocation23]  }
  0xc0   :  { %s210_s1 = sshll.u32 %s6904_s28, 4  ;;  %s231_s30 = sshll.u32 %s6905_s2, 4  ;;  %s211_s1 = int_to_ptr.vmem [resolvable:$true] %s210_s1  ;;  %s232_s30 = int_to_ptr.vmem [resolvable:$true] %s231_s30 }
  0xc1   :  { %s6746_s20 = scalar_lea.vmem %s211_s1, 16  ;;  %s6750_s17 = scalar_lea.vmem %s211_s1, 32 }
  0xc2   :  { %p6747_p9 = scmp.ne.s32.totalorder %s211_s1, %s6746_s20  ;;  %p6751_p10 = scmp.lt.s32.totalorder %s211_s1, %s211_s1 }
  0xc3   :  { %p6752_p11 = scmp.lt.s32.totalorder %s6750_s17, %s6746_s20 }
  0xc5   :  { %p6753_p12 = por %p6752_p11, %p6751_p10 }
  0xc7   :  { %p6754_p13 = pnand %p6753_p12, %p6747_p9 }
  0xc9   :  { %6757 = shalt.err (!%p6754_p13)
}
  0xca   :  { %213 = dma.hbm_to_vmem [thread:$0]  %s7014_s27, 16, %s211_s1, [#allocation19]  }
  0xcb   :  { %s6766_s11 = scalar_lea.vmem %s232_s30, 1024  ;;  %p6771_p1 = scmp.lt.s32.totalorder %s232_s30, %s232_s30 }
  0xcc   :  { %p6767_p0 = scmp.ne.s32.totalorder %s232_s30, %s6766_s11  ;;  %p6772_p2 = scmp.lt.s32.totalorder %s6766_s11, %s6766_s11 }
  0xce   :  { %p6773_p3 = por %p6772_p2, %p6771_p1 }
  0xd0   :  { %p6774_p4 = pnand %p6773_p3, %p6767_p0 }
  0xd2   :  { %6777 = shalt.err (!%p6774_p4)
}
  0xd3   :  { %s8575_s12 = sld [smem:[#allocation47_spill]]  ;;  %s6906_s14 = smov [#allocation26]  }
  0xd4   :  { %s256_s8 = sshll.u32 %s6906_s14, 4  ;;  %s6907_s7 = smov [#allocation29]   ;;  %s257_s8 = int_to_ptr.vmem [resolvable:$true] %s256_s8 }
  0xd5   :  { %s280_s10 = sshll.u32 %s6907_s7, 4  ;;  %s6786_s3 = scalar_lea.vmem %s257_s8, 16  ;;  %s281_s10 = int_to_ptr.vmem [resolvable:$true] %s280_s10 }
  0xd6   :  { %p6787_p5 = scmp.ne.s32.totalorder %s257_s8, %s6786_s3  ;;  %s6790_s27 = scalar_lea.vmem %s257_s8, 32 }
  0xd7   :  { %p6791_p6 = scmp.lt.s32.totalorder %s257_s8, %s257_s8  ;;  %p6792_p7 = scmp.lt.s32.totalorder %s6790_s27, %s6786_s3 }
  0xd9   :  { %237 = dma.hbm_to_vmem [thread:$0]  %s8575_s12, 1024, %s232_s30, [#allocation22], %s6889_s0, %s6889_s0, %s6890_s18  }
  0xda   :  { %p6793_p8 = por %p6792_p7, %p6791_p6 }
  0xdc   :  { %p6794_p9 = pnand %p6793_p8, %p6787_p5 }
  0xde   :  { %6797 = shalt.err (!%p6794_p9)
}
  0xdf   :  { %s8576_s13 = sld [smem:[#allocation49_spill]]  ;;  %s6806_s15 = scalar_lea.vmem %s281_s10, 16 }
  0xe0   :  { %p6807_p10 = scmp.ne.s32.totalorder %s281_s10, %s6806_s15  ;;  %s6810_s16 = scalar_lea.vmem %s281_s10, 32 }
  0xe1   :  { %p6811_p11 = scmp.lt.s32.totalorder %s281_s10, %s281_s10  ;;  %p6812_p12 = scmp.lt.s32.totalorder %s6810_s16, %s6806_s15 }
  0xe3   :  { %p6813_p13 = por %p6812_p12, %p6811_p11 }
  0xe5   :  { %259 = dma.hbm_to_vmem [thread:$0]  %s8576_s13, 16, %s257_s8, [#allocation25]  }
  0xe6   :  { %p6814_p0 = pnand %p6813_p13, %p6807_p10 }
  0xe8   :  { %6817 = shalt.err (!%p6814_p0)
}
  0xe9   :  { %283 = dma.hbm_to_vmem [thread:$0]  %s7064_s29, 16, %s281_s10, [#allocation28]  }
  0xea   :  { %6838 = dma.done.wait [#allocation4], 512  }
  0xeb   :  { %6839 = vsyncadd [#allocation4], 4294966784 }
  0xec   :  { %6840 = dma.done.wait [#allocation7], 512  }
  0xed   :  { %6841 = vsyncadd [#allocation7], 4294966784 }
  0xee   :  { %6842 = dma.done.wait [#allocation10], 384  }
  0xef   :  { %6843 = vsyncadd [#allocation10], 4294966912 }
  0xf0   :  { %6844 = dma.done.wait [#allocation13], 768  }
  0xf1   :  { %6845 = vsyncadd [#allocation13], 4294966528 }
  0xf2   :  { %6846 = dma.done.wait [#allocation16], 1040  }
  0xf3   :  { %6847 = vsyncadd [#allocation16], 4294966256 }
  0xf4   :  { %6848 = dma.done.wait [#allocation19], 1040  }
  0xf5   :  { %6849 = vsyncadd [#allocation19], 4294966256 }
  0xf6   :  { %6850 = dma.done.wait [#allocation22], 1040  }
  0xf7   :  { %6851 = vsyncadd [#allocation22], 4294966256 }
  0xf8   :  { %6852 = dma.done.wait [#allocation25], 32  }
  0xf9   :  { %6853 = vsyncadd [#allocation25], 4294967264 }
  0xfa   :  { %6854 = dma.done.wait [#allocation28], 32  }
  0xfb   :  { %6855 = vsyncadd [#allocation28], 4294967264  ;;  %s8577_s24 = sld [smem:[#allocation42_spill]]  ;;  %vm456_vm0 = vcmask 64512   ;;  %v455_v1 = vld [vmem:[#allocation9] sm:$0xff]  ;;  %v545_v4 = vld [vmem:[#allocation11 + $0x8] sm:$0xff]  ;;  %v812_v45 = vlaneseq }
  0xfc   :  { %5687 = vmatprep.subr.mxu1 %v455_v1  ;;  %v544_v5 = vld [vmem:[#allocation11] sm:$0xff]  ;;  %v540_v9 = vld [vmem:[#allocation6] sm:$0xff]  ;;  %s8578_s29 = sld [smem:[#allocation43_spill]]  ;;  %vm546_vm1 = vcmask 130048   ;;  %v634_v15 = vld [vmem:[#allocation14] sm:$0xff]  ;;  %vm355_vm2 = vcmask 261120  }
  0xfd   :  { %5688 = vmatpush3.msra.mxu1 %v455_v1  ;;  %v541_v10 = vld [vmem:[#allocation6 + $0x8] sm:$0xff]  ;;  %v635_v14 = vld [vmem:[#allocation14 + $0x8] sm:$0xff]  ;;  %v7140_v23 = vld [vmem:[#allocation3 + $0x10] sm:$0xff]  ;;  %v8555_v24 = vmov 0.0   ;;  %v6909_v41 = vmov 0   ;;  %v7180_v51 = vshrl.u32 %v812_v45, 7 }
  0xfe   :  { %5692 = vmatprep.subr.mxu1 %v545_v4  ;;  %v7129_v16 = vld [vmem:[#allocation17 + $0x38] sm:$0xff]  ;;  %v7149_v25 = vld [vmem:[#allocation3 + $0x18] sm:$0xff]  ;;  %v630_v29 = vld [vmem:[#allocation8] sm:$0xff]  ;;  %6194 = vset.pattern.permute.xlu0 %v6909_v41  ;;  %v6910_v43 = vmov 1966171168   ;;  %vm911_vm3 = vcmask 1041409  }
  0xff   :  { %v7136_v21 = vld [vmem:[#allocation3] sm:$0xff]  ;;  %v7138_v22 = vld [vmem:[#allocation3 + $0x8] sm:$0xff]  ;;  %v631_v30 = vld [vmem:[#allocation8 + $0x8] sm:$0xff]  ;;  %v810_v44 = vunpack.c.l.s4 %v6910_v43  ;;  %8579 = vst [vmem:[#allocation52_spill] sm:$0xff] %v7180_v51  ;;  %s8580_s6 = sld [smem:[#allocation44_spill]]  ;;  %vm900_vm4 = vcmask 130112  }
 0x100   :  { %5681 = vmatprep.mubr.msk.f32.mxu0 %vm355_vm2, %v7136_v21  ;;  %v7153_v34 = vld [vmem:[#allocation17 + $0x30] sm:$0xff]  ;;  %v7156_v35 = vld [vmem:[#allocation17 + $0x28] sm:$0xff]  ;;  %v7159_v36 = vld [vmem:[#allocation17 + $0x20] sm:$0xff]  ;;  %s8582_s5 = sld [smem:[#allocation45_spill]]  ;;  %vm915_vm6 = vcmask 123904   ;;  %vm6911_vm7 = vmmov 0  }
 0x101   :  { %v453_v2 = vld [vmem:[%s8577_s24] sm:$0xff]  ;;  %v454_v3 = vld [vmem:[%s8577_s24 + $0x8] sm:$0xff]  ;;  %v7169_v39 = vld [vmem:[#allocation17 + $0x8] sm:$0xff]  ;;  %v811_v50 = vunpack.c.0.s8 %v810_v44  ;;  %s8583_s21 = sld [smem:[#allocation41_spill]]  ;;  %s6912_s22 = smov 64   ;;  %vm1104_vm8 = vcmask 523264  }
 0x102   :  { %5689 = vmatprep.mubr.msk.f32.mxu1 %vm456_vm0, %v453_v2  ;;  %v347_v17 = vld [vmem:[%s8578_s29 + $0x18] sm:$0xff]  ;;  %v346_v18 = vld [vmem:[%s8578_s29 + $0x10] sm:$0xff]  ;;  %v345_v19 = vld [vmem:[%s8578_s29 + $0x8] sm:$0xff]  ;;  %s6913_s23 = smov 32   ;;  %s8591_s19 = sld [smem:[#allocation46_spill]]  ;;  %vm4564_vm9 = vcmask 1040384  }
 0x103   :  { %5690 = vmatmul.mubr.msk.f32.vlgmr.msra.gmra.mxu1 %vm456_vm0, %v454_v3  ;;  %5673 = vmatprep.subr.mxu0 %v347_v17  ;;  %v344_v20 = vld [vmem:[%s8578_s29] sm:$0xff]  ;;  %v7172_v40 = vld [vmem:[#allocation17] sm:$0xff]  ;;  %v5401_v42 = vld [vmem:[#allocation15] ss:$0 sm:$0xff]  ;;  %vm4567_vm10 = vcmask 1041408   ;;  %vm4570_vm11 = vcmask 1042432  }
 0x104   :  { %5693 = vmatpush3.msra.mxu1 %v545_v4  ;;  %5674 = vmatpush3.msra.mxu0 %v347_v17  ;;  %v7162_v37 = vld [vmem:[#allocation17 + $0x18] sm:$0xff]  ;;  %v7166_v38 = vld [vmem:[#allocation17 + $0x10] sm:$0xff]  ;;  %vm4573_vm12 = vcmask 1043456   ;;  %vm4576_vm13 = vcmask 1044480   ;;  %vm4579_vm14 = vcmask 1045504   ;;  %vm4582_vm15 = vcmask 1046528  }
 0x105   :  { %5694 = vmatprep.subr.mxu1 %v544_v5  ;;  %5675 = vmatprep.subr.mxu0 %v346_v18  ;;  %v5392_v17 = vld [vmem:[%s8580_s6] ss:$0 sm:$0xff]  ;;  %s8598_s28 = sld [smem:[#allocation48_spill]]  ;;  %s6917_s1 = smov 48  }
 0x106   :  { %5695 = vmatpush3.msra.mxu1 %v544_v5  ;;  %5676 = vmatpush3.msra.mxu0 %v346_v18  ;;  %v7186_v5 = vsub.s32 %v811_v50, %v7180_v51  ;;  %s6918_s2 = smov 40   ;;  %s6919_s30 = smov 56  }
 0x107   :  { %5699 = vmatprep.subr.mxu1 %v635_v14  ;;  %5677 = vmatprep.subr.mxu0 %v345_v19  ;;  %s8599_s20 = sld [smem:[#allocation50_spill]]  ;;  %s6920_s11 = smov 112  }
 0x108   :  { %5678 = vmatpush3.msra.mxu0 %v345_v19  ;;  %v7214_v19 = vsub.s32 0, %v7180_v51  ;;  %s8600_s17 = sld [smem:[#allocation51_spill]]  ;;  %s6922_s12 = smov 96  }
 0x109   :  { %5679 = vmatprep.subr.mxu0 %v344_v20  ;;  %s6923_s14 = smov 104   ;;  %s6924_s8 = smov 80  }
 0x10a   :  { %5680 = vmatpush3.msra.mxu0 %v344_v20  ;;  %s6925_s7 = smov 88   ;;  %s6927_s10 = smov [#allocation30]  }
 0x10b   :  { %5682 = vmatmul.mubr.msk.f32.vlgmr.msra.gmra.mxu0 %vm355_vm2, %v7138_v22  ;;  %5717 = vmatprep.subr.mxu0 %v8555_v24  ;;  %s5343_s3 = sshll.u32 %s6927_s10, 4  ;;  %s5344_s3 = int_to_ptr.vmem [resolvable:$true] %s5343_s3 }
 0x10c   :  { %5684 = vmatprep.mubr.msk.f32.mxu0 %vm355_vm2, %v7140_v23  ;;  %s6818_s27 = scalar_lea.vmem %s5344_s3, 256  ;;  %p6823_p2 = scmp.lt.s32.totalorder %s5344_s3, %s5344_s3 }
 0x10d   :  { %p6819_p1 = scmp.ne.s32.totalorder %s5344_s3, %s6818_s27  ;;  %p6824_p3 = scmp.lt.s32.totalorder %s6818_s27, %s6818_s27 }
 0x10f   :  { %5685 = vmatmul.mubr.msk.f32.gmra.mxu0 %vm355_vm2, %v7149_v25  ;;  %p6825_p4 = por %p6824_p3, %p6823_p2 }
 0x110   :  { %5733 = vmatprep.mubr.msk.f32.mxu0 %vm6911_vm7, %v8555_v24 }
 0x111   :  { %p6826_p5 = pnand %p6825_p4, %p6819_p1 }
 0x1c3   :  { %v5691_v6 = vpop.f32.mrf.mxu1 }
 0x1c4   :  { %v539_v7 = vmax.f32 %v5691_v6, 0.0 }
 0x1c5   :  { %v529_v8 = vpop.f32.mrf.mxu1 }
 0x1c6   :  { %v538_v11 = vmax.f32 %v529_v8, 0.0  ;;  %v543_v13 = vmul.f32 %v541_v10, %v539_v7 }
 0x1c8   :  { %v542_v12 = vmul.f32 %v540_v9, %v538_v11 }
 0x1ca   :  { %5696 = vmatprep.mubr.msk.f32.mxu1 %vm546_vm1, %v542_v12 }
 0x1cb   :  { %5697 = vmatmul.mubr.msk.f32.vlgmr.msra.gmra.mxu1 %vm546_vm1, %v543_v13  ;;  %v5683_v47 = vpop.f32.mrf.mxu0 }
 0x1cc   :  { %5700 = vmatpush3.msra.mxu1 %v635_v14 }
 0x1cd   :  { %5701 = vmatprep.subr.mxu1 %v634_v15  ;;  %v434_v56 = vpop.f32.mrf.mxu0 }
 0x1ce   :  { %5702 = vmatpush3.msra.mxu1 %v634_v15 }
 0x1cf   :  { %761 = vmatprep.subr.mxu1 %v7129_v16  ;;  %v5686_v10 = vpop.f32.mrf.mxu0 }
 0x1d1   :  { %v444_v20 = vpop.f32.mrf.mxu0 }
 0x28b   :  { %v5698_v26 = vpop.f32.mrf.mxu1 }
 0x28c   :  { %v629_v27 = vmax.f32 %v5698_v26, 0.0 }
 0x28d   :  { %v619_v28 = vpop.f32.mrf.mxu1 }
 0x28e   :  { %v628_v31 = vmax.f32 %v619_v28, 0.0  ;;  %v633_v33 = vmul.f32 %v631_v30, %v629_v27  ;;  %v7217_v28 = vadd.f32 %v5683_v47, %v5392_v17  ;;  %v7233_v47 = vld [vmem:[%s8582_s5] ss:$0 sm:$0xff] }
 0x290   :  { %v632_v32 = vmul.f32 %v630_v29, %v628_v31  ;;  %v7219_v29 = vadd.f32 %v5392_v17, %v434_v56 }
 0x292   :  { %5703 = vmatprep.mubr.msk.f32.mxu1 %vm546_vm1, %v632_v32  ;;  %v7223_v32 = vadd.f32 %v5686_v10, %v5392_v17 }
 0x293   :  { %5704 = vmatmul.mubr.msk.f32.vlgmr.msra.gmra.mxu1 %vm546_vm1, %v633_v33  ;;  %v7225_v33 = vadd.f32 %v5392_v17, %v444_v20 }
 0x294   :  { %762 = vmatpush1.msra.mxu1 %v7153_v34  ;;  %801 = vmatprep.mubr.f32.mxu1 %v8555_v24 }
 0x295   :  { %763 = vmatprep.subr.mxu1 %v7156_v35 }
 0x296   :  { %764 = vmatpush1.msra.mxu1 %v7159_v36 }
 0x297   :  { %765 = vmatprep.subr.mxu1 %v7162_v37 }
 0x298   :  { %766 = vmatpush1.msra.mxu1 %v7166_v38 }
 0x299   :  { %767 = vmatprep.subr.mxu1 %v7169_v39 }
 0x29a   :  { %768 = vmatpush1.msra.mxu1 %v7172_v40 }
 0x29b   :  { %802 = vmatmul.mubr.f32.vlgmr.msra.gmra.mxu1 %v8555_v24  ;;  %5706 = vmatprep.subr.mxu1 %v8555_v24 }
 0x29c   :  { %5714 = vmatprep.mubr.msk.f32.mxu1 %vm6911_vm7, %v8555_v24 }
 0x353   :  { %v5705_v46 = vpop.f32.mrf.mxu1 }
 0x354   :  { %v721_v48 = vadd.f32 %v5705_v46, %v5401_v42 }
 0x355   :  { %v715_v49 = vpop.f32.mrf.mxu1 }
 0x356   :  { %v716_v52 = vadd.f32 %v5401_v42, %v715_v49  ;;  %v1052_v53 = vrot.slane %v721_v48, 7  ;;  %v1946_v54 = vrot.slane %v721_v48, 1  ;;  %v2389_v55 = vrot.slane %v721_v48, 2 }
 0x357   :  { %v2832_v57 = vrot.slane %v721_v48, 3  ;;  %v3275_v58 = vrot.slane %v721_v48, 4  ;;  %v3718_v59 = vrot.slane %v721_v48, 5  ;;  %v4161_v60 = vrot.slane %v721_v48, 6 }
 0x358   :  { %v7183_v61 = vsel %vm911_vm3, %v1052_v53, %v716_v52  ;;  %v1503_v62 = vrot.slane %v716_v52, 1  ;;  %v1945_v63 = vrot.slane %v716_v52, 2  ;;  %v2388_v0 = vrot.slane %v716_v52, 3 }
 0x359   :  { %v2831_v1 = vrot.slane %v716_v52, 4  ;;  %v3274_v2 = vrot.slane %v716_v52, 5  ;;  %v3717_v3 = vrot.slane %v716_v52, 6  ;;  %v4160_v4 = vrot.slane %v716_v52, 7 }
 0x35a   :  { %v7189_v6 = vsel %vm911_vm3, %v721_v48, %v1503_v62  ;;  %v7192_v7 = vsel %vm911_vm3, %v1946_v54, %v1945_v63  ;;  %v7195_v8 = vsel %vm911_vm3, %v2389_v55, %v2388_v0  ;;  %v5405_v62 = vld [vmem:[#allocation2] ss:$0 sm:$0xff]  ;;  %v890_v0 = vand.u32 127, %v812_v45 }
 0x35b   :  { %v7197_v9 = vpop.f32.mrf.mxu1  ;;  %v7200_v11 = vsel %vm911_vm3, %v2832_v57, %v2831_v1  ;;  %v7203_v12 = vsel %vm911_vm3, %v3275_v58, %v3274_v2  ;;  %v7206_v13 = vsel %vm911_vm3, %v3718_v59, %v3717_v3  ;;  %v7209_v14 = vsel %vm911_vm3, %v4161_v60, %v4160_v4 }
 0x35c   :  { %8581 = vst [vmem:[#allocation53_spill] sm:$0xff] %v7209_v14  ;;  %v895_v2 = vadd.s32 4294967288, %v890_v0  ;;  %v7245_v4 = vsub.s32 %v890_v0, %v7180_v51  ;;  %v7280_v0 = vld [vmem:[#allocation12 + $0x10] sm:$0xff] }
 0x35d   :  { %v805_v15 = vpop.f32.mrf.mxu1 }
 0x35e   :  { %v815_v18 = vrot.slane %v805_v15, %v7186_v5  ;;  %v7248_v10 = vsub.s32 %v895_v2, %v7180_v51  ;;  %v7286_v2 = vld [vmem:[#allocation12] sm:$0xff] }
 0x360   :  { %v816_v26 = vcombine.high %v815_v18, %v815_v18  ;;  %v823_v27 = vrot.slane %v815_v18, %v7186_v5  ;;  %v7253_v18 = vld [vmem:[%s8583_s21] sm:$0x3] }
 0x361   :  { %vm884_vm5 = vcmp.gt.f32.partialorder %v7253_v18, 0.0 }
 0x362   :  { %v830_v30 = vrot.slane %v816_v26, %v7186_v5  ;;  %v834_v31 = vrot.slane %v823_v27, %v7214_v19 }
 0x364   :  { %v838_v41 = vrot.slane %v830_v30, %v7214_v19  ;;  %v842_v42 = vadd.f32 %v834_v31, %v7217_v28  ;;  %v841_v43 = vadd.f32 %v834_v31, %v7219_v29 }
 0x366   :  { %6195 = vtanh.f32 %v842_v42  ;;  %v843_v44 = vadd.f32 %v838_v41, %v7225_v33  ;;  %v844_v46 = vadd.f32 %v838_v41, %v7223_v32 }
 0x367   :  { %6197 = vtanh.f32 %v841_v43 }
 0x368   :  { %6199 = vtanh.f32 %v843_v44 }
 0x369   :  { %6201 = vtanh.f32 %v844_v46 }
 0x373   :  { %v6196_v48 = vpop.eup %6195 }
 0x374   :  { %v6198_v49 = vpop.eup %6197  ;;  %v856_v56 = vmul.f32 %v6196_v48, %v7233_v47 }
 0x375   :  { %v6200_v50 = vpop.eup %6199  ;;  %v855_v52 = vmul.f32 %v6198_v49, %v7233_v47 }
 0x376   :  { %v6202_v53 = vpop.eup %6201  ;;  %v857_v54 = vmul.f32 %v6200_v50, %v7233_v47  ;;  %v862_v59 = vsel %vm546_vm1, %v856_v56, 0.0 }
 0x377   :  { %v859_v55 = vsel %vm546_vm1, %v855_v52, 0.0  ;;  %v858_v58 = vmul.f32 %v6202_v53, %v7233_v47 }
 0x378   :  { %860 = vadd.xlane.f32.xlu0 %v859_v55  ;;  %v865_v57 = vsel %vm546_vm1, %v857_v54, 0.0 }
 0x379   :  { %866 = vadd.xlane.f32.xlu1 %v865_v57  ;;  %v868_v60 = vsel %vm546_vm1, %v858_v58, 0.0 }
 0x37c   :  { %863 = vadd.xlane.f32.xlu0 %v862_v59 }
 0x37d   :  { %869 = vadd.xlane.f32.xlu1 %v868_v60  ;;  %v7273_v60 = vsub.s32 1, %v7180_v51 }
 0x392   :  { %877 = vperm.xlu0 %6194, %v5405_v62  }
 0x401   :  { %v861_v63 = vpop.xlane.xlu0 %860 }
 0x402   :  { %v867_v1 = vpop.xlane.xlu1 %866 }
 0x405   :  { %v864_v3 = vpop.xlane.xlu0 %863 }
 0x406   :  { %v870_v15 = vpop.xlane.xlu1 %869 }
 0x40d   :  { %v7250_v17 = vpop.permute.xlu0 %877 }
 0x40e   :  { %v880_v20 = vadd.f32 %v7250_v17, %v861_v63  ;;  %v881_v26 = vadd.f32 %v7250_v17, %v864_v3  ;;  %v882_v45 = vadd.f32 %v7250_v17, %v867_v1  ;;  %v883_v27 = vadd.f32 %v7250_v17, %v870_v15  ;;  %v7276_v63 = vld [vmem:[#allocation12 + $0x18] sm:$0xff]  ;;  %v7283_v1 = vld [vmem:[#allocation12 + $0x8] sm:$0xff] }
 0x40f   :  { %5707 = vmatpush3.msra.mxu1 %v7276_v63 }
 0x410   :  { %v894_v30 = vrot.slane %v880_v20, %v7245_v4  ;;  %v899_v31 = vrot.slane %v881_v26, %v7248_v10  ;;  %v905_v41 = vrot.slane %v882_v45, %v7245_v4  ;;  %v909_v42 = vrot.slane %v883_v27, %v7248_v10  ;;  %5708 = vmatprep.subr.mxu1 %v8555_v24 }
 0x411   :  { %5709 = vmatpush3.msra.mxu1 %v7280_v0 }
 0x412   :  { %v901_v43 = vsel %vm900_vm4, %v899_v31, %v894_v30  ;;  %v910_v44 = vsel %vm900_vm4, %v909_v42, %v905_v41  ;;  %5710 = vmatprep.subr.mxu1 %v8555_v24 }
 0x413   :  { %v912_v46 = vsel %vm911_vm3, %v910_v44, %v901_v43  ;;  %5711 = vmatpush3.msra.mxu1 %v7283_v1 }
 0x414   :  { %v914_v48 = vsel %vm884_vm5, %v912_v46, -1e+30  ;;  %5712 = vmatprep.subr.mxu1 %v8555_v24 }
 0x415   :  { %v916_v49 = vsel %vm915_vm6, %v914_v48, -inf  ;;  %5713 = vmatpush3.msra.mxu1 %v7286_v2 }
 0x416   :  { %917 = vmax.xlane.f32.xlu1 %v916_v49  ;;  %1240 = vmatprep.subr.mxu1 %v7129_v16 }
 0x49f   :  { %v918_v50 = vpop.xlane.xlu1 %917 }
 0x4a0   :  { %v919_v52 = vsub.f32 %v914_v48, %v918_v50 }
 0x4a2   :  { %v920_v53 = vmul.f32 1.442695, %v919_v52 }
 0x4a4   :  { %6203 = vpow2.f32 %v920_v53 }
 0x4b1   :  { %v6204_v54 = vpop.eup %6203 }
 0x4b2   :  { %v922_v55 = vsel %vm915_vm6, %v6204_v54, 0.0 }
 0x4b3   :  { %923 = vadd.xlane.f32.xlu1 %v922_v55 }
 0x53c   :  { %v924_v56 = vpop.xlane.xlu1 %923 }
 0x53d   :  { %6205 = vrcp.f32 %v924_v56 }
 0x54a   :  { %v6206_v57 = vpop.eup %6205 }
 0x54b   :  { %v926_v58 = vmul.f32 %v6206_v57, %v6204_v54 }
 0x54d   :  { %v930_v59 = vrot.slane %v926_v58, %v7214_v19  ;;  %v941_v62 = vrot.slane %v926_v58, %v7273_v60 }
 0x54f   :  { %932 = vbcast.lane.b32.xlu1 %v930_v59, 256 }
 0x553   :  { %936 = vbcast.lane.b32.xlu1 %v930_v59, 264 }
 0x557   :  { %943 = vbcast.lane.b32.xlu1 %v941_v62, 256 }
 0x55b   :  { %947 = vbcast.lane.b32.xlu1 %v941_v62, 264 }
 0x5c1   :  { %v933_v3 = vpop.permute.xlu1 %932 }
 0x5c2   :  { %v949_v15 = vmul.f32 %v933_v3, %v7136_v21 }
 0x5c4   :  { %v953_v45 = vsel %vm355_vm2, %v949_v15, 0.0 }
 0x5c5   :  { %v937_v20 = vpop.permute.xlu1 %936 }
 0x5c6   :  { %v950_v26 = vmul.f32 %v937_v20, %v7138_v22 }
 0x5c8   :  { %v954_v27 = vsel %vm355_vm2, %v950_v26, 0.0 }
 0x5c9   :  { %v955_v30 = vadd.f32 %v954_v27, %v953_v45  ;;  %v944_v31 = vpop.permute.xlu1 %943 }
 0x5ca   :  { %v951_v42 = vmul.f32 %v944_v31, %v7140_v23 }
 0x5cb   :  { %v956_v41 = vrot.slane %v955_v30, 4 }
 0x5cc   :  { %v962_v48 = vsel %vm355_vm2, %v951_v42, 0.0 }
 0x5cd   :  { %v957_v43 = vadd.f32 %v956_v41, %v955_v30  ;;  %v948_v44 = vpop.permute.xlu1 %947 }
 0x5ce   :  { %v952_v46 = vmul.f32 %v948_v44, %v7149_v25 }
 0x5cf   :  { %v958_v50 = vrot.slane %v957_v43, 2 }
 0x5d0   :  { %v963_v49 = vsel %vm355_vm2, %v952_v46, 0.0 }
 0x5d1   :  { %v964_v52 = vadd.f32 %v963_v49, %v962_v48  ;;  %v959_v54 = vadd.f32 %v958_v50, %v957_v43  ;;  %v1095_v50 = vld [vmem:[#allocation18 + $0x30] sm:$0xff] }
 0x5d3   :  { %v965_v53 = vrot.slane %v964_v52, 4  ;;  %v960_v57 = vrot.slane %v959_v54, 1 }
 0x5d5   :  { %v966_v55 = vadd.f32 %v965_v53, %v964_v52  ;;  %v961_v62 = vadd.f32 %v960_v57, %v959_v54  ;;  %v1094_v52 = vld [vmem:[#allocation18 + $0x28] sm:$0xff]  ;;  %v1093_v53 = vld [vmem:[#allocation18 + $0x20] sm:$0xff]  ;;  %v1092_v54 = vld [vmem:[#allocation18 + $0x18] sm:$0xff] }
 0x5d6   :  { %v1090_v57 = vld [vmem:[#allocation18 + $0x8] sm:$0xff] }
 0x5d7   :  { %v967_v56 = vrot.slane %v966_v55, 2 }
 0x5d9   :  { %v968_v58 = vadd.f32 %v967_v56, %v966_v55  ;;  %v1091_v56 = vld [vmem:[#allocation18 + $0x10] sm:$0xff] }
 0x5db   :  { %v969_v59 = vrot.slane %v968_v58, 1 }
 0x5dd   :  { %v970_v3 = vadd.f32 %v969_v59, %v968_v58  ;;  %v1089_v58 = vld [vmem:[#allocation18] sm:$0xff] }
 0x5df   :  { %v7305_v15 = vsel %vm911_vm3, %v970_v3, %v961_v62 }
 0x5e0   :  { %8584 = vst [vmem:[#allocation54_spill] sm:$0xff] %v7305_v15  ;;  %5715 = vmatmul.mubr.msk.f32.vlgmr.msra.gmra.mxu1 %vm355_vm2, %v7305_v15 }
 0x5e1   :  { %1241 = vmatpush1.msra.mxu1 %v7153_v34  ;;  %1280 = vmatprep.mubr.f32.mxu1 %v8555_v24 }
 0x5e2   :  { %1242 = vmatprep.subr.mxu1 %v7156_v35 }
 0x5e3   :  { %1243 = vmatpush1.msra.mxu1 %v7159_v36 }
 0x5e4   :  { %1244 = vmatprep.subr.mxu1 %v7162_v37 }
 0x5e5   :  { %1245 = vmatpush1.msra.mxu1 %v7166_v38 }
 0x5e6   :  { %1246 = vmatprep.subr.mxu1 %v7169_v39 }
 0x5e7   :  { %1247 = vmatpush1.msra.mxu1 %v7172_v40 }
 0x5e8   :  { %5736 = vmatprep.subr.mxu1 %v8555_v24 }
 0x6a0   :  { %v1046_v20 = vpop.f32.mrf.mxu1 }
 0x6a1   :  { %v1047_v26 = vadd.f32 %v1046_v20, %v7197_v9 }
 0x6a2   :  { %v5716_v45 = vpop.f32.mrf.mxu1 }
 0x6a3   :  { %v1055_v27 = vadd.f32 %v7183_v61, %v1047_v26  ;;  %v1096_v61 = vld [vmem:[#allocation18 + $0x38] sm:$0xff] }
 0x6a4   :  { %5718 = vmatpush3.msra.mxu0 %v1096_v61 }
 0x6a5   :  { %6207 = vtanh.f32 %v1055_v27  ;;  %v5407_v31 = vmul.f32 -1.442695, %v1055_v27  ;;  %5719 = vmatprep.subr.mxu0 %v8555_v24 }
 0x6a6   :  { %5720 = vmatpush3.msra.mxu0 %v1095_v50 }
 0x6a7   :  { %6209 = vpow2.f32 %v5407_v31  ;;  %5721 = vmatprep.subr.mxu0 %v8555_v24 }
 0x6a8   :  { %5722 = vmatpush3.msra.mxu0 %v1094_v52 }
 0x6a9   :  { %5723 = vmatprep.subr.mxu0 %v8555_v24 }
 0x6aa   :  { %5724 = vmatpush3.msra.mxu0 %v1093_v53 }
 0x6ab   :  { %5725 = vmatprep.subr.mxu0 %v8555_v24 }
 0x6ac   :  { %5726 = vmatpush3.msra.mxu0 %v1092_v54 }
 0x6ad   :  { %5727 = vmatprep.subr.mxu0 %v8555_v24 }
 0x6ae   :  { %5728 = vmatpush3.msra.mxu0 %v1091_v56 }
 0x6af   :  { %5729 = vmatprep.subr.mxu0 %v8555_v24 }
 0x6b0   :  { %5730 = vmatpush3.msra.mxu0 %v1090_v57 }
 0x6b1   :  { %5731 = vmatprep.subr.mxu0 %v8555_v24 }
 0x6b2   :  { %v6208_v30 = vpop.eup %6207  ;;  %5732 = vmatpush3.msra.mxu0 %v1089_v58 }
 0x6b3   :  { %1065 = vrot.lane.b32.xlu1 %v6208_v30, %s6912_s22  ;;  %5747 = vmatprep.subr.mxu0 %v8555_v24 }
 0x6b4   :  { %v6210_v41 = vpop.eup %6209 }
 0x6b5   :  { %v1059_v42 = vadd.f32 1.0, %v6210_v41 }
 0x6b7   :  { %6211 = vrcp.f32 %v1059_v42 }
 0x6c4   :  { %v6212_v43 = vpop.eup %6211 }
 0x6c5   :  { %v1063_v9 = vmul.f32 0.0, %v6212_v43 }
 0x725   :  { %v1066_v44 = vpop.permute.xlu1 %1065 }
 0x726   :  { %v1068_v46 = vmul.f32 %v6212_v43, %v1066_v44 }
 0x728   :  { %1070 = vrot.lane.b32.xlu1 %v1068_v46, %s6913_s23 }
 0x79a   :  { %v1071_v48 = vpop.permute.xlu1 %1070 }
 0x79b   :  { %v7322_v49 = vadd.f32 %v1071_v48, %v1063_v9 }
 0x79d   :  { %6213 = vtanh.f32 %v7322_v49 }
 0x7aa   :  { %v6214_v55 = vpop.eup %6213 }
 0x7ab   :  { %1076 = vrot.lane.b32.xlu0 %v6214_v55, %s6912_s22 }
 0x81d   :  { %v1077_v59 = vpop.permute.xlu0 %1076 }
 0x81e   :  { %v1079_v62 = vmul.f32 %v6212_v43, %v1077_v59 }
 0x820   :  { %v7334_v3 = vmul.f32 0.9, %v1079_v62 }
 0x822   :  { %1085 = vrot.lane.b32.xlu1 %v7334_v3, %s6913_s23 }
 0x894   :  { %v1086_v20 = vpop.permute.xlu1 %1085 }
 0x895   :  { %v1088_v26 = vsel %vm355_vm2, %v1086_v20, 0.0  ;;  %5411 = vmatmul.mubr.msk.f32.vlgmr.msra.gmra.mxu1 %vm355_vm2, %v1086_v20 }
 0x896   :  { %5734 = vmatmul.mubr.msk.f32.vlgmr.msra.gmra.mxu0 %vm1104_vm8, %v1088_v26  ;;  %5737 = vmatpush3.msra.mxu1 %v7276_v63 }
 0x897   :  { %5738 = vmatprep.subr.mxu1 %v8555_v24  ;;  %5744 = vmatprep.mubr.msk.f32.mxu1 %vm6911_vm7, %v8555_v24 }
 0x898   :  { %5739 = vmatpush3.msra.mxu1 %v7280_v0  ;;  %5748 = vmatpush3.msra.mxu0 %v1096_v61 }
 0x899   :  { %5740 = vmatprep.subr.mxu1 %v8555_v24  ;;  %5749 = vmatprep.subr.mxu0 %v8555_v24 }
 0x89a   :  { %5741 = vmatpush3.msra.mxu1 %v7283_v1  ;;  %5750 = vmatpush3.msra.mxu0 %v1095_v50 }
 0x89b   :  { %5742 = vmatprep.subr.mxu1 %v8555_v24  ;;  %5751 = vmatprep.subr.mxu0 %v8555_v24 }
 0x89c   :  { %5743 = vmatpush3.msra.mxu1 %v7286_v2  ;;  %5752 = vmatpush3.msra.mxu0 %v1094_v52 }
 0x89d   :  { %1682 = vmatprep.subr.mxu1 %v7129_v16  ;;  %5753 = vmatprep.subr.mxu0 %v8555_v24 }
 0x89e   :  { %5754 = vmatpush3.msra.mxu0 %v1093_v53  ;;  %5763 = vmatprep.mubr.msk.f32.mxu0 %vm6911_vm7, %v8555_v24 }
 0x89f   :  { %5755 = vmatprep.subr.mxu0 %v8555_v24 }
 0x8a0   :  { %5756 = vmatpush3.msra.mxu0 %v1092_v54 }
 0x8a1   :  { %5757 = vmatprep.subr.mxu0 %v8555_v24 }
 0x8a2   :  { %5758 = vmatpush3.msra.mxu0 %v1091_v56 }
 0x8a3   :  { %5759 = vmatprep.subr.mxu0 %v8555_v24 }
 0x8a4   :  { %5760 = vmatpush3.msra.mxu0 %v1090_v57 }
 0x8a5   :  { %5761 = vmatprep.subr.mxu0 %v8555_v24 }
 0x8a6   :  { %5762 = vmatpush3.msra.mxu0 %v1089_v58 }
 0x8a7   :  { %5777 = vmatprep.subr.mxu0 %v8555_v24 }
 0x955   :  { %v7361_v45 = vpop.f32.mrf.mxu1 }
 0x956   :  { %v7363_v27 = vpop.f32.mrf.mxu0 }
 0x957   :  { %v1284_v30 = vpop.f32.mrf.mxu1 }
 0x958   :  { %v1294_v31 = vrot.slane %v1284_v30, %v7186_v5  ;;  %v5735_v41 = vpop.f32.mrf.mxu0 }
 0x95a   :  { %v1295_v42 = vcombine.high %v1294_v31, %v1294_v31  ;;  %v1302_v43 = vrot.slane %v1294_v31, %v7186_v5 }
 0x95c   :  { %v1309_v44 = vrot.slane %v1295_v42, %v7186_v5  ;;  %v1313_v46 = vrot.slane %v1302_v43, %v7214_v19 }
 0x95e   :  { %v1317_v9 = vrot.slane %v1309_v44, %v7214_v19  ;;  %v1320_v48 = vadd.f32 %v1313_v46, %v7219_v29  ;;  %v1321_v61 = vadd.f32 %v1313_v46, %v7217_v28 }
 0x960   :  { %v1322_v50 = vadd.f32 %v1317_v9, %v7225_v33  ;;  %v1323_v52 = vadd.f32 %v1317_v9, %v7223_v32  ;;  %6215 = vtanh.f32 %v1320_v48 }
 0x961   :  { %6217 = vtanh.f32 %v1321_v61 }
 0x962   :  { %6219 = vtanh.f32 %v1322_v50 }
 0x963   :  { %6221 = vtanh.f32 %v1323_v52 }
 0x96d   :  { %v6216_v53 = vpop.eup %6215 }
 0x96e   :  { %v6218_v54 = vpop.eup %6217  ;;  %v1328_v55 = vmul.f32 %v6216_v53, %v7233_v47 }
 0x96f   :  { %v6220_v56 = vpop.eup %6219  ;;  %v1329_v57 = vmul.f32 %v6218_v54, %v7233_v47 }
 0x970   :  { %v1332_v58 = vsel %vm546_vm1, %v1328_v55, 0.0  ;;  %v1330_v59 = vmul.f32 %v6220_v56, %v7233_v47  ;;  %v6222_v62 = vpop.eup %6221 }
 0x971   :  { %v1335_v20 = vsel %vm546_vm1, %v1329_v57, 0.0  ;;  %1333 = vadd.xlane.f32.xlu0 %v1332_v58  ;;  %v1331_v30 = vmul.f32 %v6222_v62, %v7233_v47 }
 0x972   :  { %1336 = vadd.xlane.f32.xlu1 %v1335_v20  ;;  %v1338_v26 = vsel %vm546_vm1, %v1330_v59, 0.0 }
 0x973   :  { %v1341_v31 = vsel %vm546_vm1, %v1331_v30, 0.0 }
 0x975   :  { %1339 = vadd.xlane.f32.xlu0 %v1338_v26 }
 0x979   :  { %1342 = vadd.xlane.f32.xlu0 %v1341_v31 }
 0x9fa   :  { %v1334_v41 = vpop.xlane.xlu0 %1333 }
 0x9fb   :  { %v1337_v42 = vpop.xlane.xlu1 %1336  ;;  %v1344_v46 = vadd.f32 %v1334_v41, %v7250_v17 }
 0x9fc   :  { %v1345_v44 = vadd.f32 %v1337_v42, %v7250_v17 }
 0x9fd   :  { %v1355_v50 = vrot.slane %v1344_v46, %v7245_v4 }
 0x9fe   :  { %v1340_v43 = vpop.xlane.xlu0 %1339  ;;  %v1359_v61 = vrot.slane %v1345_v44, %v7248_v10 }
 0x9ff   :  { %v1346_v9 = vadd.f32 %v1340_v43, %v7250_v17 }
 0xa00   :  { %v1360_v55 = vsel %vm900_vm4, %v1359_v61, %v1355_v50 }
 0xa01   :  { %v1364_v53 = vrot.slane %v1346_v9, %v7245_v4 }
 0xa02   :  { %v1343_v48 = vpop.xlane.xlu0 %1342 }
 0xa03   :  { %v1347_v52 = vadd.f32 %v1343_v48, %v7250_v17 }
 0xa05   :  { %v1368_v54 = vrot.slane %v1347_v52, %v7248_v10 }
 0xa07   :  { %v1369_v56 = vsel %vm900_vm4, %v1368_v54, %v1364_v53 }
 0xa08   :  { %v1370_v57 = vsel %vm911_vm3, %v1369_v56, %v1360_v55 }
 0xa09   :  { %v1372_v58 = vsel %vm884_vm5, %v1370_v57, -1e+30 }
 0xa0a   :  { %v1373_v59 = vsel %vm915_vm6, %v1372_v58, -inf }
 0xa0b   :  { %1374 = vmax.xlane.f32.xlu1 %v1373_v59 }
 0xa94   :  { %v1375_v62 = vpop.xlane.xlu1 %1374 }
 0xa95   :  { %v1376_v20 = vsub.f32 %v1372_v58, %v1375_v62 }
 0xa97   :  { %v1377_v26 = vmul.f32 1.442695, %v1376_v20 }
 0xa99   :  { %6223 = vpow2.f32 %v1377_v26 }
 0xaa6   :  { %v6224_v30 = vpop.eup %6223 }
 0xaa7   :  { %v1379_v31 = vsel %vm915_vm6, %v6224_v30, 0.0 }
 0xaa8   :  { %1380 = vadd.xlane.f32.xlu0 %v1379_v31 }
 0xb31   :  { %v1381_v41 = vpop.xlane.xlu0 %1380 }
 0xb32   :  { %6225 = vrcp.f32 %v1381_v41 }
 0xb3f   :  { %v6226_v42 = vpop.eup %6225 }
 0xb40   :  { %v1383_v43 = vmul.f32 %v6226_v42, %v6224_v30 }
 0xb42   :  { %v1387_v44 = vrot.slane %v1383_v43, %v7214_v19  ;;  %v1398_v46 = vrot.slane %v1383_v43, %v7273_v60 }
 0xb44   :  { %1393 = vbcast.lane.b32.xlu0 %v1387_v44, 264  ;;  %1389 = vbcast.lane.b32.xlu1 %v1387_v44, 256 }
 0xb48   :  { %1400 = vbcast.lane.b32.xlu1 %v1398_v46, 256 }
 0xb4c   :  { %1404 = vbcast.lane.b32.xlu1 %v1398_v46, 264 }
 0xbb6   :  { %v1394_v9 = vpop.permute.xlu0 %1393  ;;  %v1390_v48 = vpop.permute.xlu1 %1389 }
 0xbb7   :  { %v1407_v61 = vmul.f32 %v1394_v9, %v7138_v22  ;;  %v1406_v50 = vmul.f32 %v1390_v48, %v7136_v21 }
 0xbb9   :  { %v1411_v52 = vsel %vm355_vm2, %v1407_v61, 0.0  ;;  %v1410_v53 = vsel %vm355_vm2, %v1406_v50, 0.0 }
 0xbba   :  { %v1412_v54 = vadd.f32 %v1411_v52, %v1410_v53  ;;  %v1401_v55 = vpop.permute.xlu1 %1400  ;;  %v7426_v53 = vmul.f32 0.9, %v7322_v49 }
 0xbbb   :  { %v1408_v57 = vmul.f32 %v1401_v55, %v7140_v23 }
 0xbbc   :  { %v1413_v56 = vrot.slane %v1412_v54, 4 }
 0xbbd   :  { %v1419_v20 = vsel %vm355_vm2, %v1408_v57, 0.0 }
 0xbbe   :  { %v1414_v58 = vadd.f32 %v1413_v56, %v1412_v54  ;;  %v1405_v59 = vpop.permute.xlu1 %1404 }
 0xbbf   :  { %v1409_v62 = vmul.f32 %v1405_v59, %v7149_v25 }
 0xbc0   :  { %v1415_v22 = vrot.slane %v1414_v58, 2 }
 0xbc1   :  { %v1420_v26 = vsel %vm355_vm2, %v1409_v62, 0.0 }
 0xbc2   :  { %v1421_v30 = vadd.f32 %v1420_v26, %v1419_v20  ;;  %v1416_v31 = vadd.f32 %v1415_v22, %v1414_v58  ;;  %v1531_v58 = vmul.f32 0.1, %v7334_v3 }
 0xbc4   :  { %v1422_v21 = vrot.slane %v1421_v30, 4  ;;  %v1417_v43 = vrot.slane %v1416_v31, 1 }
 0xbc6   :  { %v1423_v41 = vadd.f32 %v1422_v21, %v1421_v30  ;;  %v1418_v9 = vadd.f32 %v1417_v43, %v1416_v31 }
 0xbc8   :  { %v1424_v42 = vrot.slane %v1423_v41, 2 }
 0xbca   :  { %v1425_v44 = vadd.f32 %v1424_v42, %v1423_v41 }
 0xbcc   :  { %v1426_v46 = vrot.slane %v1425_v44, 1 }
 0xbce   :  { %v1427_v48 = vadd.f32 %v1426_v46, %v1425_v44 }
 0xbd0   :  { %v7408_v23 = vsel %vm911_vm3, %v1427_v48, %v1418_v9 }
 0xbd1   :  { %8585 = vst [vmem:[#allocation55_spill] sm:$0xff] %v7408_v23  ;;  %5745 = vmatmul.mubr.msk.f32.vlgmr.msra.gmra.mxu1 %vm355_vm2, %v7408_v23 }
 0xbd2   :  { %1683 = vmatpush1.msra.mxu1 %v7153_v34  ;;  %1722 = vmatprep.mubr.f32.mxu1 %v8555_v24 }
 0xbd3   :  { %1684 = vmatprep.subr.mxu1 %v7156_v35 }
 0xbd4   :  { %1685 = vmatpush1.msra.mxu1 %v7159_v36 }
 0xbd5   :  { %1686 = vmatprep.subr.mxu1 %v7162_v37 }
 0xbd6   :  { %1687 = vmatpush1.msra.mxu1 %v7166_v38 }
 0xbd7   :  { %1688 = vmatprep.subr.mxu1 %v7169_v39 }
 0xbd8   :  { %1689 = vmatpush1.msra.mxu1 %v7172_v40 }
 0xbd9   :  { %5766 = vmatprep.subr.mxu1 %v8555_v24 }
 0xc91   :  { %v1499_v25 = vpop.f32.mrf.mxu1 }
 0xc92   :  { %v1500_v61 = vadd.f32 %v1499_v25, %v7361_v45 }
 0xc93   :  { %v5746_v34 = vpop.f32.mrf.mxu1 }
 0xc94   :  { %v1506_v50 = vadd.f32 %v7189_v6, %v1500_v61 }
 0xc96   :  { %6227 = vtanh.f32 %v1506_v50  ;;  %v5413_v36 = vmul.f32 -1.442695, %v1506_v50 }
 0xc98   :  { %6229 = vpow2.f32 %v5413_v36 }
 0xca3   :  { %v6228_v35 = vpop.eup %6227 }
 0xca4   :  { %1516 = vrot.lane.b32.xlu0 %v6228_v35, %s6912_s22 }
 0xca5   :  { %v6230_v37 = vpop.eup %6229 }
 0xca6   :  { %v1510_v38 = vadd.f32 1.0, %v6230_v37 }
 0xca8   :  { %6231 = vrcp.f32 %v1510_v38 }
 0xcb5   :  { %v6232_v39 = vpop.eup %6231 }
 0xcb6   :  { %v1514_v45 = vmul.f32 %v6232_v39, %v7426_v53 }
 0xd16   :  { %v1517_v52 = vpop.permute.xlu0 %1516 }
 0xd17   :  { %v1519_v40 = vmul.f32 %v6232_v39, %v1517_v52 }
 0xd19   :  { %1521 = vrot.lane.b32.xlu1 %v1519_v40, %s6913_s23 }
 0xd8b   :  { %v1522_v6 = vpop.permute.xlu1 %1521 }
 0xd8c   :  { %v7429_v54 = vadd.f32 %v1522_v6, %v1514_v45 }
 0xd8e   :  { %6233 = vtanh.f32 %v7429_v54 }
 0xd9b   :  { %v6234_v55 = vpop.eup %6233 }
 0xd9c   :  { %1527 = vrot.lane.b32.xlu0 %v6234_v55, %s6912_s22 }
 0xe0e   :  { %v1528_v56 = vpop.permute.xlu0 %1527 }
 0xe0f   :  { %v1530_v57 = vmul.f32 %v6232_v39, %v1528_v56 }
 0xe11   :  { %v1532_v59 = vmul.f32 0.9, %v1530_v57 }
 0xe13   :  { %v7434_v62 = vadd.f32 %v1532_v59, %v1531_v58 }
 0xe15   :  { %1538 = vrot.lane.b32.xlu1 %v7434_v62, %s6913_s23 }
 0xe87   :  { %v7438_v49 = vpop.permute.xlu1 %1538 }
 0xe88   :  { %5416 = vmatmul.mubr.msk.f32.vlgmr.msra.gmra.mxu1 %vm355_vm2, %v7438_v49 }
 0xe89   :  { %5767 = vmatpush3.msra.mxu1 %v7276_v63  ;;  %5774 = vmatprep.mubr.msk.f32.mxu1 %vm6911_vm7, %v8555_v24 }
 0xe8a   :  { %5768 = vmatprep.subr.mxu1 %v8555_v24 }
 0xe8b   :  { %5769 = vmatpush3.msra.mxu1 %v7280_v0 }
 0xe8c   :  { %5770 = vmatprep.subr.mxu1 %v8555_v24 }
 0xe8d   :  { %5771 = vmatpush3.msra.mxu1 %v7283_v1 }
 0xe8e   :  { %5772 = vmatprep.subr.mxu1 %v8555_v24 }
 0xe8f   :  { %5773 = vmatpush3.msra.mxu1 %v7286_v2 }
 0xe90   :  { %2125 = vmatprep.subr.mxu1 %v7129_v16 }
 0xf48   :  { %v7452_v3 = vpop.f32.mrf.mxu1 }
 0xf4a   :  { %v1726_v20 = vpop.f32.mrf.mxu1 }
 0xf4b   :  { %v1736_v26 = vrot.slane %v1726_v20, %v7186_v5 }
 0xf4d   :  { %v1737_v22 = vcombine.high %v1736_v26, %v1736_v26  ;;  %v1744_v30 = vrot.slane %v1736_v26, %v7186_v5 }
 0xf4f   :  { %v1751_v21 = vrot.slane %v1737_v22, %v7186_v5  ;;  %v1755_v31 = vrot.slane %v1744_v30, %v7214_v19 }
 0xf51   :  { %v1759_v41 = vrot.slane %v1751_v21, %v7214_v19  ;;  %v1762_v42 = vadd.f32 %v1755_v31, %v7219_v29  ;;  %v1763_v43 = vadd.f32 %v1755_v31, %v7217_v28 }
 0xf53   :  { %v1764_v16 = vadd.f32 %v1759_v41, %v7225_v33  ;;  %v1765_v44 = vadd.f32 %v1759_v41, %v7223_v32  ;;  %6235 = vtanh.f32 %v1762_v42 }
 0xf54   :  { %6237 = vtanh.f32 %v1763_v43 }
 0xf55   :  { %6239 = vtanh.f32 %v1764_v16 }
 0xf56   :  { %6241 = vtanh.f32 %v1765_v44 }
 0xf60   :  { %v6236_v46 = vpop.eup %6235 }
 0xf61   :  { %v6238_v9 = vpop.eup %6237  ;;  %v1770_v48 = vmul.f32 %v6236_v46, %v7233_v47 }
 0xf62   :  { %v6240_v25 = vpop.eup %6239  ;;  %v1771_v61 = vmul.f32 %v6238_v9, %v7233_v47 }
 0xf63   :  { %v1774_v34 = vsel %vm546_vm1, %v1770_v48, 0.0  ;;  %v1772_v50 = vmul.f32 %v6240_v25, %v7233_v47  ;;  %v6242_v35 = vpop.eup %6241 }
 0xf64   :  { %v1777_v36 = vsel %vm546_vm1, %v1771_v61, 0.0  ;;  %1775 = vadd.xlane.f32.xlu0 %v1774_v34  ;;  %v1773_v38 = vmul.f32 %v6242_v35, %v7233_v47 }
 0xf65   :  { %1778 = vadd.xlane.f32.xlu1 %v1777_v36  ;;  %v1780_v37 = vsel %vm546_vm1, %v1772_v50, 0.0 }
 0xf66   :  { %v1783_v39 = vsel %vm546_vm1, %v1773_v38, 0.0 }
 0xf68   :  { %1781 = vadd.xlane.f32.xlu0 %v1780_v37  ;;  %v7488_v37 = vld [vmem:[#allocation3 + $0x8] sm:$0xff] }
 0xf6c   :  { %1784 = vadd.xlane.f32.xlu0 %v1783_v39  ;;  %v7491_v39 = vld [vmem:[#allocation3] sm:$0xff] }
 0xfed   :  { %v1776_v52 = vpop.xlane.xlu0 %1775 }
 0xfee   :  { %v1779_v40 = vpop.xlane.xlu1 %1778  ;;  %v1786_v55 = vadd.f32 %v1776_v52, %v7250_v17 }
 0xfef   :  { %v1787_v6 = vadd.f32 %v1779_v40, %v7250_v17 }
 0xff0   :  { %v1797_v59 = vrot.slane %v1786_v55, %v7245_v4 }
 0xff1   :  { %v1782_v45 = vpop.xlane.xlu0 %1781  ;;  %v1801_v58 = vrot.slane %v1787_v6, %v7248_v10 }
 0xff2   :  { %v1788_v56 = vadd.f32 %v1782_v45, %v7250_v17 }
 0xff3   :  { %v1802_v30 = vsel %vm900_vm4, %v1801_v58, %v1797_v59 }
 0xff4   :  { %v1806_v26 = vrot.slane %v1788_v56, %v7245_v4 }
 0xff5   :  { %v1785_v57 = vpop.xlane.xlu0 %1784 }
 0xff6   :  { %v1789_v20 = vadd.f32 %v1785_v57, %v7250_v17  ;;  %v7496_v57 = vld [vmem:[#allocation3 + $0x10] sm:$0xff] }
 0xff8   :  { %v1810_v22 = vrot.slane %v1789_v20, %v7248_v10 }
 0xffa   :  { %v1811_v21 = vsel %vm900_vm4, %v1810_v22, %v1806_v26  ;;  %v7499_v26 = vld [vmem:[#allocation3 + $0x18] sm:$0xff] }
 0xffb   :  { %v1812_v31 = vsel %vm911_vm3, %v1811_v21, %v1802_v30 }
 0xffc   :  { %v1814_v41 = vsel %vm884_vm5, %v1812_v31, -1e+30 }
 0xffd   :  { %v1815_v42 = vsel %vm915_vm6, %v1814_v41, -inf }
 0xffe   :  { %1816 = vmax.xlane.f32.xlu1 %v1815_v42 }
0x1087   :  { %v1817_v43 = vpop.xlane.xlu1 %1816 }
0x1088   :  { %v1818_v16 = vsub.f32 %v1814_v41, %v1817_v43 }
0x108a   :  { %v1819_v44 = vmul.f32 1.442695, %v1818_v16 }
0x108c   :  { %6243 = vpow2.f32 %v1819_v44 }
0x1099   :  { %v6244_v46 = vpop.eup %6243 }
0x109a   :  { %v1821_v9 = vsel %vm915_vm6, %v6244_v46, 0.0 }
0x109b   :  { %1822 = vadd.xlane.f32.xlu0 %v1821_v9 }
0x1124   :  { %v1823_v48 = vpop.xlane.xlu0 %1822 }
0x1125   :  { %6245 = vrcp.f32 %v1823_v48 }
0x1132   :  { %v6246_v25 = vpop.eup %6245 }
0x1133   :  { %v1825_v61 = vmul.f32 %v6246_v25, %v6244_v46 }
0x1135   :  { %v1829_v34 = vrot.slane %v1825_v61, %v7214_v19  ;;  %v1840_v50 = vrot.slane %v1825_v61, %v7273_v60 }
0x1137   :  { %1835 = vbcast.lane.b32.xlu0 %v1829_v34, 264  ;;  %1831 = vbcast.lane.b32.xlu1 %v1829_v34, 256 }
0x113b   :  { %1842 = vbcast.lane.b32.xlu1 %v1840_v50, 256 }
0x113f   :  { %1846 = vbcast.lane.b32.xlu1 %v1840_v50, 264  ;;  %v7509_v50 = vld [vmem:[#allocation17 + $0x30] sm:$0xff] }
0x11a9   :  { %v1836_v35 = vpop.permute.xlu0 %1835  ;;  %v1832_v36 = vpop.permute.xlu1 %1831 }
0x11aa   :  { %v1849_v38 = vmul.f32 %v7488_v37, %v1836_v35  ;;  %v1848_v52 = vmul.f32 %v7491_v39, %v1832_v36  ;;  %v7513_v35 = vld [vmem:[#allocation17 + $0x28] sm:$0xff]  ;;  %v7516_v36 = vld [vmem:[#allocation17 + $0x20] sm:$0xff] }
0x11ac   :  { %v1853_v40 = vsel %vm355_vm2, %v1849_v38, 0.0  ;;  %v1852_v45 = vsel %vm355_vm2, %v1848_v52, 0.0  ;;  %v7519_v38 = vld [vmem:[#allocation17 + $0x18] sm:$0xff]  ;;  %v7522_v52 = vld [vmem:[#allocation17 + $0x10] sm:$0xff] }
0x11ad   :  { %v1854_v6 = vadd.f32 %v1853_v40, %v1852_v45  ;;  %v1843_v55 = vpop.permute.xlu1 %1842  ;;  %v7525_v40 = vld [vmem:[#allocation17 + $0x8] sm:$0xff]  ;;  %v7528_v45 = vld [vmem:[#allocation17] sm:$0xff] }
0x11ae   :  { %v1850_v58 = vmul.f32 %v7496_v57, %v1843_v55 }
0x11af   :  { %v1855_v56 = vrot.slane %v1854_v6, 4 }
0x11b0   :  { %v1861_v30 = vsel %vm355_vm2, %v1850_v58, 0.0 }
0x11b1   :  { %v1856_v59 = vadd.f32 %v1855_v56, %v1854_v6  ;;  %v1847_v20 = vpop.permute.xlu1 %1846 }
0x11b2   :  { %v1851_v22 = vmul.f32 %v7499_v26, %v1847_v20 }
0x11b3   :  { %v1857_v31 = vrot.slane %v1856_v59, 2 }
0x11b4   :  { %v1862_v21 = vsel %vm355_vm2, %v1851_v22, 0.0 }
0x11b5   :  { %v1863_v41 = vadd.f32 %v1862_v21, %v1861_v30  ;;  %v1858_v43 = vadd.f32 %v1857_v31, %v1856_v59 }
0x11b7   :  { %v1864_v42 = vrot.slane %v1863_v41, 4  ;;  %v1859_v46 = vrot.slane %v1858_v43, 1 }
0x11b9   :  { %v1865_v16 = vadd.f32 %v1864_v42, %v1863_v41  ;;  %v1860_v25 = vadd.f32 %v1859_v46, %v1858_v43  ;;  %v1535_v42 = vmul.f32 0.9, %v7429_v54 }
0x11bb   :  { %v1866_v44 = vrot.slane %v1865_v16, 2 }
0x11bd   :  { %v1867_v9 = vadd.f32 %v1866_v44, %v1865_v16 }
0x11bf   :  { %v1868_v48 = vrot.slane %v1867_v9, 1 }
0x11c1   :  { %v1869_v61 = vadd.f32 %v1868_v48, %v1867_v9 }
0x11c3   :  { %v7505_v34 = vsel %vm911_vm3, %v1869_v61, %v1860_v25  ;;  %v1974_v61 = vmul.f32 0.1, %v7434_v62  ;;  %v7563_v62 = vld [vmem:[#allocation17 + $0x38] sm:$0xff] }
0x11c4   :  { %8586 = vst [vmem:[#allocation56_spill] sm:$0xff] %v7505_v34  ;;  %5775 = vmatmul.mubr.msk.f32.vlgmr.msra.gmra.mxu1 %vm355_vm2, %v7505_v34 }
0x11c5   :  { %2126 = vmatpush1.msra.mxu1 %v7509_v50  ;;  %2165 = vmatprep.mubr.f32.mxu1 %v8555_v24 }
0x11c6   :  { %2127 = vmatprep.subr.mxu1 %v7513_v35 }
0x11c7   :  { %2128 = vmatpush1.msra.mxu1 %v7516_v36 }
0x11c8   :  { %2129 = vmatprep.subr.mxu1 %v7519_v38 }
0x11c9   :  { %2130 = vmatpush1.msra.mxu1 %v7522_v52 }
0x11ca   :  { %2131 = vmatprep.subr.mxu1 %v7525_v40 }
0x11cb   :  { %2132 = vmatpush1.msra.mxu1 %v7528_v45 }
0x11cc   :  { %5796 = vmatprep.subr.mxu1 %v8555_v24 }
0x1284   :  { %v1941_v6 = vpop.f32.mrf.mxu1 }
0x1285   :  { %v1942_v55 = vadd.f32 %v1941_v6, %v7452_v3  ;;  %v1534_v3 = vmul.f32 0.1, %v7426_v53 }
0x1286   :  { %v5776_v56 = vpop.f32.mrf.mxu1 }
0x1287   :  { %v1949_v58 = vadd.f32 %v7192_v7, %v1942_v55  ;;  %v7538_v43 = vadd.f32 %v1535_v42, %v1534_v3 }
0x1289   :  { %6247 = vtanh.f32 %v1949_v58  ;;  %v5418_v20 = vmul.f32 -1.442695, %v1949_v58 }
0x128b   :  { %6249 = vpow2.f32 %v5418_v20 }
0x1296   :  { %v6248_v59 = vpop.eup %6247 }
0x1297   :  { %1959 = vrot.lane.b32.xlu0 %v6248_v59, %s6912_s22 }
0x1298   :  { %v6250_v22 = vpop.eup %6249 }
0x1299   :  { %v1953_v30 = vadd.f32 1.0, %v6250_v22 }
0x129b   :  { %6251 = vrcp.f32 %v1953_v30 }
0x12a8   :  { %v6252_v21 = vpop.eup %6251 }
0x12a9   :  { %v1957_v7 = vmul.f32 %v6252_v21, %v7538_v43 }
0x1309   :  { %v1960_v31 = vpop.permute.xlu0 %1959 }
0x130a   :  { %v1962_v41 = vmul.f32 %v6252_v21, %v1960_v31 }
0x130c   :  { %1964 = vrot.lane.b32.xlu1 %v1962_v41, %s6913_s23 }
0x137e   :  { %v1965_v16 = vpop.permute.xlu1 %1964 }
0x137f   :  { %v7541_v44 = vadd.f32 %v1965_v16, %v1957_v7  ;;  %v7581_v16 = vld [vmem:[%s8582_s5] ss:$0 sm:$0xff] }
0x1381   :  { %6253 = vtanh.f32 %v7541_v44 }
0x138e   :  { %v6254_v46 = vpop.eup %6253 }
0x138f   :  { %1970 = vrot.lane.b32.xlu0 %v6254_v46, %s6912_s22 }
0x1401   :  { %v1971_v9 = vpop.permute.xlu0 %1970 }
0x1402   :  { %v1973_v48 = vmul.f32 %v6252_v21, %v1971_v9 }
0x1404   :  { %v1975_v25 = vmul.f32 0.9, %v1973_v48 }
0x1406   :  { %v7546_v54 = vadd.f32 %v1975_v25, %v1974_v61 }
0x1408   :  { %1981 = vrot.lane.b32.xlu1 %v7546_v54, %s6913_s23 }
0x147a   :  { %v7550_v53 = vpop.permute.xlu1 %1981 }
0x147b   :  { %5421 = vmatmul.mubr.msk.f32.vlgmr.msra.gmra.mxu1 %vm355_vm2, %v7550_v53 }
0x147c   :  { %5797 = vmatpush3.msra.mxu1 %v7276_v63  ;;  %5804 = vmatprep.mubr.msk.f32.mxu1 %vm6911_vm7, %v8555_v24 }
0x147d   :  { %5798 = vmatprep.subr.mxu1 %v8555_v24 }
0x147e   :  { %5799 = vmatpush3.msra.mxu1 %v7280_v0 }
0x147f   :  { %5800 = vmatprep.subr.mxu1 %v8555_v24 }
0x1480   :  { %5801 = vmatpush3.msra.mxu1 %v7283_v1 }
0x1481   :  { %5802 = vmatprep.subr.mxu1 %v8555_v24 }
0x1482   :  { %5803 = vmatpush3.msra.mxu1 %v7286_v2 }
0x1483   :  { %2568 = vmatprep.subr.mxu1 %v7563_v62 }
0x153b   :  { %v7566_v63 = vpop.f32.mrf.mxu1 }
0x153d   :  { %v2169_v6 = vpop.f32.mrf.mxu1 }
0x153e   :  { %v2179_v55 = vrot.slane %v2169_v6, %v7186_v5 }
0x1540   :  { %v2180_v56 = vcombine.high %v2179_v55, %v2179_v55  ;;  %v2187_v0 = vrot.slane %v2179_v55, %v7186_v5 }
0x1542   :  { %v2194_v58 = vrot.slane %v2180_v56, %v7186_v5  ;;  %v2198_v1 = vrot.slane %v2187_v0, %v7214_v19 }
0x1544   :  { %v2202_v59 = vrot.slane %v2194_v58, %v7214_v19  ;;  %v2205_v2 = vadd.f32 %v2198_v1, %v7219_v29  ;;  %v2206_v20 = vadd.f32 %v2198_v1, %v7217_v28 }
0x1546   :  { %v2207_v22 = vadd.f32 %v2202_v59, %v7225_v33  ;;  %v2208_v30 = vadd.f32 %v2202_v59, %v7223_v32  ;;  %6255 = vtanh.f32 %v2205_v2 }
0x1547   :  { %6257 = vtanh.f32 %v2206_v20 }
0x1548   :  { %6259 = vtanh.f32 %v2207_v22 }
0x1549   :  { %6261 = vtanh.f32 %v2208_v30 }
0x1553   :  { %v6256_v21 = vpop.eup %6255 }
0x1554   :  { %v6258_v31 = vpop.eup %6257  ;;  %v2213_v41 = vmul.f32 %v6256_v21, %v7233_v47 }
0x1555   :  { %v6260_v42 = vpop.eup %6259  ;;  %v2214_v3 = vmul.f32 %v6258_v31, %v7233_v47 }
0x1556   :  { %v2217_v7 = vsel %vm546_vm1, %v2213_v41, 0.0  ;;  %v2215_v46 = vmul.f32 %v7581_v16, %v6260_v42  ;;  %v6262_v9 = vpop.eup %6261 }
0x1557   :  { %v2220_v48 = vsel %vm546_vm1, %v2214_v3, 0.0  ;;  %2218 = vadd.xlane.f32.xlu0 %v2217_v7  ;;  %v2216_v61 = vmul.f32 %v7581_v16, %v6262_v9 }
0x1558   :  { %2221 = vadd.xlane.f32.xlu1 %v2220_v48  ;;  %v2223_v25 = vsel %vm546_vm1, %v2215_v46, 0.0 }
0x1559   :  { %v2226_v6 = vsel %vm546_vm1, %v2216_v61, 0.0 }
0x155b   :  { %2224 = vadd.xlane.f32.xlu0 %v2223_v25 }
0x155f   :  { %2227 = vadd.xlane.f32.xlu0 %v2226_v6 }
0x15e0   :  { %v2219_v47 = vpop.xlane.xlu0 %2218 }
0x15e1   :  { %v2222_v55 = vpop.xlane.xlu1 %2221  ;;  %v2229_v58 = vadd.f32 %v2219_v47, %v7250_v17 }
0x15e2   :  { %v2230_v0 = vadd.f32 %v2222_v55, %v7250_v17 }
0x15e3   :  { %v2240_v20 = vrot.slane %v2229_v58, %v7245_v4 }
0x15e4   :  { %v2225_v56 = vpop.xlane.xlu0 %2224  ;;  %v2244_v2 = vrot.slane %v2230_v0, %v7248_v10 }
0x15e5   :  { %v2231_v1 = vadd.f32 %v2225_v56, %v7250_v17 }
0x15e6   :  { %v2245_v31 = vsel %vm900_vm4, %v2244_v2, %v2240_v20 }
0x15e7   :  { %v2249_v30 = vrot.slane %v2231_v1, %v7245_v4 }
0x15e8   :  { %v2228_v59 = vpop.xlane.xlu0 %2227 }
0x15e9   :  { %v2232_v22 = vadd.f32 %v2228_v59, %v7250_v17 }
0x15eb   :  { %v2253_v21 = vrot.slane %v2232_v22, %v7248_v10 }
0x15ed   :  { %v2254_v41 = vsel %vm900_vm4, %v2253_v21, %v2249_v30 }
0x15ee   :  { %v2255_v42 = vsel %vm911_vm3, %v2254_v41, %v2245_v31 }
0x15ef   :  { %v2257_v3 = vsel %vm884_vm5, %v2255_v42, -1e+30 }
0x15f0   :  { %v2258_v7 = vsel %vm915_vm6, %v2257_v3, -inf }
0x15f1   :  { %2259 = vmax.xlane.f32.xlu1 %v2258_v7 }
0x167a   :  { %v2260_v46 = vpop.xlane.xlu1 %2259 }
0x167b   :  { %v2261_v9 = vsub.f32 %v2257_v3, %v2260_v46 }
0x167d   :  { %v2262_v48 = vmul.f32 1.442695, %v2261_v9 }
0x167f   :  { %6263 = vpow2.f32 %v2262_v48 }
0x168c   :  { %v6264_v25 = vpop.eup %6263 }
0x168d   :  { %v2264_v61 = vsel %vm915_vm6, %v6264_v25, 0.0 }
0x168e   :  { %2265 = vadd.xlane.f32.xlu0 %v2264_v61 }
0x1717   :  { %v2266_v6 = vpop.xlane.xlu0 %2265 }
0x1718   :  { %6265 = vrcp.f32 %v2266_v6 }
0x1725   :  { %v6266_v47 = vpop.eup %6265 }
0x1726   :  { %v2268_v55 = vmul.f32 %v6266_v47, %v6264_v25 }
0x1728   :  { %v2272_v56 = vrot.slane %v2268_v55, %v7214_v19  ;;  %v2283_v0 = vrot.slane %v2268_v55, %v7273_v60 }
0x172a   :  { %2278 = vbcast.lane.b32.xlu0 %v2272_v56, 264  ;;  %2274 = vbcast.lane.b32.xlu1 %v2272_v56, 256 }
0x172e   :  { %2285 = vbcast.lane.b32.xlu1 %v2283_v0, 256 }
0x1732   :  { %2289 = vbcast.lane.b32.xlu1 %v2283_v0, 264 }
0x179c   :  { %v2279_v58 = vpop.permute.xlu0 %2278  ;;  %v2275_v1 = vpop.permute.xlu1 %2274 }
0x179d   :  { %v2292_v59 = vmul.f32 %v7488_v37, %v2279_v58  ;;  %v2291_v2 = vmul.f32 %v7491_v39, %v2275_v1 }
0x179f   :  { %v2296_v20 = vsel %vm355_vm2, %v2292_v59, 0.0  ;;  %v2295_v22 = vsel %vm355_vm2, %v2291_v2, 0.0 }
0x17a0   :  { %v2297_v30 = vadd.f32 %v2296_v20, %v2295_v22  ;;  %v2286_v21 = vpop.permute.xlu1 %2285 }
0x17a1   :  { %v2293_v41 = vmul.f32 %v7496_v57, %v2286_v21 }
0x17a2   :  { %v2298_v31 = vrot.slane %v2297_v30, 4 }
0x17a3   :  { %v2304_v46 = vsel %vm355_vm2, %v2293_v41, 0.0 }
0x17a4   :  { %v2299_v42 = vadd.f32 %v2298_v31, %v2297_v30  ;;  %v2290_v3 = vpop.permute.xlu1 %2289 }
0x17a5   :  { %v2294_v7 = vmul.f32 %v7499_v26, %v2290_v3 }
0x17a6   :  { %v2300_v48 = vrot.slane %v2299_v42, 2 }
0x17a7   :  { %v2305_v9 = vsel %vm355_vm2, %v2294_v7, 0.0 }
0x17a8   :  { %v2306_v25 = vadd.f32 %v2305_v9, %v2304_v46  ;;  %v2301_v6 = vadd.f32 %v2300_v48, %v2299_v42  ;;  %v1978_v48 = vmul.f32 0.9, %v7541_v44 }
0x17aa   :  { %v2307_v61 = vrot.slane %v2306_v25, 4  ;;  %v2302_v56 = vrot.slane %v2301_v6, 1 }
0x17ac   :  { %v2308_v47 = vadd.f32 %v2307_v61, %v2306_v25  ;;  %v2303_v1 = vadd.f32 %v2302_v56, %v2301_v6 }
0x17ae   :  { %v2309_v55 = vrot.slane %v2308_v47, 2 }
0x17b0   :  { %v2310_v0 = vadd.f32 %v2309_v55, %v2308_v47 }
0x17b2   :  { %v2311_v58 = vrot.slane %v2310_v0, 1 }
0x17b4   :  { %v2312_v59 = vadd.f32 %v2311_v58, %v2310_v0  ;;  %v2417_v58 = vmul.f32 0.1, %v7546_v54  ;;  %v7655_v54 = vld [vmem:[#allocation12 + $0x10] sm:$0xff] }
0x17b6   :  { %v7614_v2 = vsel %vm911_vm3, %v2312_v59, %v2303_v1  ;;  %v7649_v1 = vld [vmem:[#allocation12 + $0x18] sm:$0xff]  ;;  %v7659_v59 = vld [vmem:[#allocation12 + $0x8] sm:$0xff] }
0x17b7   :  { %8587 = vst [vmem:[#allocation57_spill] sm:$0xff] %v7614_v2  ;;  %5805 = vmatmul.mubr.msk.f32.vlgmr.msra.gmra.mxu1 %vm355_vm2, %v7614_v2 }
0x17b8   :  { %2569 = vmatpush1.msra.mxu1 %v7509_v50  ;;  %2608 = vmatprep.mubr.f32.mxu1 %v8555_v24 }
0x17b9   :  { %2570 = vmatprep.subr.mxu1 %v7513_v35 }
0x17ba   :  { %2571 = vmatpush1.msra.mxu1 %v7516_v36 }
0x17bb   :  { %2572 = vmatprep.subr.mxu1 %v7519_v38 }
0x17bc   :  { %2573 = vmatpush1.msra.mxu1 %v7522_v52 }
0x17bd   :  { %2574 = vmatprep.subr.mxu1 %v7525_v40 }
0x17be   :  { %2575 = vmatpush1.msra.mxu1 %v7528_v45 }
0x17bf   :  { %5826 = vmatprep.subr.mxu1 %v8555_v24 }
0x1877   :  { %v2384_v20 = vpop.f32.mrf.mxu1 }
0x1878   :  { %v2385_v22 = vadd.f32 %v2384_v20, %v7566_v63  ;;  %v1977_v63 = vmul.f32 0.1, %v7538_v43  ;;  %v7663_v20 = vld [vmem:[#allocation12] sm:$0xff] }
0x1879   :  { %v5806_v30 = vpop.f32.mrf.mxu1 }
0x187a   :  { %v2392_v21 = vadd.f32 %v7195_v8, %v2385_v22  ;;  %v7633_v25 = vadd.f32 %v1978_v48, %v1977_v63 }
0x187c   :  { %6267 = vtanh.f32 %v2392_v21  ;;  %v5423_v41 = vmul.f32 -1.442695, %v2392_v21 }
0x187e   :  { %6269 = vpow2.f32 %v5423_v41 }
0x1889   :  { %v6268_v31 = vpop.eup %6267 }
0x188a   :  { %2402 = vrot.lane.b32.xlu0 %v6268_v31, %s6912_s22 }
0x188b   :  { %v6270_v42 = vpop.eup %6269 }
0x188c   :  { %v2396_v3 = vadd.f32 1.0, %v6270_v42 }
0x188e   :  { %6271 = vrcp.f32 %v2396_v3 }
0x189b   :  { %v6272_v7 = vpop.eup %6271 }
0x189c   :  { %v2400_v8 = vmul.f32 %v6272_v7, %v7633_v25 }
0x18fc   :  { %v2403_v46 = vpop.permute.xlu0 %2402 }
0x18fd   :  { %v2405_v9 = vmul.f32 %v6272_v7, %v2403_v46 }
0x18ff   :  { %2407 = vrot.lane.b32.xlu1 %v2405_v9, %s6913_s23 }
0x1971   :  { %v2408_v61 = vpop.permute.xlu1 %2407 }
0x1972   :  { %v7636_v6 = vadd.f32 %v2408_v61, %v2400_v8 }
0x1974   :  { %6273 = vtanh.f32 %v7636_v6 }
0x1981   :  { %v6274_v47 = vpop.eup %6273 }
0x1982   :  { %2413 = vrot.lane.b32.xlu0 %v6274_v47, %s6912_s22 }
0x19f4   :  { %v2414_v55 = vpop.permute.xlu0 %2413 }
0x19f5   :  { %v2416_v56 = vmul.f32 %v6272_v7, %v2414_v55 }
0x19f7   :  { %v2418_v0 = vmul.f32 0.9, %v2416_v56 }
0x19f9   :  { %v7641_v44 = vadd.f32 %v2418_v0, %v2417_v58 }
0x19fb   :  { %2424 = vrot.lane.b32.xlu1 %v7641_v44, %s6913_s23 }
0x1a6d   :  { %v7645_v43 = vpop.permute.xlu1 %2424 }
0x1a6e   :  { %5426 = vmatmul.mubr.msk.f32.vlgmr.msra.gmra.mxu1 %vm355_vm2, %v7645_v43 }
0x1a6f   :  { %5827 = vmatpush3.msra.mxu1 %v7649_v1  ;;  %5834 = vmatprep.mubr.msk.f32.mxu1 %vm6911_vm7, %v8555_v24 }
0x1a70   :  { %5828 = vmatprep.subr.mxu1 %v8555_v24 }
0x1a71   :  { %5829 = vmatpush3.msra.mxu1 %v7655_v54 }
0x1a72   :  { %5830 = vmatprep.subr.mxu1 %v8555_v24 }
0x1a73   :  { %5831 = vmatpush3.msra.mxu1 %v7659_v59 }
0x1a74   :  { %5832 = vmatprep.subr.mxu1 %v8555_v24 }
0x1a75   :  { %5833 = vmatpush3.msra.mxu1 %v7663_v20 }
0x1a76   :  { %3011 = vmatprep.subr.mxu1 %v7563_v62 }
0x1b2e   :  { %v7667_v22 = vpop.f32.mrf.mxu1 }
0x1b30   :  { %v2612_v30 = vpop.f32.mrf.mxu1 }
0x1b31   :  { %v2622_v21 = vrot.slane %v2612_v30, %v7186_v5 }
0x1b33   :  { %v2623_v31 = vcombine.high %v2622_v21, %v2622_v21  ;;  %v2630_v41 = vrot.slane %v2622_v21, %v7186_v5 }
0x1b35   :  { %v2637_v42 = vrot.slane %v2623_v31, %v7186_v5  ;;  %v2641_v3 = vrot.slane %v2630_v41, %v7214_v19 }
0x1b37   :  { %v2645_v7 = vrot.slane %v2637_v42, %v7214_v19  ;;  %v2648_v46 = vadd.f32 %v2641_v3, %v7219_v29  ;;  %v2649_v9 = vadd.f32 %v2641_v3, %v7217_v28 }
0x1b39   :  { %v2650_v48 = vadd.f32 %v2645_v7, %v7225_v33  ;;  %v2651_v63 = vadd.f32 %v2645_v7, %v7223_v32  ;;  %6275 = vtanh.f32 %v2648_v46 }
0x1b3a   :  { %6277 = vtanh.f32 %v2649_v9 }
0x1b3b   :  { %6279 = vtanh.f32 %v2650_v48 }
0x1b3c   :  { %6281 = vtanh.f32 %v2651_v63 }
0x1b46   :  { %v6276_v8 = vpop.eup %6275 }
0x1b47   :  { %v6278_v61 = vpop.eup %6277  ;;  %v2656_v47 = vmul.f32 %v7581_v16, %v6276_v8 }
0x1b48   :  { %v6280_v55 = vpop.eup %6279  ;;  %v2657_v56 = vmul.f32 %v7581_v16, %v6278_v61 }
0x1b49   :  { %v2660_v0 = vsel %vm546_vm1, %v2656_v47, 0.0  ;;  %v2658_v58 = vmul.f32 %v7581_v16, %v6280_v55  ;;  %v6282_v30 = vpop.eup %6281 }
0x1b4a   :  { %v2663_v21 = vsel %vm546_vm1, %v2657_v56, 0.0  ;;  %2661 = vadd.xlane.f32.xlu0 %v2660_v0  ;;  %v2659_v41 = vmul.f32 %v7581_v16, %v6282_v30 }
0x1b4b   :  { %2664 = vadd.xlane.f32.xlu1 %v2663_v21  ;;  %v2666_v31 = vsel %vm546_vm1, %v2658_v58, 0.0 }
0x1b4c   :  { %v2669_v42 = vsel %vm546_vm1, %v2659_v41, 0.0 }
0x1b4e   :  { %2667 = vadd.xlane.f32.xlu0 %v2666_v31 }
0x1b52   :  { %2670 = vadd.xlane.f32.xlu0 %v2669_v42 }
0x1bd3   :  { %v2662_v3 = vpop.xlane.xlu0 %2661 }
0x1bd4   :  { %v2665_v7 = vpop.xlane.xlu1 %2664  ;;  %v2672_v48 = vadd.f32 %v2662_v3, %v7250_v17 }
0x1bd5   :  { %v2673_v9 = vadd.f32 %v2665_v7, %v7250_v17 }
0x1bd6   :  { %v2683_v47 = vrot.slane %v2672_v48, %v7245_v4 }
0x1bd7   :  { %v2668_v46 = vpop.xlane.xlu0 %2667  ;;  %v2687_v61 = vrot.slane %v2673_v9, %v7248_v10 }
0x1bd8   :  { %v2674_v63 = vadd.f32 %v2668_v46, %v7250_v17 }
0x1bd9   :  { %v2688_v58 = vsel %vm900_vm4, %v2687_v61, %v2683_v47 }
0x1bda   :  { %v2692_v56 = vrot.slane %v2674_v63, %v7245_v4 }
0x1bdb   :  { %v2671_v8 = vpop.xlane.xlu0 %2670 }
0x1bdc   :  { %v2675_v55 = vadd.f32 %v2671_v8, %v7250_v17 }
0x1bde   :  { %v2696_v0 = vrot.slane %v2675_v55, %v7248_v10 }
0x1be0   :  { %v2697_v30 = vsel %vm900_vm4, %v2696_v0, %v2692_v56 }
0x1be1   :  { %v2698_v21 = vsel %vm911_vm3, %v2697_v30, %v2688_v58 }
0x1be2   :  { %v2700_v31 = vsel %vm884_vm5, %v2698_v21, -1e+30 }
0x1be3   :  { %v2701_v41 = vsel %vm915_vm6, %v2700_v31, -inf }
0x1be4   :  { %2702 = vmax.xlane.f32.xlu1 %v2701_v41 }
0x1c6d   :  { %v2703_v42 = vpop.xlane.xlu1 %2702 }
0x1c6e   :  { %v2704_v3 = vsub.f32 %v2700_v31, %v2703_v42 }
0x1c70   :  { %v2705_v7 = vmul.f32 1.442695, %v2704_v3 }
0x1c72   :  { %6283 = vpow2.f32 %v2705_v7 }
0x1c7f   :  { %v6284_v46 = vpop.eup %6283 }
0x1c80   :  { %v2707_v9 = vsel %vm915_vm6, %v6284_v46, 0.0 }
0x1c81   :  { %2708 = vadd.xlane.f32.xlu0 %v2707_v9 }
0x1d0a   :  { %v2709_v48 = vpop.xlane.xlu0 %2708 }
0x1d0b   :  { %6285 = vrcp.f32 %v2709_v48 }
0x1d18   :  { %v6286_v63 = vpop.eup %6285 }
0x1d19   :  { %v2711_v8 = vmul.f32 %v6286_v63, %v6284_v46 }
0x1d1b   :  { %v2715_v61 = vrot.slane %v2711_v8, %v7214_v19  ;;  %v2726_v47 = vrot.slane %v2711_v8, %v7273_v60 }
0x1d1d   :  { %2721 = vbcast.lane.b32.xlu0 %v2715_v61, 264  ;;  %2717 = vbcast.lane.b32.xlu1 %v2715_v61, 256 }
0x1d21   :  { %2728 = vbcast.lane.b32.xlu1 %v2726_v47, 256 }
0x1d25   :  { %2732 = vbcast.lane.b32.xlu1 %v2726_v47, 264 }
0x1d8f   :  { %v2722_v55 = vpop.permute.xlu0 %2721  ;;  %v2718_v56 = vpop.permute.xlu1 %2717 }
0x1d90   :  { %v2735_v0 = vmul.f32 %v7488_v37, %v2722_v55  ;;  %v2734_v58 = vmul.f32 %v7491_v39, %v2718_v56 }
0x1d92   :  { %v2739_v30 = vsel %vm355_vm2, %v2735_v0, 0.0  ;;  %v2738_v21 = vsel %vm355_vm2, %v2734_v58, 0.0 }
0x1d93   :  { %v2740_v31 = vadd.f32 %v2739_v30, %v2738_v21  ;;  %v2729_v41 = vpop.permute.xlu1 %2728 }
0x1d94   :  { %v2736_v3 = vmul.f32 %v7496_v57, %v2729_v41  ;;  %v8589_v41 = vmov 0.0  }
0x1d95   :  { %v2741_v42 = vrot.slane %v2740_v31, 4 }
0x1d96   :  { %v2747_v48 = vsel %vm355_vm2, %v2736_v3, 0.0 }
0x1d97   :  { %v2742_v7 = vadd.f32 %v2741_v42, %v2740_v31  ;;  %v2733_v46 = vpop.permute.xlu1 %2732 }
0x1d98   :  { %v2737_v9 = vmul.f32 %v7499_v26, %v2733_v46 }
0x1d99   :  { %v2743_v8 = vrot.slane %v2742_v7, 2 }
0x1d9a   :  { %v2748_v63 = vsel %vm355_vm2, %v2737_v9, 0.0 }
0x1d9b   :  { %v2749_v61 = vadd.f32 %v2748_v63, %v2747_v48  ;;  %v2744_v55 = vadd.f32 %v2743_v8, %v2742_v7 }
0x1d9d   :  { %v2750_v47 = vrot.slane %v2749_v61, 4  ;;  %v2745_v58 = vrot.slane %v2744_v55, 1 }
0x1d9f   :  { %v2751_v56 = vadd.f32 %v2750_v47, %v2749_v61  ;;  %v2746_v24 = vadd.f32 %v2745_v58, %v2744_v55  ;;  %v2421_v47 = vmul.f32 0.9, %v7636_v6 }
0x1da1   :  { %v2752_v0 = vrot.slane %v2751_v56, 2 }
0x1da3   :  { %v2753_v30 = vadd.f32 %v2752_v0, %v2751_v56  ;;  %v7734_v56 = vld [vmem:[#allocation20] ss:$0 sm:$0xff] }
0x1da5   :  { %v2754_v21 = vrot.slane %v2753_v30, 1 }
0x1da7   :  { %v2755_v51 = vadd.f32 %v2754_v21, %v2753_v30  ;;  %v1175_v30 = vadd.f32 %v7734_v56, %v7363_v27 }
0x1da9   :  { %v7712_v31 = vsel %vm911_vm3, %v2755_v51, %v2746_v24 }
0x1daa   :  { %8588 = vst [vmem:[#allocation58_spill] sm:$0xff] %v7712_v31  ;;  %5835 = vmatmul.mubr.msk.f32.vlgmr.msra.gmra.mxu1 %vm355_vm2, %v7712_v31 }
0x1dab   :  { %3012 = vmatpush1.msra.mxu1 %v7509_v50  ;;  %3051 = vmatprep.mubr.f32.mxu1 %v8589_v41 }
0x1dac   :  { %3013 = vmatprep.subr.mxu1 %v7513_v35 }
0x1dad   :  { %3014 = vmatpush1.msra.mxu1 %v7516_v36 }
0x1dae   :  { %3015 = vmatprep.subr.mxu1 %v7519_v38 }
0x1daf   :  { %3016 = vmatpush1.msra.mxu1 %v7522_v52 }
0x1db0   :  { %3017 = vmatprep.subr.mxu1 %v7525_v40 }
0x1db1   :  { %3018 = vmatpush1.msra.mxu1 %v7528_v45 }
0x1db2   :  { %5856 = vmatprep.subr.mxu1 %v8589_v41 }
0x1e6a   :  { %v2827_v24 = vpop.f32.mrf.mxu1 }
0x1e6b   :  { %v2828_v51 = vadd.f32 %v2827_v24, %v7667_v22  ;;  %v2420_v22 = vmul.f32 0.1, %v7633_v25  ;;  %v5410_v25 = vmul.f32 -1.442695, %v1175_v30 }
0x1e6c   :  { %v5836_v42 = vpop.f32.mrf.mxu1 }
0x1e6d   :  { %v2835_v3 = vadd.f32 %v7200_v11, %v2828_v51  ;;  %v7731_v55 = vadd.f32 %v2421_v47, %v2420_v22 }
0x1e6f   :  { %6287 = vtanh.f32 %v2835_v3  ;;  %v5428_v46 = vmul.f32 -1.442695, %v2835_v3 }
0x1e71   :  { %6289 = vpow2.f32 %v5428_v46  ;;  %v2860_v46 = vmul.f32 0.1, %v7641_v44 }
0x1e7c   :  { %v6288_v7 = vpop.eup %6287 }
0x1e7d   :  { %2845 = vrot.lane.b32.xlu0 %v6288_v7, %s6912_s22 }
0x1e7e   :  { %v6290_v9 = vpop.eup %6289 }
0x1e7f   :  { %v2839_v48 = vadd.f32 1.0, %v6290_v9 }
0x1e81   :  { %6291 = vrcp.f32 %v2839_v48 }
0x1e8e   :  { %v6292_v63 = vpop.eup %6291 }
0x1e8f   :  { %v2843_v11 = vmul.f32 %v6292_v63, %v7731_v55 }
0x1eef   :  { %v2846_v8 = vpop.permute.xlu0 %2845 }
0x1ef0   :  { %v2848_v61 = vmul.f32 %v6292_v63, %v2846_v8 }
0x1ef2   :  { %2850 = vrot.lane.b32.xlu1 %v2848_v61, %s6913_s23 }
0x1f64   :  { %v2851_v0 = vpop.permute.xlu1 %2850 }
0x1f65   :  { %v7736_v58 = vadd.f32 %v2851_v0, %v2843_v11 }
0x1f67   :  { %6293 = vtanh.f32 %v7736_v58 }
0x1f68   :  { %6295 = vtanh.f32 %v1175_v30 }
0x1f69   :  { %6297 = vpow2.f32 %v5410_v25 }
0x1f74   :  { %v6294_v21 = vpop.eup %6293 }
0x1f75   :  { %2856 = vrot.lane.b32.xlu0 %v6294_v21, %s6912_s22  ;;  %v6296_v6 = vpop.eup %6295 }
0x1f76   :  { %v6298_v24 = vpop.eup %6297 }
0x1f77   :  { %v1181_v51 = vadd.f32 1.0, %v6298_v24 }
0x1f79   :  { %1187 = vrot.lane.b32.xlu0 %v6296_v6, %s6912_s22  ;;  %6299 = vrcp.f32 %v1181_v51 }
0x1f86   :  { %v6300_v48 = vpop.eup %6299 }
0x1f87   :  { %v1185_v44 = vmul.f32 0.0, %v6300_v48 }
0x1fe7   :  { %v2857_v42 = vpop.permute.xlu0 %2856 }
0x1fe8   :  { %v2859_v3 = vmul.f32 %v6292_v63, %v2857_v42 }
0x1fea   :  { %v2861_v7 = vmul.f32 0.9, %v2859_v3 }
0x1feb   :  { %v1188_v9 = vpop.permute.xlu0 %1187 }
0x1fec   :  { %v7744_v27 = vadd.f32 %v2861_v7, %v2860_v46  ;;  %v1190_v8 = vmul.f32 %v6300_v48, %v1188_v9 }
0x1fee   :  { %2867 = vrot.lane.b32.xlu1 %v7744_v27, %s6913_s23 }
0x1ff2   :  { %1192 = vrot.lane.b32.xlu1 %v1190_v8, %s6913_s23 }
0x2060   :  { %v7749_v61 = vpop.permute.xlu1 %2867 }
0x2061   :  { %5431 = vmatmul.mubr.msk.f32.vlgmr.msra.gmra.mxu1 %vm355_vm2, %v7749_v61 }
0x2062   :  { %5857 = vmatpush3.msra.mxu1 %v7649_v1  ;;  %5864 = vmatprep.mubr.msk.f32.mxu1 %vm6911_vm7, %v8589_v41 }
0x2063   :  { %5858 = vmatprep.subr.mxu1 %v8589_v41 }
0x2064   :  { %v1193_v63 = vpop.permute.xlu1 %1192  ;;  %5859 = vmatpush3.msra.mxu1 %v7655_v54 }
0x2065   :  { %v7758_v47 = vadd.f32 %v1193_v63, %v1185_v44  ;;  %5860 = vmatprep.subr.mxu1 %v8589_v41 }
0x2066   :  { %5861 = vmatpush3.msra.mxu1 %v7659_v59 }
0x2067   :  { %6301 = vtanh.f32 %v7758_v47  ;;  %5862 = vmatprep.subr.mxu1 %v8589_v41 }
0x2068   :  { %5863 = vmatpush3.msra.mxu1 %v7663_v20 }
0x2069   :  { %3454 = vmatprep.subr.mxu1 %v7563_v62 }
0x2074   :  { %v6302_v22 = vpop.eup %6301 }
0x2075   :  { %1198 = vrot.lane.b32.xlu0 %v6302_v22, %s6912_s22 }
0x20e7   :  { %v1199_v11 = vpop.permute.xlu0 %1198 }
0x20e8   :  { %v1201_v0 = vmul.f32 %v6300_v48, %v1199_v11 }
0x20ea   :  { %v7767_v30 = vmul.f32 0.9, %v1201_v0 }
0x20ec   :  { %1541 = vrot.lane.b32.xlu1 %v7767_v30, %s6912_s22 }
0x2121   :  { %v7771_v21 = vpop.f32.mrf.mxu1 }
0x2123   :  { %v3055_v6 = vpop.f32.mrf.mxu1 }
0x2124   :  { %v3065_v25 = vrot.slane %v3055_v6, %v7186_v5 }
0x2126   :  { %v3066_v24 = vcombine.high %v3065_v25, %v3065_v25  ;;  %v3073_v51 = vrot.slane %v3065_v25, %v7186_v5 }
0x2128   :  { %v3080_v62 = vrot.slane %v3066_v24, %v7186_v5  ;;  %v3084_v42 = vrot.slane %v3073_v51, %v7214_v19 }
0x212a   :  { %v3088_v3 = vrot.slane %v3080_v62, %v7214_v19  ;;  %v3091_v7 = vadd.f32 %v3084_v42, %v7219_v29  ;;  %v3092_v46 = vadd.f32 %v3084_v42, %v7217_v28 }
0x212c   :  { %v3093_v9 = vadd.f32 %v3088_v3, %v7225_v33  ;;  %v3094_v48 = vadd.f32 %v3088_v3, %v7223_v32  ;;  %6303 = vtanh.f32 %v3091_v7 }
0x212d   :  { %6305 = vtanh.f32 %v3092_v46  ;;  %v7793_v46 = vld [vmem:[#allocation18 + $0x38] sm:$0xff] }
0x212e   :  { %6307 = vtanh.f32 %v3093_v9  ;;  %v7803_v9 = vld [vmem:[#allocation18 + $0x28] sm:$0xff] }
0x212f   :  { %6309 = vtanh.f32 %v3094_v48  ;;  %v7811_v48 = vld [vmem:[#allocation18 + $0x18] sm:$0xff] }
0x2139   :  { %v6304_v8 = vpop.eup %6303 }
0x213a   :  { %v6306_v44 = vpop.eup %6305  ;;  %v3099_v63 = vmul.f32 %v7581_v16, %v6304_v8  ;;  %v7815_v8 = vld [vmem:[#allocation18 + $0x10] sm:$0xff] }
0x213b   :  { %v6308_v22 = vpop.eup %6307  ;;  %v3100_v11 = vmul.f32 %v7581_v16, %v6306_v44  ;;  %v7819_v44 = vld [vmem:[#allocation18 + $0x8] sm:$0xff] }
0x213c   :  { %v3103_v0 = vsel %vm546_vm1, %v3099_v63, 0.0  ;;  %v3101_v6 = vmul.f32 %v7581_v16, %v6308_v22  ;;  %v6310_v25 = vpop.eup %6309  ;;  %v7823_v63 = vld [vmem:[#allocation18] sm:$0xff] }
0x213d   :  { %v3106_v24 = vsel %vm546_vm1, %v3100_v11, 0.0  ;;  %3104 = vadd.xlane.f32.xlu0 %v3103_v0  ;;  %v3102_v62 = vmul.f32 %v7581_v16, %v6310_v25  ;;  %v7799_v16 = vld [vmem:[#allocation18 + $0x30] sm:$0xff] }
0x213e   :  { %3107 = vadd.xlane.f32.xlu1 %v3106_v24  ;;  %v3109_v51 = vsel %vm546_vm1, %v3101_v6, 0.0 }
0x213f   :  { %v3112_v42 = vsel %vm546_vm1, %v3102_v62, 0.0 }
0x2141   :  { %3110 = vadd.xlane.f32.xlu0 %v3109_v51 }
0x2145   :  { %3113 = vadd.xlane.f32.xlu0 %v3112_v42 }
0x215e   :  { %v1542_v3 = vpop.permute.xlu1 %1541 }
0x215f   :  { %v1544_v7 = vsel %vm355_vm2, %v7438_v49, %v1542_v3  ;;  %v7807_v49 = vld [vmem:[#allocation18 + $0x20] sm:$0xff] }
0x2160   :  { %5764 = vmatmul.mubr.msk.f32.vlgmr.msra.gmra.mxu0 %vm1104_vm8, %v1544_v7 }
0x2161   :  { %5778 = vmatpush3.msra.mxu0 %v7793_v46  ;;  %5793 = vmatprep.mubr.msk.f32.mxu0 %vm6911_vm7, %v8589_v41 }
0x2162   :  { %5779 = vmatprep.subr.mxu0 %v8589_v41 }
0x2163   :  { %5780 = vmatpush3.msra.mxu0 %v7799_v16 }
0x2164   :  { %5781 = vmatprep.subr.mxu0 %v8589_v41 }
0x2165   :  { %5782 = vmatpush3.msra.mxu0 %v7803_v9 }
0x2166   :  { %5783 = vmatprep.subr.mxu0 %v8589_v41 }
0x2167   :  { %5784 = vmatpush3.msra.mxu0 %v7807_v49 }
0x2168   :  { %5785 = vmatprep.subr.mxu0 %v8589_v41 }
0x2169   :  { %5786 = vmatpush3.msra.mxu0 %v7811_v48 }
0x216a   :  { %5787 = vmatprep.subr.mxu0 %v8589_v41 }
0x216b   :  { %5788 = vmatpush3.msra.mxu0 %v7815_v8 }
0x216c   :  { %5789 = vmatprep.subr.mxu0 %v8589_v41 }
0x216d   :  { %5790 = vmatpush3.msra.mxu0 %v7819_v44 }
0x216e   :  { %5791 = vmatprep.subr.mxu0 %v8589_v41 }
0x216f   :  { %5792 = vmatpush3.msra.mxu0 %v7823_v63 }
0x2170   :  { %5807 = vmatprep.subr.mxu0 %v8589_v41 }
0x21c6   :  { %v3105_v22 = vpop.xlane.xlu0 %3104 }
0x21c7   :  { %v3108_v11 = vpop.xlane.xlu1 %3107  ;;  %v3115_v25 = vadd.f32 %v3105_v22, %v7250_v17 }
0x21c8   :  { %v3116_v6 = vadd.f32 %v3108_v11, %v7250_v17 }
0x21c9   :  { %v3126_v42 = vrot.slane %v3115_v25, %v7245_v4 }
0x21ca   :  { %v3111_v0 = vpop.xlane.xlu0 %3110  ;;  %v3130_v62 = vrot.slane %v3116_v6, %v7248_v10 }
0x21cb   :  { %v3117_v24 = vadd.f32 %v3111_v0, %v7250_v17 }
0x21cc   :  { %v3131_v2 = vsel %vm900_vm4, %v3130_v62, %v3126_v42 }
0x21cd   :  { %v3135_v7 = vrot.slane %v3117_v24, %v7245_v4 }
0x21ce   :  { %v3114_v51 = vpop.xlane.xlu0 %3113 }
0x21cf   :  { %v3118_v3 = vadd.f32 %v3114_v51, %v7250_v17 }
0x21d1   :  { %v3139_v31 = vrot.slane %v3118_v3, %v7248_v10 }
0x21d3   :  { %v3140_v15 = vsel %vm900_vm4, %v3139_v31, %v3135_v7 }
0x21d4   :  { %v3141_v11 = vsel %vm911_vm3, %v3140_v15, %v3131_v2 }
0x21d5   :  { %v3143_v22 = vsel %vm884_vm5, %v3141_v11, -1e+30 }
0x21d6   :  { %v3144_v0 = vsel %vm915_vm6, %v3143_v22, -inf }
0x21d7   :  { %3145 = vmax.xlane.f32.xlu1 %v3144_v0 }
0x2220   :  { %v1614_v6 = vpop.f32.mrf.mxu0 }
0x2221   :  { %v1615_v25 = vadd.f32 %v7734_v56, %v1614_v6 }
0x2222   :  { %v5765_v51 = vpop.f32.mrf.mxu0 }
0x2223   :  { %6311 = vtanh.f32 %v1615_v25  ;;  %v5415_v2 = vmul.f32 -1.442695, %v1615_v25 }
0x2230   :  { %v6312_v24 = vpop.eup %6311 }
0x2231   :  { %1627 = vrot.lane.b32.xlu1 %v6312_v24, %s6912_s22 }
0x2260   :  { %v3146_v3 = vpop.xlane.xlu1 %3145 }
0x2261   :  { %v3147_v62 = vsub.f32 %v3143_v22, %v3146_v3 }
0x2263   :  { %v3148_v42 = vmul.f32 1.442695, %v3147_v62 }
0x2265   :  { %6313 = vpow2.f32 %v3148_v42 }
0x2266   :  { %6315 = vpow2.f32 %v5415_v2 }
0x2272   :  { %v6314_v31 = vpop.eup %6313 }
0x2273   :  { %v3150_v15 = vsel %vm915_vm6, %v6314_v31, 0.0  ;;  %v6316_v11 = vpop.eup %6315 }
0x2274   :  { %3151 = vadd.xlane.f32.xlu0 %v3150_v15  ;;  %v1621_v0 = vadd.f32 1.0, %v6316_v11 }
0x22a3   :  { %v1628_v24 = vpop.permute.xlu1 %1627 }
0x22fd   :  { %v3152_v7 = vpop.xlane.xlu0 %3151 }
0x22fe   :  { %6317 = vrcp.f32 %v3152_v7 }
0x22ff   :  { %6319 = vrcp.f32 %v1621_v0 }
0x230b   :  { %v6318_v6 = vpop.eup %6317 }
0x230c   :  { %v3154_v51 = vmul.f32 %v6318_v6, %v6314_v31  ;;  %v6320_v3 = vpop.eup %6319  ;;  %v7852_v6 = vmul.f32 0.9, %v7758_v47 }
0x230d   :  { %v1630_v62 = vmul.f32 %v6320_v3, %v1628_v24 }
0x230e   :  { %v3158_v34 = vrot.slane %v3154_v51, %v7214_v19  ;;  %v3169_v22 = vrot.slane %v3154_v51, %v7273_v60 }
0x2310   :  { %3164 = vbcast.lane.b32.xlu1 %v3158_v34, 264  ;;  %3160 = vbcast.lane.b32.xlu0 %v3158_v34, 256 }
0x2314   :  { %3171 = vbcast.lane.b32.xlu1 %v3169_v22, 256  ;;  %3175 = vbcast.lane.b32.xlu0 %v3169_v22, 264 }
0x2318   :  { %1632 = vrot.lane.b32.xlu1 %v1630_v62, %s6913_s23 }
0x2382   :  { %v3161_v25 = vpop.permute.xlu0 %3160  ;;  %v3165_v42 = vpop.permute.xlu1 %3164 }
0x2383   :  { %v3177_v15 = vmul.f32 %v7491_v39, %v3161_v25  ;;  %v3178_v2 = vmul.f32 %v7488_v37, %v3165_v42  ;;  %v1625_v37 = vmul.f32 %v6320_v3, %v7852_v6 }
0x2385   :  { %v3181_v31 = vsel %vm355_vm2, %v3177_v15, 0.0  ;;  %v3182_v7 = vsel %vm355_vm2, %v3178_v2, 0.0 }
0x2386   :  { %v3183_v34 = vadd.f32 %v3182_v7, %v3181_v31  ;;  %v3176_v11 = vpop.permute.xlu0 %3175  ;;  %v3172_v0 = vpop.permute.xlu1 %3171 }
0x2387   :  { %v3180_v51 = vmul.f32 %v7499_v26, %v3176_v11  ;;  %v3179_v22 = vmul.f32 %v7496_v57, %v3172_v0 }
0x2388   :  { %v3184_v24 = vrot.slane %v3183_v34, 4 }
0x2389   :  { %v3191_v62 = vsel %vm355_vm2, %v3180_v51, 0.0  ;;  %v3190_v39 = vsel %vm355_vm2, %v3179_v22, 0.0 }
0x238a   :  { %v3185_v25 = vadd.f32 %v3184_v24, %v3183_v34  ;;  %v3192_v42 = vadd.f32 %v3191_v62, %v3190_v39  ;;  %v1633_v15 = vpop.permute.xlu1 %1632  ;;  %v1642_v24 = vmul.f32 0.1, %v7767_v30 }
0x238b   :  { %v7859_v2 = vadd.f32 %v1633_v15, %v1625_v37 }
0x238c   :  { %v3186_v31 = vrot.slane %v3185_v25, 2  ;;  %v3193_v7 = vrot.slane %v3192_v42, 4 }
0x238d   :  { %6321 = vtanh.f32 %v7859_v2 }
0x238e   :  { %v3187_v47 = vadd.f32 %v3186_v31, %v3185_v25  ;;  %v3194_v26 = vadd.f32 %v3193_v7, %v3192_v42  ;;  %v2864_v7 = vmul.f32 0.9, %v7736_v58 }
0x2390   :  { %v3195_v11 = vrot.slane %v3194_v26, 2  ;;  %v3188_v57 = vrot.slane %v3187_v47, 1 }
0x2392   :  { %v3196_v0 = vadd.f32 %v3195_v11, %v3194_v26  ;;  %v3189_v51 = vadd.f32 %v3188_v57, %v3187_v47  ;;  %v2863_v47 = vmul.f32 0.1, %v7731_v55 }
0x2394   :  { %v3197_v23 = vrot.slane %v3196_v0, 1  ;;  %v7910_v26 = vadd.f32 %v2864_v7, %v2863_v47 }
0x2396   :  { %v3198_v14 = vadd.f32 %v3197_v23, %v3196_v0 }
0x2398   :  { %v7863_v22 = vsel %vm911_vm3, %v3198_v14, %v3189_v51 }
0x2399   :  { %5865 = vmatmul.mubr.msk.f32.vlgmr.msra.gmra.mxu1 %vm355_vm2, %v7863_v22 }
0x239a   :  { %v6322_v34 = vpop.eup %6321  ;;  %3455 = vmatpush1.msra.mxu1 %v7509_v50  ;;  %3494 = vmatprep.mubr.f32.mxu1 %v8589_v41 }
0x239b   :  { %1638 = vrot.lane.b32.xlu0 %v6322_v34, %s6912_s22  ;;  %3456 = vmatprep.subr.mxu1 %v7513_v35 }
0x239c   :  { %3457 = vmatpush1.msra.mxu1 %v7516_v36 }
0x239d   :  { %3458 = vmatprep.subr.mxu1 %v7519_v38 }
0x239e   :  { %3459 = vmatpush1.msra.mxu1 %v7522_v52 }
0x239f   :  { %3460 = vmatprep.subr.mxu1 %v7525_v40 }
0x23a0   :  { %3461 = vmatpush1.msra.mxu1 %v7528_v45 }
0x23a1   :  { %5886 = vmatprep.subr.mxu1 %v8589_v41 }
0x240d   :  { %v1639_v14 = vpop.permute.xlu0 %1638 }
0x240e   :  { %v1641_v23 = vmul.f32 %v6320_v3, %v1639_v14 }
0x2410   :  { %v1643_v50 = vmul.f32 0.9, %v1641_v23 }
0x2412   :  { %v7878_v62 = vadd.f32 %v1643_v50, %v1642_v24 }
0x2414   :  { %1984 = vrot.lane.b32.xlu1 %v7878_v62, %s6912_s22 }
0x2459   :  { %v3270_v35 = vpop.f32.mrf.mxu1 }
0x245a   :  { %v3271_v36 = vadd.f32 %v3270_v35, %v7771_v21 }
0x245b   :  { %v5866_v38 = vpop.f32.mrf.mxu1 }
0x245c   :  { %v3278_v52 = vadd.f32 %v7203_v12, %v3271_v36  ;;  %v3303_v38 = vmul.f32 0.1, %v7744_v27 }
0x245e   :  { %6323 = vtanh.f32 %v3278_v52  ;;  %v5433_v12 = vmul.f32 -1.442695, %v3278_v52 }
0x2460   :  { %6325 = vpow2.f32 %v5433_v12 }
0x246b   :  { %v6324_v40 = vpop.eup %6323 }
0x246c   :  { %3288 = vrot.lane.b32.xlu0 %v6324_v40, %s6912_s22 }
0x2486   :  { %v1985_v45 = vpop.permute.xlu1 %1984 }
0x2487   :  { %v1987_v3 = vsel %vm355_vm2, %v7550_v53, %v1985_v45  ;;  %v6326_v53 = vpop.eup %6325  ;;  %v1646_v45 = vmul.f32 0.9, %v7859_v2 }
0x2488   :  { %5794 = vmatmul.mubr.msk.f32.vlgmr.msra.gmra.mxu0 %vm1104_vm8, %v1987_v3  ;;  %v3282_v21 = vadd.f32 1.0, %v6326_v53  ;;  %v1645_v3 = vmul.f32 0.1, %v7852_v6  ;;  %v6452_v6 = vld [vmem:[#allocation17 + $0x38] sm:$0xff] }
0x2489   :  { %5808 = vmatpush3.msra.mxu0 %v7793_v46  ;;  %5823 = vmatprep.mubr.msk.f32.mxu0 %vm6911_vm7, %v8589_v41 }
0x248a   :  { %5809 = vmatprep.subr.mxu0 %v8589_v41  ;;  %6327 = vrcp.f32 %v3282_v21  ;;  %v7926_v12 = vadd.f32 %v1646_v45, %v1645_v3 }
0x248b   :  { %5810 = vmatpush3.msra.mxu0 %v7799_v16 }
0x248c   :  { %5811 = vmatprep.subr.mxu0 %v8589_v41 }
0x248d   :  { %5812 = vmatpush3.msra.mxu0 %v7803_v9 }
0x248e   :  { %5813 = vmatprep.subr.mxu0 %v8589_v41 }
0x248f   :  { %5814 = vmatpush3.msra.mxu0 %v7807_v49 }
0x2490   :  { %5815 = vmatprep.subr.mxu0 %v8589_v41 }
0x2491   :  { %5816 = vmatpush3.msra.mxu0 %v7811_v48 }
0x2492   :  { %5817 = vmatprep.subr.mxu0 %v8589_v41 }
0x2493   :  { %5818 = vmatpush3.msra.mxu0 %v7815_v8 }
0x2494   :  { %5819 = vmatprep.subr.mxu0 %v8589_v41 }
0x2495   :  { %5820 = vmatpush3.msra.mxu0 %v7819_v44 }
0x2496   :  { %5821 = vmatprep.subr.mxu0 %v8589_v41 }
0x2497   :  { %5822 = vmatpush3.msra.mxu0 %v7823_v63  ;;  %v6328_v39 = vpop.eup %6327 }
0x2498   :  { %5837 = vmatprep.subr.mxu0 %v8589_v41  ;;  %v3286_v11 = vmul.f32 %v6328_v39, %v7910_v26 }
0x24de   :  { %v3289_v37 = vpop.permute.xlu0 %3288 }
0x24df   :  { %v3291_v25 = vmul.f32 %v6328_v39, %v3289_v37 }
0x24e1   :  { %3293 = vrot.lane.b32.xlu1 %v3291_v25, %s6913_s23 }
0x2548   :  { %v2057_v42 = vpop.f32.mrf.mxu0 }
0x2549   :  { %v2058_v15 = vadd.f32 %v7734_v56, %v2057_v42 }
0x254a   :  { %v5795_v31 = vpop.f32.mrf.mxu0 }
0x254b   :  { %6329 = vtanh.f32 %v2058_v15  ;;  %v5420_v14 = vmul.f32 -1.442695, %v2058_v15 }
0x2553   :  { %v3294_v57 = vpop.permute.xlu1 %3293 }
0x2554   :  { %v7913_v0 = vadd.f32 %v3294_v57, %v3286_v11 }
0x2556   :  { %6331 = vtanh.f32 %v7913_v0 }
0x2557   :  { %6333 = vpow2.f32 %v5420_v14 }
0x2558   :  { %v6330_v51 = vpop.eup %6329 }
0x2559   :  { %2070 = vrot.lane.b32.xlu1 %v6330_v51, %s6912_s22 }
0x2563   :  { %v6332_v34 = vpop.eup %6331 }
0x2564   :  { %3299 = vrot.lane.b32.xlu0 %v6332_v34, %s6912_s22  ;;  %v6334_v58 = vpop.eup %6333 }
0x2565   :  { %v2064_v23 = vadd.f32 1.0, %v6334_v58 }
0x2567   :  { %6335 = vrcp.f32 %v2064_v23 }
0x2574   :  { %v6336_v55 = vpop.eup %6335 }
0x2575   :  { %v2068_v53 = vmul.f32 %v6336_v55, %v7926_v12 }
0x25cb   :  { %v2071_v50 = vpop.permute.xlu1 %2070 }
0x25cc   :  { %v2073_v24 = vmul.f32 %v6336_v55, %v2071_v50  ;;  %v7963_v50 = vld [vmem:[%s8582_s5] ss:$0 sm:$0xff] }
0x25ce   :  { %2075 = vrot.lane.b32.xlu1 %v2073_v24, %s6913_s23 }
0x25d6   :  { %v3300_v35 = vpop.permute.xlu0 %3299 }
0x25d7   :  { %v3302_v36 = vmul.f32 %v6328_v39, %v3300_v35 }
0x25d9   :  { %v3304_v52 = vmul.f32 0.9, %v3302_v36 }
0x25db   :  { %v7920_v40 = vadd.f32 %v3304_v52, %v3303_v38 }
0x25dd   :  { %3310 = vrot.lane.b32.xlu0 %v7920_v40, %s6913_s23 }
0x2640   :  { %v2076_v21 = vpop.permute.xlu1 %2075 }
0x2641   :  { %v7929_v37 = vadd.f32 %v2076_v21, %v2068_v53 }
0x2643   :  { %6337 = vtanh.f32 %v7929_v37 }
0x264f   :  { %v7932_v27 = vpop.permute.xlu0 %3310 }
0x2650   :  { %v6338_v39 = vpop.eup %6337  ;;  %5436 = vmatmul.mubr.msk.f32.vlgmr.msra.gmra.mxu1 %vm355_vm2, %v7932_v27 }
0x2651   :  { %2081 = vrot.lane.b32.xlu0 %v6338_v39, %s6912_s22  ;;  %5887 = vmatpush3.msra.mxu1 %v7649_v1  ;;  %v2085_v1 = vmul.f32 0.1, %v7878_v62 }
0x2652   :  { %5888 = vmatprep.subr.mxu1 %v8589_v41  ;;  %5894 = vmatprep.mubr.msk.f32.mxu1 %vm6911_vm7, %v8589_v41 }
0x2653   :  { %5889 = vmatpush3.msra.mxu1 %v7655_v54 }
0x2654   :  { %5890 = vmatprep.subr.mxu1 %v8589_v41 }
0x2655   :  { %5891 = vmatpush3.msra.mxu1 %v7659_v59 }
0x2656   :  { %5892 = vmatprep.subr.mxu1 %v8589_v41 }
0x2657   :  { %5893 = vmatpush3.msra.mxu1 %v7663_v20 }
0x2658   :  { %3897 = vmatprep.subr.mxu1 %v6452_v6 }
0x26c3   :  { %v2082_v2 = vpop.permute.xlu0 %2081 }
0x26c4   :  { %v2084_v25 = vmul.f32 %v6336_v55, %v2082_v2 }
0x26c6   :  { %v2086_v42 = vmul.f32 0.9, %v2084_v25 }
0x26c8   :  { %v7947_v15 = vadd.f32 %v2086_v42, %v2085_v1 }
0x26ca   :  { %2427 = vrot.lane.b32.xlu1 %v7947_v15, %s6912_s22 }
0x2710   :  { %v7951_v54 = vpop.f32.mrf.mxu1 }
0x2712   :  { %v3498_v31 = vpop.f32.mrf.mxu1 }
0x2713   :  { %v3508_v59 = vrot.slane %v3498_v31, %v7186_v5 }
0x2715   :  { %v3509_v7 = vcombine.high %v3508_v59, %v3508_v59  ;;  %v3516_v20 = vrot.slane %v3508_v59, %v7186_v5 }
0x2717   :  { %v3523_v47 = vrot.slane %v3509_v7, %v7186_v5  ;;  %v3527_v11 = vrot.slane %v3516_v20, %v7214_v19 }
0x2719   :  { %v3531_v57 = vrot.slane %v3523_v47, %v7214_v19  ;;  %v3534_v51 = vadd.f32 %v3527_v11, %v7219_v29  ;;  %v3535_v34 = vadd.f32 %v3527_v11, %v7217_v28 }
0x271b   :  { %v3536_v14 = vadd.f32 %v3531_v57, %v7225_v33  ;;  %v3537_v58 = vadd.f32 %v3531_v57, %v7223_v32  ;;  %6339 = vtanh.f32 %v3534_v51 }
0x271c   :  { %6341 = vtanh.f32 %v3535_v34 }
0x271d   :  { %6343 = vtanh.f32 %v3536_v14 }
0x271e   :  { %6345 = vtanh.f32 %v3537_v58 }
0x2728   :  { %v6340_v23 = vpop.eup %6339 }
0x2729   :  { %v6342_v55 = vpop.eup %6341  ;;  %v3542_v24 = vmul.f32 %v7963_v50, %v6340_v23 }
0x272a   :  { %v6344_v35 = vpop.eup %6343  ;;  %v3543_v36 = vmul.f32 %v7963_v50, %v6342_v55 }
0x272b   :  { %v3546_v38 = vsel %vm546_vm1, %v3542_v24, 0.0  ;;  %v3544_v52 = vmul.f32 %v7963_v50, %v6344_v35  ;;  %v6346_v45 = vpop.eup %6345 }
0x272c   :  { %3547 = vadd.xlane.f32.xlu0 %v3546_v38  ;;  %v3549_v3 = vsel %vm546_vm1, %v3543_v36, 0.0  ;;  %v3545_v21 = vmul.f32 %v7963_v50, %v6346_v45 }
0x272d   :  { %3550 = vadd.xlane.f32.xlu1 %v3549_v3  ;;  %v3552_v53 = vsel %vm546_vm1, %v3544_v52, 0.0 }
0x272e   :  { %v3555_v39 = vsel %vm546_vm1, %v3545_v21, 0.0 }
0x2730   :  { %3553 = vadd.xlane.f32.xlu0 %v3552_v53 }
0x2734   :  { %3556 = vadd.xlane.f32.xlu0 %v3555_v39 }
0x273c   :  { %v2428_v6 = vpop.permute.xlu1 %2427 }
0x273d   :  { %v2430_v2 = vsel %vm355_vm2, %v7645_v43, %v2428_v6 }
0x273e   :  { %5824 = vmatmul.mubr.msk.f32.vlgmr.msra.gmra.mxu0 %vm1104_vm8, %v2430_v2 }
0x273f   :  { %5838 = vmatpush3.msra.mxu0 %v7793_v46  ;;  %5853 = vmatprep.mubr.msk.f32.mxu0 %vm6911_vm7, %v8589_v41 }
0x2740   :  { %5839 = vmatprep.subr.mxu0 %v8589_v41 }
0x2741   :  { %5840 = vmatpush3.msra.mxu0 %v7799_v16 }
0x2742   :  { %5841 = vmatprep.subr.mxu0 %v8589_v41 }
0x2743   :  { %5842 = vmatpush3.msra.mxu0 %v7803_v9 }
0x2744   :  { %5843 = vmatprep.subr.mxu0 %v8589_v41 }
0x2745   :  { %5844 = vmatpush3.msra.mxu0 %v7807_v49 }
0x2746   :  { %5845 = vmatprep.subr.mxu0 %v8589_v41 }
0x2747   :  { %5846 = vmatpush3.msra.mxu0 %v7811_v48 }
0x2748   :  { %5847 = vmatprep.subr.mxu0 %v8589_v41 }
0x2749   :  { %5848 = vmatpush3.msra.mxu0 %v7815_v8 }
0x274a   :  { %5849 = vmatprep.subr.mxu0 %v8589_v41 }
0x274b   :  { %5850 = vmatpush3.msra.mxu0 %v7819_v44 }
0x274c   :  { %5851 = vmatprep.subr.mxu0 %v8589_v41 }
0x274d   :  { %5852 = vmatpush3.msra.mxu0 %v7823_v63 }
0x274e   :  { %5867 = vmatprep.subr.mxu0 %v8589_v41 }
0x27b5   :  { %v3548_v43 = vpop.xlane.xlu0 %3547 }
0x27b6   :  { %v3551_v25 = vpop.xlane.xlu1 %3550  ;;  %v3558_v31 = vadd.f32 %v3548_v43, %v7250_v17 }
0x27b7   :  { %v3559_v42 = vadd.f32 %v3551_v25, %v7250_v17 }
0x27b8   :  { %v3569_v47 = vrot.slane %v3558_v31, %v7245_v4  ;;  %v2089_v31 = vmul.f32 0.9, %v7929_v37 }
0x27b9   :  { %v3554_v1 = vpop.xlane.xlu0 %3553  ;;  %v3573_v20 = vrot.slane %v3559_v42, %v7248_v10 }
0x27ba   :  { %v3560_v59 = vadd.f32 %v3554_v1, %v7250_v17 }
0x27bb   :  { %v3574_v34 = vsel %vm900_vm4, %v3573_v20, %v3569_v47 }
0x27bc   :  { %v3578_v57 = vrot.slane %v3560_v59, %v7245_v4  ;;  %v2088_v59 = vmul.f32 0.1, %v7926_v12 }
0x27bd   :  { %v3557_v7 = vpop.xlane.xlu0 %3556 }
0x27be   :  { %v3561_v11 = vadd.f32 %v3557_v7, %v7250_v17  ;;  %v8014_v7 = vadd.f32 %v2089_v31, %v2088_v59 }
0x27c0   :  { %v3582_v51 = vrot.slane %v3561_v11, %v7248_v10 }
0x27c2   :  { %v3583_v14 = vsel %vm900_vm4, %v3582_v51, %v3578_v57 }
0x27c3   :  { %v3584_v58 = vsel %vm911_vm3, %v3583_v14, %v3574_v34 }
0x27c4   :  { %v3586_v23 = vsel %vm884_vm5, %v3584_v58, -1e+30 }
0x27c5   :  { %v3587_v55 = vsel %vm915_vm6, %v3586_v23, -inf }
0x27c6   :  { %3588 = vmax.xlane.f32.xlu1 %v3587_v55 }
0x27fe   :  { %v2500_v24 = vpop.f32.mrf.mxu0 }
0x27ff   :  { %v2501_v35 = vadd.f32 %v7734_v56, %v2500_v24  ;;  %v8026_v24 = vld [vmem:[#allocation3] sm:$0xff] }
0x2800   :  { %v5825_v36 = vpop.f32.mrf.mxu0 }
0x2801   :  { %6347 = vtanh.f32 %v2501_v35  ;;  %v5425_v53 = vmul.f32 -1.442695, %v2501_v35 }
0x280e   :  { %v6348_v38 = vpop.eup %6347 }
0x280f   :  { %2513 = vrot.lane.b32.xlu0 %v6348_v38, %s6912_s22 }
0x284f   :  { %v3589_v52 = vpop.xlane.xlu1 %3588 }
0x2850   :  { %v3590_v45 = vsub.f32 %v3586_v23, %v3589_v52  ;;  %v8023_v23 = vld [vmem:[#allocation3 + $0x8] sm:$0xff] }
0x2852   :  { %v3591_v3 = vmul.f32 1.442695, %v3590_v45 }
0x2854   :  { %6349 = vpow2.f32 %v3591_v3 }
0x2855   :  { %6351 = vpow2.f32 %v5425_v53  ;;  %v8031_v53 = vld [vmem:[#allocation3 + $0x18] sm:$0xff] }
0x2861   :  { %v6350_v21 = vpop.eup %6349 }
0x2862   :  { %v3593_v39 = vsel %vm915_vm6, %v6350_v21, 0.0  ;;  %v6352_v6 = vpop.eup %6351 }
0x2863   :  { %3594 = vadd.xlane.f32.xlu1 %v3593_v39  ;;  %v2507_v2 = vadd.f32 1.0, %v6352_v6  ;;  %v8034_v39 = vld [vmem:[#allocation3 + $0x10] sm:$0xff] }
0x2865   :  { %6353 = vrcp.f32 %v2507_v2 }
0x2872   :  { %v6354_v43 = vpop.eup %6353 }
0x2873   :  { %v2511_v20 = vmul.f32 %v6354_v43, %v8014_v7 }
0x2881   :  { %v2514_v25 = vpop.permute.xlu0 %2513 }
0x2882   :  { %v2516_v1 = vmul.f32 %v6354_v43, %v2514_v25 }
0x2884   :  { %2518 = vrot.lane.b32.xlu1 %v2516_v1, %s6913_s23 }
0x28ec   :  { %v3595_v42 = vpop.xlane.xlu1 %3594 }
0x28ed   :  { %6355 = vrcp.f32 %v3595_v42 }
0x28f6   :  { %v2519_v47 = vpop.permute.xlu1 %2518 }
0x28f7   :  { %v8017_v11 = vadd.f32 %v2519_v47, %v2511_v20 }
0x28f9   :  { %6357 = vtanh.f32 %v8017_v11 }
0x28fa   :  { %v6356_v57 = vpop.eup %6355 }
0x28fb   :  { %v3597_v51 = vmul.f32 %v6356_v57, %v6350_v21 }
0x28fd   :  { %v3601_v34 = vrot.slane %v3597_v51, %v7214_v19  ;;  %v3612_v14 = vrot.slane %v3597_v51, %v7273_v60  ;;  %v2528_v51 = vmul.f32 0.1, %v7947_v15 }
0x28ff   :  { %3603 = vbcast.lane.b32.xlu0 %v3601_v34, 256  ;;  %3607 = vbcast.lane.b32.xlu1 %v3601_v34, 264 }
0x2903   :  { %3614 = vbcast.lane.b32.xlu0 %v3612_v14, 256  ;;  %3618 = vbcast.lane.b32.xlu1 %v3612_v14, 264 }
0x2906   :  { %v6358_v12 = vpop.eup %6357 }
0x2907   :  { %2524 = vrot.lane.b32.xlu0 %v6358_v12, %s6912_s22 }
0x2971   :  { %v3608_v37 = vpop.permute.xlu1 %3607  ;;  %v3604_v58 = vpop.permute.xlu0 %3603 }
0x2972   :  { %v3621_v55 = vmul.f32 %v8023_v23, %v3608_v37  ;;  %v3620_v35 = vmul.f32 %v8026_v24, %v3604_v58 }
0x2974   :  { %v3625_v36 = vsel %vm355_vm2, %v3621_v55, 0.0  ;;  %v3624_v38 = vsel %vm355_vm2, %v3620_v35, 0.0 }
0x2975   :  { %v3626_v52 = vadd.f32 %v3625_v36, %v3624_v38  ;;  %v3619_v45 = vpop.permute.xlu1 %3618  ;;  %v3615_v3 = vpop.permute.xlu0 %3614 }
0x2976   :  { %v3623_v21 = vmul.f32 %v8031_v53, %v3619_v45  ;;  %v3622_v6 = vmul.f32 %v8034_v39, %v3615_v3  ;;  %v6458_v45 = vld [vmem:[#allocation17 + $0x30] sm:$0xff]  ;;  %v6459_v3 = vld [vmem:[#allocation17 + $0x28] sm:$0xff] }
0x2977   :  { %v3627_v2 = vrot.slane %v3626_v52, 4 }
0x2978   :  { %v3634_v25 = vsel %vm355_vm2, %v3623_v21, 0.0  ;;  %v3633_v1 = vsel %vm355_vm2, %v3622_v6, 0.0  ;;  %v6460_v21 = vld [vmem:[#allocation17 + $0x20] sm:$0xff]  ;;  %v6461_v6 = vld [vmem:[#allocation17 + $0x18] sm:$0xff] }
0x2979   :  { %v3628_v42 = vadd.f32 %v3627_v2, %v3626_v52  ;;  %v3635_v31 = vadd.f32 %v3634_v25, %v3633_v1  ;;  %v2525_v59 = vpop.permute.xlu0 %2524  ;;  %v6462_v2 = vld [vmem:[#allocation17 + $0x10] sm:$0xff]  ;;  %v6463_v25 = vld [vmem:[#allocation17 + $0x8] sm:$0xff]  ;;  %v6464_v1 = vld [vmem:[#allocation17] sm:$0xff] }
0x297a   :  { %v2527_v20 = vmul.f32 %v6354_v43, %v2525_v59 }
0x297b   :  { %v3629_v47 = vrot.slane %v3628_v42, 2  ;;  %v3636_v57 = vrot.slane %v3635_v31, 4 }
0x297c   :  { %v2529_v34 = vmul.f32 0.9, %v2527_v20 }
0x297d   :  { %v3630_v14 = vadd.f32 %v3629_v47, %v3628_v42  ;;  %v3637_v12 = vadd.f32 %v3636_v57, %v3635_v31 }
0x297e   :  { %v8040_v37 = vadd.f32 %v2529_v34, %v2528_v51 }
0x297f   :  { %v3638_v58 = vrot.slane %v3637_v12, 2  ;;  %v3631_v55 = vrot.slane %v3630_v14, 1 }
0x2980   :  { %2870 = vrot.lane.b32.xlu1 %v8040_v37, %s6912_s22 }
0x2981   :  { %v3639_v35 = vadd.f32 %v3638_v58, %v3637_v12  ;;  %v3632_v38 = vadd.f32 %v3631_v55, %v3630_v14 }
0x2983   :  { %v3640_v36 = vrot.slane %v3639_v35, 1 }
0x2985   :  { %v3641_v52 = vadd.f32 %v3640_v36, %v3639_v35 }
0x2987   :  { %v8045_v43 = vsel %vm911_vm3, %v3641_v52, %v3632_v38 }
0x2988   :  { %5895 = vmatmul.mubr.msk.f32.vlgmr.msra.gmra.mxu1 %vm355_vm2, %v8045_v43 }
0x2989   :  { %3898 = vmatpush1.msra.mxu1 %v6458_v45  ;;  %3937 = vmatprep.mubr.f32.mxu1 %v8589_v41 }
0x298a   :  { %3899 = vmatprep.subr.mxu1 %v6459_v3 }
0x298b   :  { %3900 = vmatpush1.msra.mxu1 %v6460_v21 }
0x298c   :  { %3901 = vmatprep.subr.mxu1 %v6461_v6  ;;  %v3307_v6 = vmul.f32 0.9, %v7913_v0 }
0x298d   :  { %3902 = vmatpush1.msra.mxu1 %v6462_v2  ;;  %v3306_v2 = vmul.f32 0.1, %v7910_v26 }
0x298e   :  { %3903 = vmatprep.subr.mxu1 %v6463_v25 }
0x298f   :  { %3904 = vmatpush1.msra.mxu1 %v6464_v1  ;;  %v8081_v25 = vadd.f32 %v3307_v6, %v3306_v2 }
0x2990   :  { %5916 = vmatprep.subr.mxu1 %v8589_v41 }
0x29f2   :  { %v2871_v42 = vpop.permute.xlu1 %2870 }
0x29f3   :  { %v2873_v31 = vsel %vm355_vm2, %v7749_v61, %v2871_v42 }
0x29f4   :  { %5854 = vmatmul.mubr.msk.f32.vlgmr.msra.gmra.mxu0 %vm1104_vm8, %v2873_v31 }
0x29f5   :  { %5868 = vmatpush3.msra.mxu0 %v7793_v46  ;;  %5883 = vmatprep.mubr.msk.f32.mxu0 %vm6911_vm7, %v8589_v41 }
0x29f6   :  { %5869 = vmatprep.subr.mxu0 %v8589_v41 }
0x29f7   :  { %5870 = vmatpush3.msra.mxu0 %v7799_v16 }
0x29f8   :  { %5871 = vmatprep.subr.mxu0 %v8589_v41 }
0x29f9   :  { %5872 = vmatpush3.msra.mxu0 %v7803_v9 }
0x29fa   :  { %5873 = vmatprep.subr.mxu0 %v8589_v41 }
0x29fb   :  { %5874 = vmatpush3.msra.mxu0 %v7807_v49 }
0x29fc   :  { %5875 = vmatprep.subr.mxu0 %v8589_v41 }
0x29fd   :  { %5876 = vmatpush3.msra.mxu0 %v7811_v48 }
0x29fe   :  { %5877 = vmatprep.subr.mxu0 %v8589_v41 }
0x29ff   :  { %5878 = vmatpush3.msra.mxu0 %v7815_v8 }
0x2a00   :  { %5879 = vmatprep.subr.mxu0 %v8589_v41 }
0x2a01   :  { %5880 = vmatpush3.msra.mxu0 %v7819_v44 }
0x2a02   :  { %5881 = vmatprep.subr.mxu0 %v8589_v41 }
0x2a03   :  { %5882 = vmatpush3.msra.mxu0 %v7823_v63 }
0x2a04   :  { %5897 = vmatprep.subr.mxu0 %v8589_v41 }
0x2a48   :  { %v3713_v61 = vpop.f32.mrf.mxu1 }
0x2a49   :  { %v3714_v59 = vadd.f32 %v3713_v61, %v7951_v54 }
0x2a4a   :  { %v5896_v20 = vpop.f32.mrf.mxu1 }
0x2a4b   :  { %v3721_v47 = vadd.f32 %v7206_v13, %v3714_v59  ;;  %v2532_v59 = vmul.f32 0.9, %v8017_v11  ;;  %v2531_v20 = vmul.f32 0.1, %v8014_v7 }
0x2a4d   :  { %6359 = vtanh.f32 %v3721_v47  ;;  %v5438_v51 = vmul.f32 -1.442695, %v3721_v47  ;;  %v8090_v47 = vadd.f32 %v2532_v59, %v2531_v20 }
0x2a4f   :  { %6361 = vpow2.f32 %v5438_v51 }
0x2a5a   :  { %v6360_v57 = vpop.eup %6359 }
0x2a5b   :  { %3731 = vrot.lane.b32.xlu0 %v6360_v57, %s6912_s22 }
0x2a5c   :  { %v6362_v58 = vpop.eup %6361 }
0x2a5d   :  { %v3725_v55 = vadd.f32 1.0, %v6362_v58 }
0x2ab4   :  { %v2943_v34 = vpop.f32.mrf.mxu0 }
0x2ab5   :  { %v2944_v14 = vadd.f32 %v7734_v56, %v2943_v34 }
0x2ab6   :  { %v5855_v12 = vpop.f32.mrf.mxu0 }
0x2ab7   :  { %6363 = vtanh.f32 %v2944_v14  ;;  %v5430_v38 = vmul.f32 -1.442695, %v2944_v14  ;;  %v3746_v12 = vmul.f32 0.1, %v7920_v40  ;;  %v6465_v40 = vld [vmem:[#allocation12 + $0x18] sm:$0xff] }
0x2ab8   :  { %6365 = vrcp.f32 %v3725_v55 }
0x2ab9   :  { %6367 = vpow2.f32 %v5430_v38 }
0x2ac4   :  { %v6364_v35 = vpop.eup %6363 }
0x2ac5   :  { %2956 = vrot.lane.b32.xlu0 %v6364_v35, %s6912_s22  ;;  %v6366_v54 = vpop.eup %6365  ;;  %v2971_v35 = vmul.f32 0.1, %v8040_v37 }
0x2ac6   :  { %v6368_v52 = vpop.eup %6367  ;;  %v3729_v1 = vmul.f32 %v6366_v54, %v8081_v25 }
0x2ac7   :  { %v2950_v45 = vadd.f32 1.0, %v6368_v52  ;;  %v6467_v52 = vld [vmem:[#allocation12 + $0x8] sm:$0xff] }
0x2ac9   :  { %6369 = vrcp.f32 %v2950_v45  ;;  %v6468_v45 = vld [vmem:[#allocation12] sm:$0xff] }
0x2acd   :  { %v3732_v36 = vpop.permute.xlu0 %3731 }
0x2ace   :  { %v3734_v13 = vmul.f32 %v6366_v54, %v3732_v36 }
0x2ad0   :  { %3736 = vrot.lane.b32.xlu1 %v3734_v13, %s6913_s23 }
0x2ad6   :  { %v6370_v3 = vpop.eup %6369 }
0x2ad7   :  { %v2954_v26 = vmul.f32 %v6370_v3, %v8090_v47 }
0x2b37   :  { %v2957_v56 = vpop.permute.xlu0 %2956 }
0x2b38   :  { %v2959_v21 = vmul.f32 %v6370_v3, %v2957_v56 }
0x2b3a   :  { %2961 = vrot.lane.b32.xlu0 %v2959_v21, %s6913_s23 }
0x2b42   :  { %v3737_v42 = vpop.permute.xlu1 %3736 }
0x2b43   :  { %v8084_v31 = vadd.f32 %v3737_v42, %v3729_v1 }
0x2b45   :  { %6371 = vtanh.f32 %v8084_v31 }
0x2b52   :  { %v6372_v61 = vpop.eup %6371 }
0x2b53   :  { %3742 = vrot.lane.b32.xlu1 %v6372_v61, %s6912_s22 }
0x2bac   :  { %v2962_v0 = vpop.permute.xlu0 %2961 }
0x2bad   :  { %v8093_v57 = vadd.f32 %v2962_v0, %v2954_v26 }
0x2baf   :  { %6373 = vtanh.f32 %v8093_v57 }
0x2bbc   :  { %v6374_v51 = vpop.eup %6373 }
0x2bbd   :  { %2967 = vrot.lane.b32.xlu0 %v6374_v51, %s6912_s22 }
0x2bc5   :  { %v3743_v34 = vpop.permute.xlu1 %3742 }
0x2bc6   :  { %v3745_v14 = vmul.f32 %v6366_v54, %v3743_v34  ;;  %v6466_v54 = vld [vmem:[#allocation12 + $0x10] sm:$0xff] }
0x2bc8   :  { %v3747_v58 = vmul.f32 0.9, %v3745_v14  ;;  %v8156_v14 = vld [vmem:[#allocation20] ss:$0 sm:$0xff] }
0x2bca   :  { %v8098_v11 = vadd.f32 %v3747_v58, %v3746_v12 }
0x2bcc   :  { %3753 = vrot.lane.b32.xlu1 %v8098_v11, %s6913_s23 }
0x2c2f   :  { %v2968_v7 = vpop.permute.xlu0 %2967 }
0x2c30   :  { %v2970_v55 = vmul.f32 %v6370_v3, %v2968_v7 }
0x2c32   :  { %v2972_v36 = vmul.f32 0.9, %v2970_v55 }
0x2c34   :  { %v8103_v13 = vadd.f32 %v2972_v36, %v2971_v35 }
0x2c36   :  { %3313 = vrot.lane.b32.xlu1 %v8103_v13, %s6912_s22 }
0x2c3e   :  { %v8107_v38 = vpop.permute.xlu1 %3753 }
0x2c3f   :  { %5441 = vmatmul.mubr.msk.f32.vlgmr.msra.gmra.mxu1 %vm355_vm2, %v8107_v38 }
0x2c40   :  { %5917 = vmatpush3.msra.mxu1 %v6465_v40  ;;  %5924 = vmatprep.mubr.msk.f32.mxu1 %vm6911_vm7, %v8589_v41 }
0x2c41   :  { %5918 = vmatprep.subr.mxu1 %v8589_v41 }
0x2c42   :  { %5919 = vmatpush3.msra.mxu1 %v6466_v54 }
0x2c43   :  { %5920 = vmatprep.subr.mxu1 %v8589_v41 }
0x2c44   :  { %5921 = vmatpush3.msra.mxu1 %v6467_v52 }
0x2c45   :  { %5922 = vmatprep.subr.mxu1 %v8589_v41 }
0x2c46   :  { %5923 = vmatpush3.msra.mxu1 %v6468_v45 }
0x2ca8   :  { %v3314_v3 = vpop.permute.xlu1 %3313 }
0x2ca9   :  { %v3316_v56 = vsel %vm355_vm2, %v7932_v27, %v3314_v3 }
0x2caa   :  { %5884 = vmatmul.mubr.msk.f32.vlgmr.msra.gmra.mxu0 %vm1104_vm8, %v3316_v56 }
0x2cab   :  { %5898 = vmatpush3.msra.mxu0 %v7793_v46  ;;  %5913 = vmatprep.mubr.msk.f32.mxu0 %vm6911_vm7, %v8589_v41 }
0x2cac   :  { %5899 = vmatprep.subr.mxu0 %v8589_v41 }
0x2cad   :  { %5900 = vmatpush3.msra.mxu0 %v7799_v16 }
0x2cae   :  { %5901 = vmatprep.subr.mxu0 %v8589_v41 }
0x2caf   :  { %5902 = vmatpush3.msra.mxu0 %v7803_v9 }
0x2cb0   :  { %5903 = vmatprep.subr.mxu0 %v8589_v41 }
0x2cb1   :  { %5904 = vmatpush3.msra.mxu0 %v7807_v49 }
0x2cb2   :  { %5905 = vmatprep.subr.mxu0 %v8589_v41 }
0x2cb3   :  { %5906 = vmatpush3.msra.mxu0 %v7811_v48 }
0x2cb4   :  { %5907 = vmatprep.subr.mxu0 %v8589_v41 }
0x2cb5   :  { %5908 = vmatpush3.msra.mxu0 %v7815_v8 }
0x2cb6   :  { %5909 = vmatprep.subr.mxu0 %v8589_v41 }
0x2cb7   :  { %5910 = vmatpush3.msra.mxu0 %v7819_v44 }
0x2cb8   :  { %5911 = vmatprep.subr.mxu0 %v8589_v41 }
0x2cb9   :  { %5912 = vmatpush3.msra.mxu0 %v7823_v63 }
0x2cba   :  { %5927 = vmatprep.subr.mxu0 %v8589_v41 }
0x2cff   :  { %v8137_v46 = vpop.f32.mrf.mxu1 }
0x2d01   :  { %v3941_v16 = vpop.f32.mrf.mxu1 }
0x2d02   :  { %v3951_v9 = vrot.slane %v3941_v16, %v7186_v5 }
0x2d04   :  { %v3952_v49 = vcombine.high %v3951_v9, %v3951_v9  ;;  %v3959_v48 = vrot.slane %v3951_v9, %v7186_v5 }
0x2d06   :  { %v3966_v8 = vrot.slane %v3952_v49, %v7186_v5  ;;  %v3970_v27 = vrot.slane %v3959_v48, %v7214_v19 }
0x2d08   :  { %v3974_v44 = vrot.slane %v3966_v8, %v7214_v19  ;;  %v3977_v21 = vadd.f32 %v3970_v27, %v7219_v29  ;;  %v3978_v63 = vadd.f32 %v3970_v27, %v7217_v28 }
0x2d0a   :  { %v3979_v6 = vadd.f32 %v3974_v44, %v7225_v33  ;;  %v3980_v2 = vadd.f32 %v3974_v44, %v7223_v32  ;;  %6375 = vtanh.f32 %v3977_v21 }
0x2d0b   :  { %6377 = vtanh.f32 %v3978_v63 }
0x2d0c   :  { %6379 = vtanh.f32 %v3979_v6 }
0x2d0d   :  { %6381 = vtanh.f32 %v3980_v2 }
0x2d17   :  { %v6376_v1 = vpop.eup %6375 }
0x2d18   :  { %v6378_v42 = vpop.eup %6377  ;;  %v3985_v61 = vmul.f32 %v7963_v50, %v6376_v1 }
0x2d19   :  { %v6380_v59 = vpop.eup %6379  ;;  %v3986_v20 = vmul.f32 %v7963_v50, %v6378_v42 }
0x2d1a   :  { %v3989_v26 = vsel %vm546_vm1, %v3985_v61, 0.0  ;;  %v3987_v29 = vmul.f32 %v7963_v50, %v6380_v59  ;;  %v6382_v28 = vpop.eup %6381  ;;  %v2975_v59 = vmul.f32 0.9, %v8093_v57 }
0x2d1b   :  { %3990 = vadd.xlane.f32.xlu0 %v3989_v26  ;;  %v3992_v33 = vsel %vm546_vm1, %v3986_v20, 0.0  ;;  %v3988_v0 = vmul.f32 %v7963_v50, %v6382_v28  ;;  %v2974_v20 = vmul.f32 0.1, %v8090_v47 }
0x2d1c   :  { %3993 = vadd.xlane.f32.xlu1 %v3992_v33  ;;  %v3995_v32 = vsel %vm546_vm1, %v3987_v29, 0.0 }
0x2d1d   :  { %v3998_v51 = vsel %vm546_vm1, %v3988_v0, 0.0  ;;  %v8178_v26 = vadd.f32 %v2975_v59, %v2974_v20  ;;  %v6475_v20 = vld [vmem:[#allocation18 + $0x10] sm:$0xff] }
0x2d1f   :  { %3996 = vadd.xlane.f32.xlu0 %v3995_v32 }
0x2d23   :  { %3999 = vadd.xlane.f32.xlu0 %v3998_v51 }
0x2d6a   :  { %v3386_v34 = vpop.f32.mrf.mxu0 }
0x2d6b   :  { %v3387_v12 = vadd.f32 %v8156_v14, %v3386_v34 }
0x2d6c   :  { %v5885_v58 = vpop.f32.mrf.mxu0 }
0x2d6d   :  { %6383 = vtanh.f32 %v3387_v12  ;;  %v5435_v21 = vmul.f32 -1.442695, %v3387_v12 }
0x2d6f   :  { %6385 = vpow2.f32 %v5435_v21 }
0x2d7a   :  { %v6384_v7 = vpop.eup %6383 }
0x2d7b   :  { %3399 = vrot.lane.b32.xlu1 %v6384_v7, %s6912_s22 }
0x2d7c   :  { %v6386_v63 = vpop.eup %6385 }
0x2da4   :  { %v3991_v55 = vpop.xlane.xlu0 %3990 }
0x2da5   :  { %v3994_v35 = vpop.xlane.xlu1 %3993  ;;  %v4001_v50 = vadd.f32 %v3991_v55, %v7250_v17  ;;  %v3414_v55 = vmul.f32 0.1, %v8103_v13 }
0x2da6   :  { %v4002_v40 = vadd.f32 %v3994_v35, %v7250_v17 }
0x2da7   :  { %v4012_v3 = vrot.slane %v4001_v50, %v7245_v4 }
0x2da8   :  { %v3997_v36 = vpop.xlane.xlu0 %3996  ;;  %v4016_v45 = vrot.slane %v4002_v40, %v7248_v10 }
0x2da9   :  { %v4003_v54 = vadd.f32 %v3997_v36, %v7250_v17 }
0x2daa   :  { %v4017_v49 = vsel %vm900_vm4, %v4016_v45, %v4012_v3 }
0x2dab   :  { %v4021_v16 = vrot.slane %v4003_v54, %v7245_v4 }
0x2dac   :  { %v4000_v52 = vpop.xlane.xlu0 %3999 }
0x2dad   :  { %v4004_v56 = vadd.f32 %v4000_v52, %v7250_v17  ;;  %v3393_v17 = vadd.f32 1.0, %v6386_v63 }
0x2daf   :  { %v4025_v9 = vrot.slane %v4004_v56, %v7248_v10  ;;  %6387 = vrcp.f32 %v3393_v17  ;;  %v6470_v17 = vld [vmem:[#allocation18 + $0x38] sm:$0xff] }
0x2db1   :  { %v4026_v48 = vsel %vm900_vm4, %v4025_v9, %v4021_v16  ;;  %vm4780_vm4 = vcmask 326656  }
0x2db2   :  { %v4027_v8 = vsel %vm911_vm3, %v4026_v48, %v4017_v49 }
0x2db3   :  { %v4029_v27 = vsel %vm884_vm5, %v4027_v8, -1e+30  ;;  %vm4782_vm5 = vcmask 392192  }
0x2db4   :  { %v4030_v44 = vsel %vm915_vm6, %v4029_v27, -inf }
0x2db5   :  { %4031 = vmax.xlane.f32.xlu0 %v4030_v44 }
0x2dbc   :  { %v6388_v4 = vpop.eup %6387 }
0x2dbd   :  { %v3397_v29 = vmul.f32 %v6388_v4, %v8178_v26 }
0x2ded   :  { %v3400_v6 = vpop.permute.xlu1 %3399 }
0x2dee   :  { %v3402_v10 = vmul.f32 %v6388_v4, %v3400_v6 }
0x2df0   :  { %3404 = vrot.lane.b32.xlu0 %v3402_v10, %s6913_s23  ;;  %v6472_v10 = vld [vmem:[#allocation18 + $0x28] sm:$0xff] }
0x2e3e   :  { %v4032_v2 = vpop.xlane.xlu0 %4031 }
0x2e3f   :  { %v4033_v1 = vsub.f32 %v4029_v27, %v4032_v2 }
0x2e41   :  { %v4034_v42 = vmul.f32 1.442695, %v4033_v1  ;;  %v6473_v1 = vld [vmem:[#allocation18 + $0x20] sm:$0xff] }
0x2e43   :  { %6389 = vpow2.f32 %v4034_v42 }
0x2e50   :  { %v6390_v61 = vpop.eup %6389 }
0x2e51   :  { %v4036_v18 = vsel %vm915_vm6, %v6390_v61, 0.0  ;;  %vm4784_vm6 = vcmask 457728  }
0x2e52   :  { %4037 = vadd.xlane.f32.xlu1 %v4036_v18 }
0x2e62   :  { %v3405_v28 = vpop.permute.xlu0 %3404 }
0x2e63   :  { %v8181_v33 = vadd.f32 %v3405_v28, %v3397_v29  ;;  %v6476_v28 = vld [vmem:[#allocation18 + $0x8] sm:$0xff] }
0x2e65   :  { %6391 = vtanh.f32 %v8181_v33 }
0x2e72   :  { %v6392_v32 = vpop.eup %6391 }
0x2e73   :  { %3410 = vrot.lane.b32.xlu0 %v6392_v32, %s6912_s22  ;;  %v6477_v32 = vld [vmem:[#allocation18] sm:$0xff] }
0x2edb   :  { %v4038_v0 = vpop.xlane.xlu1 %4037 }
0x2edc   :  { %6393 = vrcp.f32 %v4038_v0 }
0x2ee5   :  { %v3411_v47 = vpop.permute.xlu0 %3410 }
0x2ee6   :  { %v3413_v12 = vmul.f32 %v6388_v4, %v3411_v47  ;;  %v6471_v4 = vld [vmem:[#allocation18 + $0x30] sm:$0xff] }
0x2ee8   :  { %v3415_v7 = vmul.f32 0.9, %v3413_v12 }
0x2ee9   :  { %v6394_v51 = vpop.eup %6393 }
0x2eea   :  { %v4040_v34 = vmul.f32 %v6394_v51, %v6390_v61  ;;  %v8188_v35 = vadd.f32 %v3415_v7, %v3414_v55  ;;  %v6474_v61 = vld [vmem:[#allocation18 + $0x18] sm:$0xff]  ;;  %v8590_v7 = vld [vmem:[#allocation53_spill] sm:$0xff] }
0x2eec   :  { %v4044_v57 = vrot.slane %v4040_v34, %v7214_v19  ;;  %v4055_v58 = vrot.slane %v4040_v34, %v7273_v60 }
0x2eee   :  { %4046 = vbcast.lane.b32.xlu0 %v4044_v57, 256 }
0x2ef2   :  { %4050 = vbcast.lane.b32.xlu0 %v4044_v57, 264 }
0x2ef6   :  { %4057 = vbcast.lane.b32.xlu0 %v4055_v58, 256 }
0x2efa   :  { %4061 = vbcast.lane.b32.xlu0 %v4055_v58, 264 }
0x2efe   :  { %3756 = vrot.lane.b32.xlu0 %v8188_v35, %s6912_s22 }
0x2f60   :  { %v4047_v36 = vpop.permute.xlu0 %4046 }
0x2f61   :  { %v4063_v40 = vmul.f32 %v8026_v24, %v4047_v36 }
0x2f63   :  { %v4067_v52 = vsel %vm355_vm2, %v4063_v40, 0.0 }
0x2f64   :  { %v4051_v50 = vpop.permute.xlu0 %4050 }
0x2f65   :  { %v4064_v54 = vmul.f32 %v8023_v23, %v4051_v50 }
0x2f67   :  { %v4068_v60 = vsel %vm355_vm2, %v4064_v54, 0.0 }
0x2f68   :  { %v4069_v45 = vadd.f32 %v4068_v60, %v4067_v52  ;;  %v4058_v3 = vpop.permute.xlu0 %4057 }
0x2f69   :  { %v4065_v16 = vmul.f32 %v8034_v39, %v4058_v3 }
0x2f6a   :  { %v4070_v56 = vrot.slane %v4069_v45, 4 }
0x2f6b   :  { %v4076_v8 = vsel %vm355_vm2, %v4065_v16, 0.0 }
0x2f6c   :  { %v4071_v9 = vadd.f32 %v4070_v56, %v4069_v45  ;;  %v4062_v49 = vpop.permute.xlu0 %4061 }
0x2f6d   :  { %v4066_v48 = vmul.f32 %v8031_v53, %v4062_v49 }
0x2f6e   :  { %v4072_v27 = vrot.slane %v4071_v9, 2 }
0x2f6f   :  { %v4077_v24 = vsel %vm355_vm2, %v4066_v48, 0.0  ;;  %v3418_v48 = vmul.f32 0.9, %v8181_v33 }
0x2f70   :  { %v4078_v44 = vadd.f32 %v4077_v24, %v4076_v8  ;;  %v3757_v23 = vpop.permute.xlu0 %3756  ;;  %v4073_v39 = vadd.f32 %v4072_v27, %v4071_v9  ;;  %v3417_v8 = vmul.f32 0.1, %v8178_v26 }
0x2f71   :  { %v3759_v21 = vsel %vm355_vm2, %v8107_v38, %v3757_v23 }
0x2f72   :  { %v4079_v63 = vrot.slane %v4078_v44, 4  ;;  %5914 = vmatmul.mubr.msk.f32.vlgmr.msra.gmra.mxu0 %vm1104_vm8, %v3759_v21  ;;  %v4074_v38 = vrot.slane %v4073_v39, 1  ;;  %v3419_v24 = vadd.f32 %v3418_v48, %v3417_v8  ;;  %v3750_v21 = vmul.f32 0.9, %v8084_v31 }
0x2f73   :  { %5928 = vmatpush3.msra.mxu0 %v6470_v17  ;;  %5943 = vmatprep.mubr.msk.f32.mxu0 %vm6911_vm7, %v8589_v41 }
0x2f74   :  { %v4080_v53 = vadd.f32 %v4079_v63, %v4078_v44  ;;  %5929 = vmatprep.subr.mxu0 %v8589_v41  ;;  %v4075_v18 = vadd.f32 %v4074_v38, %v4073_v39  ;;  %v3749_v63 = vmul.f32 0.1, %v8081_v25  ;;  %v3857_v38 = vmul.f32 0.1, %v8188_v35 }
0x2f75   :  { %5930 = vmatpush3.msra.mxu0 %v6471_v4 }
0x2f76   :  { %v4081_v6 = vrot.slane %v4080_v53, 2  ;;  %5931 = vmatprep.subr.mxu0 %v8589_v41  ;;  %v3751_v17 = vadd.f32 %v3750_v21, %v3749_v63 }
0x2f77   :  { %5932 = vmatpush3.msra.mxu0 %v6472_v10 }
0x2f78   :  { %v4082_v2 = vadd.f32 %v4081_v6, %v4080_v53  ;;  %5933 = vmatprep.subr.mxu0 %v8589_v41 }
0x2f79   :  { %5934 = vmatpush3.msra.mxu0 %v6473_v1 }
0x2f7a   :  { %v4083_v42 = vrot.slane %v4082_v2, 1  ;;  %5935 = vmatprep.subr.mxu0 %v8589_v41 }
0x2f7b   :  { %5936 = vmatpush3.msra.mxu0 %v6474_v61 }
0x2f7c   :  { %v4084_v59 = vadd.f32 %v4083_v42, %v4082_v2  ;;  %5937 = vmatprep.subr.mxu0 %v8589_v41  ;;  %v4189_v42 = vmul.f32 0.1, %v8098_v11 }
0x2f7d   :  { %5938 = vmatpush3.msra.mxu0 %v6475_v20 }
0x2f7e   :  { %v8211_v29 = vsel %vm911_vm3, %v4084_v59, %v4075_v18  ;;  %5939 = vmatprep.subr.mxu0 %v8589_v41  ;;  %vm4777_vm3 = vcmask 195584  }
0x2f7f   :  { %5925 = vmatmul.mubr.msk.f32.vlgmr.msra.gmra.mxu1 %vm355_vm2, %v8211_v29  ;;  %5940 = vmatpush3.msra.mxu0 %v6476_v28 }
0x2f80   :  { %5941 = vmatprep.subr.mxu0 %v8589_v41 }
0x2f81   :  { %5942 = vmatpush3.msra.mxu0 %v6477_v32 }
0x2f82   :  { %5965 = vmatprep.subr.mxu0 %v8589_v41 }
0x3032   :  { %v3829_v0 = vpop.f32.mrf.mxu0 }
0x3033   :  { %v3830_v51 = vadd.f32 %v8156_v14, %v3829_v0 }
0x3034   :  { %v5915_v34 = vpop.f32.mrf.mxu0 }
0x3035   :  { %6395 = vtanh.f32 %v3830_v51  ;;  %v5440_v40 = vmul.f32 -1.442695, %v3830_v51 }
0x303f   :  { %v4156_v57 = vpop.f32.mrf.mxu1 }
0x3040   :  { %v4157_v47 = vadd.f32 %v4156_v57, %v8137_v46 }
0x3041   :  { %v5926_v12 = vpop.f32.mrf.mxu1 }
0x3042   :  { %v6396_v58 = vpop.eup %6395  ;;  %v4164_v55 = vadd.f32 %v8590_v7, %v4157_v47 }
0x3043   :  { %3842 = vrot.lane.b32.xlu0 %v6396_v58, %s6912_s22 }
0x3044   :  { %6397 = vtanh.f32 %v4164_v55  ;;  %v5443_v50 = vmul.f32 -1.442695, %v4164_v55 }
0x3045   :  { %6399 = vpow2.f32 %v5440_v40  ;;  %v8594_v40 = vld [vmem:[#allocation54_spill] sm:$0xff] }
0x3046   :  { %6401 = vpow2.f32 %v5443_v50  ;;  %v8595_v50 = vld [vmem:[#allocation57_spill] sm:$0xff] }
0x3051   :  { %v6398_v36 = vpop.eup %6397 }
0x3052   :  { %4174 = vrot.lane.b32.xlu1 %v6398_v36, %s6912_s22  ;;  %v6400_v54 = vpop.eup %6399 }
0x3053   :  { %v3836_v52 = vadd.f32 1.0, %v6400_v54  ;;  %v6402_v60 = vpop.eup %6401  ;;  %v8596_v54 = vld [vmem:[#allocation58_spill] sm:$0xff] }
0x3054   :  { %v4168_v45 = vadd.f32 1.0, %v6402_v60  ;;  %v4591_v60 = vld [vmem:[%s8591_s19 + $0x30] sm:$0xff] }
0x3055   :  { %6403 = vrcp.f32 %v3836_v52  ;;  %v4592_v52 = vld [vmem:[%s8591_s19 + $0x38] sm:$0xff] }
0x3056   :  { %6405 = vrcp.f32 %v4168_v45  ;;  %5946 = vmatprep.subr.mxu1 %v4592_v52  ;;  %v4590_v45 = vld [vmem:[%s8591_s19 + $0x28] sm:$0xff] }
0x3057   :  { %5947 = vmatpush3.msra.mxu1 %v4592_v52 }
0x3058   :  { %5948 = vmatprep.subr.mxu1 %v4591_v60 }
0x3059   :  { %5949 = vmatpush3.msra.mxu1 %v4591_v60 }
0x305a   :  { %5950 = vmatprep.subr.mxu1 %v4590_v45 }
0x305b   :  { %5951 = vmatpush3.msra.mxu1 %v4590_v45 }
0x3062   :  { %v6404_v46 = vpop.eup %6403 }
0x3063   :  { %v6406_v16 = vpop.eup %6405  ;;  %v3840_v27 = vmul.f32 %v6404_v46, %v3419_v24 }
0x3064   :  { %v4172_v39 = vmul.f32 %v6406_v16, %v3751_v17 }
0x30b5   :  { %v3843_v3 = vpop.permute.xlu0 %3842 }
0x30b6   :  { %v3845_v56 = vmul.f32 %v6404_v46, %v3843_v3  ;;  %v4588_v3 = vld [vmem:[%s8591_s19 + $0x18] sm:$0xff] }
0x30b8   :  { %3847 = vrot.lane.b32.xlu0 %v3845_v56, %s6913_s23 }
0x30c4   :  { %v4175_v9 = vpop.permute.xlu1 %4174 }
0x30c5   :  { %v4177_v49 = vmul.f32 %v6406_v16, %v4175_v9 }
0x30c7   :  { %4179 = vrot.lane.b32.xlu0 %v4177_v49, %s6913_s23  ;;  %v4585_v49 = vld [vmem:[%s8591_s19] sm:$0xff] }
0x312a   :  { %v3848_v44 = vpop.permute.xlu0 %3847 }
0x312b   :  { %v3850_v23 = vadd.f32 %v3848_v44, %v3840_v27 }
0x312d   :  { %6407 = vtanh.f32 %v3850_v23 }
0x3139   :  { %v4180_v53 = vpop.permute.xlu0 %4179 }
0x313a   :  { %v6408_v4 = vpop.eup %6407  ;;  %v4182_v6 = vadd.f32 %v4180_v53, %v4172_v39 }
0x313b   :  { %3853 = vrot.lane.b32.xlu0 %v6408_v4, %s6912_s22 }
0x313c   :  { %6409 = vtanh.f32 %v4182_v6 }
0x3149   :  { %v6410_v33 = vpop.eup %6409 }
0x314a   :  { %4185 = vrot.lane.b32.xlu0 %v6410_v33, %s6912_s22 }
0x31ad   :  { %v3854_v26 = vpop.permute.xlu0 %3853 }
0x31ae   :  { %v3856_v10 = vmul.f32 %v6404_v46, %v3854_v26  ;;  %v4589_v46 = vld [vmem:[%s8591_s19 + $0x20] sm:$0xff] }
0x31af   :  { %5952 = vmatprep.subr.mxu1 %v4589_v46 }
0x31b0   :  { %v3858_v2 = vmul.f32 0.9, %v3856_v10  ;;  %5953 = vmatpush3.msra.mxu1 %v4589_v46 }
0x31b1   :  { %5954 = vmatprep.subr.mxu1 %v4588_v3 }
0x31b2   :  { %v8232_v1 = vadd.f32 %v3858_v2, %v3857_v38  ;;  %5955 = vmatpush3.msra.mxu1 %v4588_v3 }
0x31b4   :  { %4196 = vrot.lane.b32.xlu0 %v8232_v1, %s6912_s22 }
0x31bc   :  { %v4186_v25 = vpop.permute.xlu0 %4185 }
0x31bd   :  { %v4188_v31 = vmul.f32 %v6406_v16, %v4186_v25  ;;  %v4586_v16 = vld [vmem:[%s8591_s19 + $0x8] sm:$0xff] }
0x31bf   :  { %v4190_v61 = vmul.f32 0.9, %v4188_v31 }
0x31c1   :  { %v4191_v18 = vadd.f32 %v4190_v61, %v4189_v42 }
0x31c3   :  { %4193 = vrot.lane.b32.xlu1 %v4191_v18, %s6913_s23 }
0x3226   :  { %v4197_v59 = vpop.permute.xlu0 %4196 }
0x3235   :  { %v4194_v20 = vpop.permute.xlu1 %4193 }
0x3236   :  { %v4199_v28 = vsel %vm355_vm2, %v4194_v20, %v4197_v59 }
0x3237   :  { %5944 = vmatmul.mubr.msk.f32.vlgmr.msra.gmra.mxu0 %vm1104_vm8, %v4199_v28 }
0x3238   :  { %5981 = vmatprep.mubr.msk.f32.mxu0 %vm6911_vm7, %v8589_v41 }
0x32f7   :  { %v4269_v32 = vpop.f32.mrf.mxu0 }
0x32f8   :  { %v4270_v0 = vadd.f32 %v8156_v14, %v4269_v32  ;;  %v3860_v14 = vmul.f32 0.1, %v3419_v24 }
0x32f9   :  { %v5945_v51 = vpop.f32.mrf.mxu0 }
0x32fa   :  { %6411 = vtanh.f32 %v4270_v0  ;;  %v5445_v11 = vmul.f32 -1.442695, %v4270_v0 }
0x32fc   :  { %6413 = vpow2.f32 %v5445_v11 }
0x3307   :  { %v6412_v34 = vpop.eup %6411 }
0x3308   :  { %4282 = vrot.lane.b32.xlu1 %v6412_v34, %s6912_s22 }
0x3309   :  { %v6414_v57 = vpop.eup %6413 }
0x330a   :  { %v4276_v47 = vadd.f32 1.0, %v6414_v57 }
0x330c   :  { %6415 = vrcp.f32 %v4276_v47 }
0x3319   :  { %v6416_v12 = vpop.eup %6415 }
0x337a   :  { %v4283_v58 = vpop.permute.xlu1 %4282 }
0x337b   :  { %v4285_v7 = vmul.f32 %v6416_v12, %v4283_v58 }
0x337d   :  { %4287 = vrot.lane.b32.xlu0 %v4285_v7, %s6913_s23 }
0x3381   :  { %1649 = vrot.lane.b32.xlu0 %v7878_v62, %s6913_s23  ;;  %v3861_v62 = vmul.f32 0.9, %v3850_v23 }
0x3385   :  { %2092 = vrot.lane.b32.xlu0 %v7947_v15, %s6913_s23  ;;  %v3862_v15 = vadd.f32 %v3861_v62, %v3860_v14 }
0x3387   :  { %v4280_v55 = vmul.f32 %v6416_v12, %v3862_v15 }
0x3389   :  { %1207 = vrot.lane.b32.xlu0 %v7767_v30, %s6913_s23 }
0x338d   :  { %2535 = vrot.lane.b32.xlu0 %v8040_v37, %s6913_s23 }
0x3391   :  { %2978 = vrot.lane.b32.xlu0 %v8103_v13, %s6913_s23  ;;  %v8592_v13 = vld [vmem:[#allocation55_spill] sm:$0xff] }
0x3395   :  { %3421 = vrot.lane.b32.xlu0 %v8188_v35, %s6913_s23  ;;  %v8593_v35 = vld [vmem:[#allocation56_spill] sm:$0xff] }
0x3399   :  { %3864 = vrot.lane.b32.xlu0 %v8232_v1, %s6913_s23 }
0x33ef   :  { %v4288_v30 = vpop.permute.xlu0 %4287 }
0x33f0   :  { %v4290_v36 = vadd.f32 %v4288_v30, %v4280_v55 }
0x33f2   :  { %6417 = vtanh.f32 %v4290_v36 }
0x33f3   :  { %v1650_v24 = vpop.permute.xlu0 %1649 }
0x33f7   :  { %v2093_v44 = vpop.permute.xlu0 %2092 }
0x33fb   :  { %v1208_v21 = vpop.permute.xlu0 %1207 }
0x33ff   :  { %v6418_v37 = vpop.eup %6417  ;;  %v2536_v17 = vpop.permute.xlu0 %2535 }
0x3400   :  { %4293 = vrot.lane.b32.xlu1 %v6418_v37, %s6912_s22 }
0x3403   :  { %v2979_v53 = vpop.permute.xlu0 %2978 }
0x3404   :  { %1652 = vrot.lane.b32.xlu1 %v8592_v13, %s6913_s23 }
0x3407   :  { %v3422_v6 = vpop.permute.xlu0 %3421 }
0x3408   :  { %2095 = vrot.lane.b32.xlu1 %v8593_v35, %s6913_s23 }
0x340b   :  { %v3865_v31 = vpop.permute.xlu0 %3864 }
0x340c   :  { %1210 = vrot.lane.b32.xlu1 %v8594_v40, %s6913_s23 }
0x3410   :  { %2538 = vrot.lane.b32.xlu1 %v8595_v50, %s6913_s23 }
0x3414   :  { %2981 = vrot.lane.b32.xlu1 %v8596_v54, %s6913_s23 }
0x3418   :  { %3424 = vrot.lane.b32.xlu1 %v7863_v22, %s6913_s23  ;;  %v4587_v22 = vld [vmem:[%s8591_s19 + $0x10] sm:$0xff] }
0x3419   :  { %5956 = vmatprep.subr.mxu1 %v4587_v22 }
0x341a   :  { %5957 = vmatpush3.msra.mxu1 %v4587_v22 }
0x341b   :  { %5958 = vmatprep.subr.mxu1 %v4586_v16 }
0x341c   :  { %3867 = vrot.lane.b32.xlu1 %v8045_v43, %s6913_s23  ;;  %5959 = vmatpush3.msra.mxu1 %v4586_v16  ;;  %v4297_v43 = vmul.f32 0.1, %v8232_v1 }
0x341d   :  { %5960 = vmatprep.subr.mxu1 %v4585_v49 }
0x341e   :  { %5961 = vmatpush3.msra.mxu1 %v4585_v49 }
0x341f   :  { %5984 = vmatprep.subr.mxu1 %v8589_v41 }
0x3420   :  { %4304 = vrot.lane.b32.xlu1 %v8211_v29, %s6913_s23 }
0x3472   :  { %v4294_v56 = vpop.permute.xlu1 %4293 }
0x3473   :  { %v4296_v9 = vmul.f32 %v6416_v12, %v4294_v56 }
0x3475   :  { %v4298_v48 = vmul.f32 0.9, %v4296_v9 }
0x3476   :  { %v1653_v8 = vpop.permute.xlu1 %1652 }
0x3477   :  { %v4299_v29 = vadd.f32 %v4298_v48, %v4297_v43  ;;  %v1655_v33 = vsel %vm355_vm2, %v1650_v24, %v1653_v8 }
0x3478   :  { %v4340_v2 = vrot.slane %v1655_v33, %v7186_v5 }
0x3479   :  { %4301 = vrot.lane.b32.xlu0 %v4299_v29, %s6913_s23 }
0x347a   :  { %v2096_v27 = vpop.permute.xlu1 %2095  ;;  %v4341_v32 = vcombine.high %v4340_v2, %v4340_v2  ;;  %v4348_v34 = vrot.slane %v4340_v2, %v7186_v5 }
0x347b   :  { %v2098_v1 = vsel %vm355_vm2, %v2093_v44, %v2096_v27 }
0x347c   :  { %v4363_v20 = vrot.slane %v2098_v1, %v7186_v5  ;;  %v4355_v58 = vrot.slane %v4341_v32, %v7186_v5  ;;  %v4497_v36 = vrot.slane %v4348_v34, %v7214_v19  ;;  %v4792_v34 = vld [vmem:[#allocation23 + $0x30] sm:$0xff] }
0x347e   :  { %v1211_v23 = vpop.permute.xlu1 %1210  ;;  %v4364_v47 = vcombine.high %v4363_v20, %v4363_v20  ;;  %v4371_v15 = vrot.slane %v4363_v20, %v7186_v5  ;;  %v4501_v52 = vrot.slane %v4355_v58, %v7214_v19  ;;  %v4791_v58 = vld [vmem:[#allocation23 + $0x28] sm:$0xff] }
0x347f   :  { %v1213_v26 = vsel %vm355_vm2, %v1208_v21, %v1211_v23 }
0x3480   :  { %v4315_v61 = vrot.slane %v1213_v26, %v7186_v5  ;;  %v4378_v40 = vrot.slane %v4364_v47, %v7186_v5  ;;  %v4507_v56 = vrot.slane %v4371_v15, %v7214_v19  ;;  %v4790_v15 = vld [vmem:[#allocation23 + $0x20] sm:$0xff] }
0x3482   :  { %v2539_v63 = vpop.permute.xlu1 %2538  ;;  %v4316_v11 = vcombine.high %v4315_v61, %v4315_v61  ;;  %v4323_v7 = vrot.slane %v4315_v61, %v7186_v5  ;;  %v4511_v24 = vrot.slane %v4378_v40, %v7214_v19 }
0x3483   :  { %v2541_v10 = vsel %vm355_vm2, %v2536_v17, %v2539_v63 }
0x3484   :  { %v4386_v18 = vrot.slane %v2541_v10, %v7186_v5  ;;  %v4330_v37 = vrot.slane %v4316_v11, %v7186_v5  ;;  %v4565_v60 = vsel %vm4564_vm9, %v4323_v7, %v4497_v36 }
0x3485   :  { %v4568_v27 = vsel %vm4567_vm10, %v4565_v60, %v4507_v56  ;;  %v4786_v56 = vld [vmem:[#allocation23] sm:$0xff] }
0x3486   :  { %v2982_v39 = vpop.permute.xlu1 %2981  ;;  %v4387_v57 = vcombine.high %v4386_v18, %v4386_v18  ;;  %v4394_v62 = vrot.slane %v4386_v18, %v7186_v5  ;;  %v4566_v43 = vsel %vm4564_vm9, %v4330_v37, %v4501_v52  ;;  %v4788_v52 = vld [vmem:[#allocation23 + $0x10] sm:$0xff] }
0x3487   :  { %v2984_v25 = vsel %vm355_vm2, %v2979_v53, %v2982_v39  ;;  %v4569_v53 = vsel %vm4567_vm10, %v4566_v43, %v4511_v24  ;;  %v4889_v43 = vld [vmem:[%s8598_s28 + $0x70] sm:$0xff]  ;;  %v4887_v24 = vld [vmem:[%s8598_s28 + $0x60] sm:$0xff] }
0x3488   :  { %v4409_v28 = vrot.slane %v2984_v25, %v7186_v5  ;;  %v4401_v13 = vrot.slane %v4387_v57, %v7186_v5  ;;  %v4517_v45 = vrot.slane %v4394_v62, %v7214_v19  ;;  %v8597_v57 = vld [vmem:[#allocation52_spill] sm:$0xff] }
0x348a   :  { %v3425_v4 = vpop.permute.xlu1 %3424  ;;  %v4410_v12 = vcombine.high %v4409_v28, %v4409_v28  ;;  %v4417_v55 = vrot.slane %v4409_v28, %v7186_v5  ;;  %v4521_v48 = vrot.slane %v4401_v13, %v7214_v19  ;;  %v4571_v21 = vsel %vm4570_vm11, %v4568_v27, %v4517_v45  ;;  %v4789_v13 = vld [vmem:[#allocation23 + $0x18] sm:$0xff] }
0x348b   :  { %v3427_v42 = vsel %vm355_vm2, %v3422_v6, %v3425_v4  ;;  %v6915_v28 = vmov 1934713408  }
0x348c   :  { %v4432_v0 = vrot.slane %v3427_v42, %v7186_v5  ;;  %v4424_v50 = vrot.slane %v4410_v12, %v7186_v5  ;;  %v4527_v16 = vrot.slane %v4417_v55, %v7214_v19  ;;  %v4572_v33 = vsel %vm4570_vm11, %v4569_v53, %v4521_v48 }
0x348d   :  { %v4714_v32 = vunpack.c.l.s4 %v6915_v28  ;;  %v4878_v28 = vld [vmem:[%s8598_s28 + $0x18] sm:$0xff] }
0x348e   :  { %v3868_v38 = vpop.permute.xlu1 %3867  ;;  %v4433_v14 = vcombine.high %v4432_v0, %v4432_v0  ;;  %v4440_v35 = vrot.slane %v4432_v0, %v7186_v5  ;;  %v4531_v44 = vrot.slane %v4424_v50, %v7214_v19  ;;  %v4574_v6 = vsel %vm4573_vm12, %v4571_v21, %v4527_v16  ;;  %v4793_v0 = vld [vmem:[#allocation23 + $0x38] sm:$0xff] }
0x348f   :  { %v3870_v59 = vsel %vm355_vm2, %v3865_v31, %v3868_v38  ;;  %5966 = vmatpush3.msra.mxu0 %v4793_v0  ;;  %v4715_v12 = vunpack.c.0.s8 %v4714_v32  ;;  %v4877_v32 = vld [vmem:[%s8598_s28 + $0x10] sm:$0xff]  ;;  %v4876_v0 = vld [vmem:[%s8598_s28 + $0x8] sm:$0xff] }
0x3490   :  { %v4455_v51 = vrot.slane %v3870_v59, %v7186_v5  ;;  %v4447_v46 = vrot.slane %v4433_v14, %v7186_v5  ;;  %v4537_v29 = vrot.slane %v4440_v35, %v7214_v19  ;;  %v4575_v1 = vsel %vm4573_vm12, %v4572_v33, %v4531_v44  ;;  %5967 = vmatprep.subr.mxu0 %v8589_v41  ;;  %v4886_v44 = vld [vmem:[%s8598_s28 + $0x58] sm:$0xff] }
0x3491   :  { %5968 = vmatpush3.msra.mxu0 %v4792_v34  ;;  %v8368_v37 = vsub.s32 %v4715_v12, %v8597_v57  ;;  %v4983_v34 = vld [vmem:[%s8599_s20 + $0x70] sm:$0xff]  ;;  %v4981_v12 = vld [vmem:[%s8599_s20 + $0x60] sm:$0xff] }
0x3492   :  { %v4456_v30 = vcombine.high %v4455_v51, %v4455_v51  ;;  %v4463_v54 = vrot.slane %v4455_v51, %v7186_v5  ;;  %v4305_v3 = vpop.permute.xlu1 %4304  ;;  %v4541_v63 = vrot.slane %v4447_v46, %v7214_v19  ;;  %v4577_v38 = vsel %vm4576_vm13, %v4574_v6, %v4537_v29  ;;  %5969 = vmatprep.subr.mxu0 %v8589_v41  ;;  %v4888_v29 = vld [vmem:[%s8598_s28 + $0x68] sm:$0xff] }
0x3493   :  { %5970 = vmatpush3.msra.mxu0 %v4791_v58  ;;  %v4980_v58 = vld [vmem:[%s8599_s20 + $0x58] sm:$0xff] }
0x3494   :  { %v4470_v9 = vrot.slane %v4456_v30, %v7186_v5  ;;  %v4547_v23 = vrot.slane %v4463_v54, %v7214_v19  ;;  %v4578_v42 = vsel %vm4576_vm13, %v4575_v1, %v4541_v63  ;;  %5971 = vmatprep.subr.mxu0 %v8589_v41  ;;  %v4884_v63 = vld [vmem:[%s8598_s28 + $0x48] sm:$0xff] }
0x3495   :  { %5972 = vmatpush3.msra.mxu0 %v4790_v15  ;;  %v5449_v15 = vld [vmem:[#allocation24] ss:$0 sm:$0xff] }
0x3496   :  { %v4551_v4 = vrot.slane %v4470_v9, %v7214_v19  ;;  %v4580_v2 = vsel %vm4579_vm14, %v4577_v38, %v4547_v23  ;;  %5973 = vmatprep.subr.mxu0 %v8589_v41  ;;  %v4885_v23 = vld [vmem:[%s8598_s28 + $0x50] sm:$0xff] }
0x3497   :  { %5974 = vmatpush3.msra.mxu0 %v4789_v13 }
0x3498   :  { %v4581_v61 = vsel %vm4579_vm14, %v4578_v42, %v4551_v4  ;;  %5975 = vmatprep.subr.mxu0 %v8589_v41 }
0x3499   :  { %5976 = vmatpush3.msra.mxu0 %v4788_v52  ;;  %v4973_v52 = vld [vmem:[%s8599_s20 + $0x20] sm:$0xff] }
0x349a   :  { %5977 = vmatprep.subr.mxu0 %v8589_v41 }
0x34eb   :  { %v4302_v22 = vpop.permute.xlu0 %4301 }
0x34ec   :  { %v4307_v49 = vsel %vm355_vm2, %v4302_v22, %v4305_v3  ;;  %v4787_v3 = vld [vmem:[#allocation23 + $0x8] sm:$0xff] }
0x34ed   :  { %v4478_v8 = vrot.slane %v4307_v49, %v7186_v5  ;;  %5978 = vmatpush3.msra.mxu0 %v4787_v3  ;;  %v4890_v49 = vld [vmem:[%s8598_s28 + $0x78] sm:$0xff]  ;;  %v4969_v3 = vld [vmem:[%s8599_s20] sm:$0xff] }
0x34ee   :  { %5979 = vmatprep.subr.mxu0 %v8589_v41 }
0x34ef   :  { %v4479_v17 = vcombine.high %v4478_v8, %v4478_v8  ;;  %v4486_v39 = vrot.slane %v4478_v8, %v7186_v5  ;;  %5980 = vmatpush3.msra.mxu0 %v4786_v56  ;;  %v5077_v56 = vld [vmem:[%s8600_s17 + $0x70] sm:$0xff] }
0x34f0   :  { %6019 = vmatprep.subr.mxu0 %v8589_v41 }
0x34f1   :  { %v4493_v26 = vrot.slane %v4479_v17, %v7186_v5  ;;  %v4557_v10 = vrot.slane %v4486_v39, %v7214_v19  ;;  %v6914_v5 = vmov 1983009808  }
0x34f2   :  { %v4683_v59 = vunpack.c.l.s4 %v6914_v5  ;;  %v4881_v5 = vld [vmem:[%s8598_s28 + $0x30] sm:$0xff] }
0x34f3   :  { %v4561_v25 = vrot.slane %v4493_v26, %v7214_v19  ;;  %v4583_v31 = vsel %vm4582_vm15, %v4580_v2, %v4557_v10  ;;  %v5446_v19 = vld [vmem:[#allocation21] ss:$0 sm:$0xff] }
0x34f4   :  { %5962 = vmatprep.mubr.msk.f32.mxu1 %vm1104_vm8, %v4583_v31  ;;  %v4684_v20 = vunpack.c.0.s8 %v4683_v59  ;;  %v4880_v59 = vld [vmem:[%s8598_s28 + $0x28] sm:$0xff] }
0x34f5   :  { %v4584_v18 = vsel %vm4582_vm15, %v4581_v61, %v4561_v25  ;;  %v4883_v61 = vld [vmem:[%s8598_s28 + $0x40] sm:$0xff] }
0x34f6   :  { %5963 = vmatmul.mubr.msk.f32.vlgmr.msra.gmra.mxu1 %vm1104_vm8, %v4584_v18  ;;  %v8353_v47 = vsub.s32 %v4684_v20, %v8597_v57  ;;  %v4882_v18 = vld [vmem:[%s8598_s28 + $0x38] sm:$0xff]  ;;  %v4879_v20 = vld [vmem:[%s8598_s28 + $0x20] sm:$0xff]  ;;  %v4982_v57 = vld [vmem:[%s8599_s20 + $0x68] sm:$0xff] }
0x34f7   :  { %6016 = vmatprep.mubr.msk.f32.mxu1 %vm6911_vm7, %v8589_v41  ;;  %5985 = vmatpush3.msra.mxu1 %v4890_v49  ;;  %v5074_v49 = vld [vmem:[%s8600_s17 + $0x58] sm:$0xff] }
0x34f8   :  { %5986 = vmatprep.subr.mxu1 %v8589_v41 }
0x34f9   :  { %5987 = vmatpush3.msra.mxu1 %v4889_v43  ;;  %v5073_v43 = vld [vmem:[%s8600_s17 + $0x50] sm:$0xff] }
0x34fa   :  { %5988 = vmatprep.subr.mxu1 %v8589_v41 }
0x34fb   :  { %5989 = vmatpush3.msra.mxu1 %v4888_v29  ;;  %v5451_v29 = vld [vmem:[#allocation26] ss:$0 sm:$0xff] }
0x34fc   :  { %5990 = vmatprep.subr.mxu1 %v8589_v41 }
0x34fd   :  { %5991 = vmatpush3.msra.mxu1 %v4887_v24 }
0x34fe   :  { %5992 = vmatprep.subr.mxu1 %v8589_v41 }
0x34ff   :  { %5993 = vmatpush3.msra.mxu1 %v4886_v44 }
0x3500   :  { %5994 = vmatprep.subr.mxu1 %v8589_v41 }
0x3501   :  { %5995 = vmatpush3.msra.mxu1 %v4885_v23  ;;  %v5071_v23 = vld [vmem:[%s8600_s17 + $0x40] sm:$0xff] }
0x3502   :  { %5996 = vmatprep.subr.mxu1 %v8589_v41 }
0x3503   :  { %5997 = vmatpush3.msra.mxu1 %v4884_v63  ;;  %v5069_v63 = vld [vmem:[%s8600_s17 + $0x30] sm:$0xff] }
0x3504   :  { %5998 = vmatprep.subr.mxu1 %v8589_v41 }
0x3505   :  { %5999 = vmatpush3.msra.mxu1 %v4883_v61  ;;  %v5452_v61 = vld [vmem:[#allocation27] ss:$0 sm:$0xff] }
0x3506   :  { %6000 = vmatprep.subr.mxu1 %v8589_v41 }
0x3507   :  { %6001 = vmatpush3.msra.mxu1 %v4882_v18 }
0x3508   :  { %6002 = vmatprep.subr.mxu1 %v8589_v41 }
0x3509   :  { %6003 = vmatpush3.msra.mxu1 %v4881_v5 }
0x350a   :  { %6004 = vmatprep.subr.mxu1 %v8589_v41 }
0x350b   :  { %6005 = vmatpush3.msra.mxu1 %v4880_v59 }
0x350c   :  { %6006 = vmatprep.subr.mxu1 %v8589_v41 }
0x350d   :  { %6007 = vmatpush3.msra.mxu1 %v4879_v20 }
0x350e   :  { %6008 = vmatprep.subr.mxu1 %v8589_v41 }
0x350f   :  { %6009 = vmatpush3.msra.mxu1 %v4878_v28  ;;  %v5165_v28 = vld [vmem:[%s7069_s25 + $0x40] sm:$0xff] }
0x3510   :  { %6010 = vmatprep.subr.mxu1 %v8589_v41 }
0x3511   :  { %6011 = vmatpush3.msra.mxu1 %v4877_v32  ;;  %v5164_v32 = vld [vmem:[%s7069_s25 + $0x38] sm:$0xff] }
0x3512   :  { %6012 = vmatprep.subr.mxu1 %v8589_v41 }
0x3513   :  { %6013 = vmatpush3.msra.mxu1 %v4876_v0  ;;  %v5163_v0 = vld [vmem:[%s7069_s25 + $0x30] sm:$0xff] }
0x3514   :  { %6014 = vmatprep.subr.mxu1 %v8589_v41 }
0x35b6   :  { %v5964_v51 = vpop.f32.mrf.mxu1 }
0x35b7   :  { %v8350_v11 = vadd.f32 %v5964_v51, %v5446_v19  ;;  %v4984_v51 = vld [vmem:[%s8599_s20 + $0x78] sm:$0xff] }
0x35b8   :  { %v4672_v7 = vpop.f32.mrf.mxu1 }
0x35b9   :  { %v4696_v62 = vcombine.high %v8350_v11, %v8589_v41  ;;  %v8358_v14 = vadd.f32 %v5446_v19, %v4672_v7  ;;  %v4703_v55 = vrot.slane %v8350_v11, %v8353_v47  ;;  %v4875_v19 = vld [vmem:[%s8598_s28] sm:$0xff]  ;;  %v4979_v7 = vld [vmem:[%s8599_s20 + $0x50] sm:$0xff] }
0x35ba   :  { %6015 = vmatpush3.msra.mxu1 %v4875_v19  ;;  %v5162_v19 = vld [vmem:[%s7069_s25 + $0x28] sm:$0xff] }
0x35bb   :  { %v4681_v30 = vcombine.high %v8358_v14, %v8589_v41  ;;  %v4688_v36 = vrot.slane %v8358_v14, %v8353_v47  ;;  %v4710_v35 = vrot.slane %v4696_v62, %v8353_v47  ;;  %6054 = vmatprep.subr.mxu1 %v8589_v41  ;;  %v4978_v62 = vld [vmem:[%s8599_s20 + $0x48] sm:$0xff] }
0x35bd   :  { %v4695_v40 = vrot.slane %v4681_v30, %v8353_v47  ;;  %v4711_v50 = vcombine.low %v4688_v36, %v4703_v55  ;;  %v4712_v54 = vcombine.high %v4688_v36, %v4703_v55 }
0x35bf   :  { %v4727_v60 = vcombine.low %v4695_v40, %v4710_v35  ;;  %v4726_v45 = vrot.slane %v4712_v54, %v8368_v37  ;;  %v4719_v46 = vrot.slane %v4711_v50, %v8368_v37  ;;  %v4728_v16 = vcombine.high %v4695_v40, %v4710_v35  ;;  %v4977_v35 = vld [vmem:[%s8599_s20 + $0x40] sm:$0xff]  ;;  %v4976_v40 = vld [vmem:[%s8599_s20 + $0x38] sm:$0xff]  ;;  %v4975_v50 = vld [vmem:[%s8599_s20 + $0x30] sm:$0xff] }
0x35c0   :  { %v4974_v54 = vld [vmem:[%s8599_s20 + $0x28] sm:$0xff] }
0x35c1   :  { %4752 = vrot.lane.b32.xlu1 %v4726_v45, %s6903_s26  ;;  %v4743_v22 = vcombine.high %v4719_v46, %v8589_v41  ;;  %v4735_v9 = vrot.slane %v4727_v60, %v8368_v37  ;;  %v4744_v48 = vcombine.high %v4726_v45, %v8589_v41  ;;  %s6916_s26 = smov 24   ;;  %v4742_v8 = vrot.slane %v4728_v16, %v8368_v37  ;;  %v4972_v60 = vld [vmem:[%s8599_s20 + $0x18] sm:$0xff]  ;;  %v4971_v45 = vld [vmem:[%s8599_s20 + $0x10] sm:$0xff]  ;;  %v5076_v16 = vld [vmem:[%s8600_s17 + $0x68] sm:$0xff] }
0x35c3   :  { %4748 = vrot.lane.b32.xlu0 %v4743_v22, %s6890_s18  ;;  %v4745_v27 = vcombine.high %v4735_v9, %v8589_v41  ;;  %v4746_v21 = vcombine.high %v4742_v8, %v8589_v41  ;;  %v5078_v22 = vld [vmem:[%s8600_s17 + $0x78] sm:$0xff] }
0x35c5   :  { %4760 = vrot.lane.b32.xlu1 %v4735_v9, %s6913_s23  ;;  %v5075_v9 = vld [vmem:[%s8600_s17 + $0x60] sm:$0xff] }
0x35c7   :  { %4756 = vrot.lane.b32.xlu0 %v4744_v48, %s6916_s26  ;;  %v5072_v48 = vld [vmem:[%s8600_s17 + $0x48] sm:$0xff] }
0x35c9   :  { %4768 = vrot.lane.b32.xlu1 %v4742_v8, %s6917_s1 }
0x35cb   :  { %4764 = vrot.lane.b32.xlu0 %v4745_v27, %s6918_s2 }
0x35cf   :  { %4772 = vrot.lane.b32.xlu0 %v4746_v21, %s6919_s30  ;;  %v5070_v21 = vld [vmem:[%s8600_s17 + $0x38] sm:$0xff] }
0x3633   :  { %v4753_v17 = vpop.permute.xlu1 %4752 }
0x3635   :  { %v4749_v39 = vpop.permute.xlu0 %4748 }
0x3636   :  { %v4775_v53 = vsel %vm456_vm0, %v4719_v46, %v4749_v39  ;;  %v4970_v46 = vld [vmem:[%s8599_s20 + $0x8] sm:$0xff]  ;;  %v5067_v39 = vld [vmem:[%s8600_s17 + $0x20] sm:$0xff] }
0x3637   :  { %v4776_v4 = vsel %vm546_vm1, %v4775_v53, %v4753_v17  ;;  %v4761_v33 = vpop.permute.xlu1 %4760  ;;  %v5068_v17 = vld [vmem:[%s8600_s17 + $0x28] sm:$0xff]  ;;  %v5066_v53 = vld [vmem:[%s8600_s17 + $0x18] sm:$0xff] }
0x3639   :  { %v4757_v6 = vpop.permute.xlu0 %4756 }
0x363a   :  { %v4778_v26 = vsel %vm4777_vm3, %v4776_v4, %v4757_v6  ;;  %v5065_v4 = vld [vmem:[%s8600_s17 + $0x10] sm:$0xff]  ;;  %v5064_v6 = vld [vmem:[%s8600_s17 + $0x8] sm:$0xff] }
0x363b   :  { %v4779_v10 = vsel %vm355_vm2, %v4778_v26, %v4761_v33  ;;  %v4769_v1 = vpop.permute.xlu1 %4768  ;;  %v5063_v33 = vld [vmem:[%s8600_s17] sm:$0xff]  ;;  %v5172_v26 = vld [vmem:[%s7069_s25 + $0x78] sm:$0xff]  ;;  %vm5335_vm2 = vcmask 138240  }
0x363d   :  { %v4765_v38 = vpop.permute.xlu0 %4764 }
0x363e   :  { %v4781_v2 = vsel %vm4780_vm4, %v4779_v10, %v4765_v38  ;;  %v5171_v10 = vld [vmem:[%s7069_s25 + $0x70] sm:$0xff]  ;;  %v5170_v38 = vld [vmem:[%s7069_s25 + $0x68] sm:$0xff] }
0x363f   :  { %v4783_v25 = vsel %vm4782_vm5, %v4781_v2, %v4769_v1  ;;  %v5169_v2 = vld [vmem:[%s7069_s25 + $0x60] sm:$0xff]  ;;  %v5168_v1 = vld [vmem:[%s7069_s25 + $0x58] sm:$0xff] }
0x3641   :  { %v4773_v31 = vpop.permute.xlu0 %4772 }
0x3642   :  { %v8405_v42 = vsel %vm4784_vm6, %v4783_v25, %v4773_v31  ;;  %v5167_v25 = vld [vmem:[%s7069_s25 + $0x50] sm:$0xff]  ;;  %v5166_v31 = vld [vmem:[%s7069_s25 + $0x48] sm:$0xff] }
0x3643   :  { %5982 = vmatmul.mubr.msk.f32.vlgmr.msra.gmra.mxu0 %vm1104_vm8, %v8405_v42 }
0x3644   :  { %6051 = vmatprep.mubr.msk.f32.mxu0 %vm6911_vm7, %v8589_v41  ;;  %6020 = vmatpush3.msra.mxu0 %v4984_v51  ;;  %v5161_v51 = vld [vmem:[%s7069_s25 + $0x20] sm:$0xff] }
0x3645   :  { %6021 = vmatprep.subr.mxu0 %v8589_v41 }
0x3646   :  { %6022 = vmatpush3.msra.mxu0 %v4983_v34  ;;  %v5160_v34 = vld [vmem:[%s7069_s25 + $0x18] sm:$0xff] }
0x3647   :  { %6023 = vmatprep.subr.mxu0 %v8589_v41 }
0x3648   :  { %6024 = vmatpush3.msra.mxu0 %v4982_v57  ;;  %v5159_v57 = vld [vmem:[%s7069_s25 + $0x10] sm:$0xff] }
0x3649   :  { %6025 = vmatprep.subr.mxu0 %v8589_v41 }
0x364a   :  { %6026 = vmatpush3.msra.mxu0 %v4981_v12  ;;  %v5158_v12 = vld [vmem:[%s7069_s25 + $0x8] sm:$0xff] }
0x364b   :  { %6027 = vmatprep.subr.mxu0 %v8589_v41 }
0x364c   :  { %6028 = vmatpush3.msra.mxu0 %v4980_v58  ;;  %v5157_v58 = vld [vmem:[%s7069_s25] sm:$0xff]  ;;  %s6921_s25 = smov 120  }
0x364d   :  { %6029 = vmatprep.subr.mxu0 %v8589_v41 }
0x364e   :  { %6030 = vmatpush3.msra.mxu0 %v4979_v7  ;;  %v5453_v7 = vld [vmem:[#allocation29] ss:$0 sm:$0xff] }
0x364f   :  { %6031 = vmatprep.subr.mxu0 %v8589_v41 }
0x3650   :  { %6032 = vmatpush3.msra.mxu0 %v4978_v62 }
0x3651   :  { %6033 = vmatprep.subr.mxu0 %v8589_v41 }
0x3652   :  { %6034 = vmatpush3.msra.mxu0 %v4977_v35 }
0x3653   :  { %6035 = vmatprep.subr.mxu0 %v8589_v41 }
0x3654   :  { %6036 = vmatpush3.msra.mxu0 %v4976_v40 }
0x3655   :  { %6037 = vmatprep.subr.mxu0 %v8589_v41 }
0x3656   :  { %6038 = vmatpush3.msra.mxu0 %v4975_v50 }
0x3657   :  { %6039 = vmatprep.subr.mxu0 %v8589_v41 }
0x3658   :  { %6040 = vmatpush3.msra.mxu0 %v4974_v54 }
0x3659   :  { %6041 = vmatprep.subr.mxu0 %v8589_v41 }
0x365a   :  { %6042 = vmatpush3.msra.mxu0 %v4973_v52 }
0x365b   :  { %6043 = vmatprep.subr.mxu0 %v8589_v41 }
0x365c   :  { %6044 = vmatpush3.msra.mxu0 %v4972_v60 }
0x365d   :  { %6045 = vmatprep.subr.mxu0 %v8589_v41 }
0x365e   :  { %6046 = vmatpush3.msra.mxu0 %v4971_v45 }
0x365f   :  { %6047 = vmatprep.subr.mxu0 %v8589_v41 }
0x3660   :  { %6048 = vmatpush3.msra.mxu0 %v4970_v46 }
0x3661   :  { %6049 = vmatprep.subr.mxu0 %v8589_v41 }
0x3662   :  { %6050 = vmatpush3.msra.mxu0 %v4969_v3 }
0x3663   :  { %6089 = vmatprep.subr.mxu0 %v8589_v41 }
0x3703   :  { %v4870_v55 = vpop.f32.mrf.mxu0 }
0x3704   :  { %v4871_v30 = vadd.f32 %v5449_v15, %v4870_v55 }
0x3705   :  { %v5983_v36 = vpop.f32.mrf.mxu0 }
0x3706   :  { %6419 = vtanh.f32 %v4871_v30  ;;  %v5454_v36 = vld [vmem:[%s7074_s9] ss:$0 sm:$0xff]  ;;  %s6926_s9 = smov 72  }
0x3713   :  { %v6420_v13 = vpop.eup %6419 }
0x3714   :  { %6017 = vmatmul.mubr.f32.vlgmr.msra.gmra.mxu1 %v6420_v13 }
0x3715   :  { %6086 = vmatprep.mubr.msk.f32.mxu1 %vm6911_vm7, %v8589_v41  ;;  %6055 = vmatpush3.msra.mxu1 %v5078_v22 }
0x3716   :  { %6056 = vmatprep.subr.mxu1 %v8589_v41 }
0x3717   :  { %6057 = vmatpush3.msra.mxu1 %v5077_v56 }
0x3718   :  { %6058 = vmatprep.subr.mxu1 %v8589_v41 }
0x3719   :  { %6059 = vmatpush3.msra.mxu1 %v5076_v16 }
0x371a   :  { %6060 = vmatprep.subr.mxu1 %v8589_v41 }
0x371b   :  { %6061 = vmatpush3.msra.mxu1 %v5075_v9 }
0x371c   :  { %6062 = vmatprep.subr.mxu1 %v8589_v41 }
0x371d   :  { %6063 = vmatpush3.msra.mxu1 %v5074_v49 }
0x371e   :  { %6064 = vmatprep.subr.mxu1 %v8589_v41 }
0x371f   :  { %6065 = vmatpush3.msra.mxu1 %v5073_v43 }
0x3720   :  { %6066 = vmatprep.subr.mxu1 %v8589_v41 }
0x3721   :  { %6067 = vmatpush3.msra.mxu1 %v5072_v48 }
0x3722   :  { %6068 = vmatprep.subr.mxu1 %v8589_v41 }
0x3723   :  { %6069 = vmatpush3.msra.mxu1 %v5071_v23 }
0x3724   :  { %6070 = vmatprep.subr.mxu1 %v8589_v41 }
0x3725   :  { %6071 = vmatpush3.msra.mxu1 %v5070_v21 }
0x3726   :  { %6072 = vmatprep.subr.mxu1 %v8589_v41 }
0x3727   :  { %6073 = vmatpush3.msra.mxu1 %v5069_v63 }
0x3728   :  { %6074 = vmatprep.subr.mxu1 %v8589_v41 }
0x3729   :  { %6075 = vmatpush3.msra.mxu1 %v5068_v17 }
0x372a   :  { %6076 = vmatprep.subr.mxu1 %v8589_v41 }
0x372b   :  { %6077 = vmatpush3.msra.mxu1 %v5067_v39 }
0x372c   :  { %6078 = vmatprep.subr.mxu1 %v8589_v41 }
0x372d   :  { %6079 = vmatpush3.msra.mxu1 %v5066_v53 }
0x372e   :  { %6080 = vmatprep.subr.mxu1 %v8589_v41 }
0x372f   :  { %6081 = vmatpush3.msra.mxu1 %v5065_v4 }
0x3730   :  { %6082 = vmatprep.subr.mxu1 %v8589_v41 }
0x3731   :  { %6083 = vmatpush3.msra.mxu1 %v5064_v6 }
0x3732   :  { %6084 = vmatprep.subr.mxu1 %v8589_v41 }
0x3733   :  { %6085 = vmatpush3.msra.mxu1 %v5063_v33 }
0x37d4   :  { %v4964_v8 = vpop.f32.mrf.mxu1 }
0x37d5   :  { %v4965_v24 = vadd.f32 %v5451_v29, %v4964_v8 }
0x37d6   :  { %v6018_v27 = vpop.f32.mrf.mxu1 }
0x37d7   :  { %6421 = vtanh.f32 %v4965_v24 }
0x37e4   :  { %v6422_v44 = vpop.eup %6421 }
0x37e5   :  { %6052 = vmatmul.mubr.f32.vlgmr.msra.gmra.mxu0 %v6422_v44 }
0x37e6   :  { %6121 = vmatprep.mubr.msk.f32.mxu0 %vm6911_vm7, %v8589_v41  ;;  %6090 = vmatpush3.msra.mxu0 %v5172_v26 }
0x37e7   :  { %6091 = vmatprep.subr.mxu0 %v8589_v41 }
0x37e8   :  { %6092 = vmatpush3.msra.mxu0 %v5171_v10 }
0x37e9   :  { %6093 = vmatprep.subr.mxu0 %v8589_v41 }
0x37ea   :  { %6094 = vmatpush3.msra.mxu0 %v5170_v38 }
0x37eb   :  { %6095 = vmatprep.subr.mxu0 %v8589_v41 }
0x37ec   :  { %6096 = vmatpush3.msra.mxu0 %v5169_v2 }
0x37ed   :  { %6097 = vmatprep.subr.mxu0 %v8589_v41 }
0x37ee   :  { %6098 = vmatpush3.msra.mxu0 %v5168_v1 }
0x37ef   :  { %6099 = vmatprep.subr.mxu0 %v8589_v41 }
0x37f0   :  { %6100 = vmatpush3.msra.mxu0 %v5167_v25 }
0x37f1   :  { %6101 = vmatprep.subr.mxu0 %v8589_v41 }
0x37f2   :  { %6102 = vmatpush3.msra.mxu0 %v5166_v31 }
0x37f3   :  { %6103 = vmatprep.subr.mxu0 %v8589_v41 }
0x37f4   :  { %6104 = vmatpush3.msra.mxu0 %v5165_v28 }
0x37f5   :  { %6105 = vmatprep.subr.mxu0 %v8589_v41 }
0x37f6   :  { %6106 = vmatpush3.msra.mxu0 %v5164_v32 }
0x37f7   :  { %6107 = vmatprep.subr.mxu0 %v8589_v41 }
0x37f8   :  { %6108 = vmatpush3.msra.mxu0 %v5163_v0 }
0x37f9   :  { %6109 = vmatprep.subr.mxu0 %v8589_v41 }
0x37fa   :  { %6110 = vmatpush3.msra.mxu0 %v5162_v19 }
0x37fb   :  { %6111 = vmatprep.subr.mxu0 %v8589_v41 }
0x37fc   :  { %6112 = vmatpush3.msra.mxu0 %v5161_v51 }
0x37fd   :  { %6113 = vmatprep.subr.mxu0 %v8589_v41 }
0x37fe   :  { %6114 = vmatpush3.msra.mxu0 %v5160_v34 }
0x37ff   :  { %6115 = vmatprep.subr.mxu0 %v8589_v41 }
0x3800   :  { %6116 = vmatpush3.msra.mxu0 %v5159_v57 }
0x3801   :  { %6117 = vmatprep.subr.mxu0 %v8589_v41 }
0x3802   :  { %6118 = vmatpush3.msra.mxu0 %v5158_v12 }
0x3803   :  { %6119 = vmatprep.subr.mxu0 %v8589_v41 }
0x3804   :  { %6120 = vmatpush3.msra.mxu0 %v5157_v58 }
0x38a5   :  { %v5058_v18 = vpop.f32.mrf.mxu0 }
0x38a6   :  { %v5059_v5 = vadd.f32 %v5452_v61, %v5058_v18 }
0x38a7   :  { %v6053_v59 = vpop.f32.mrf.mxu0 }
0x38a8   :  { %6423 = vtanh.f32 %v5059_v5 }
0x38b5   :  { %v6424_v20 = vpop.eup %6423 }
0x38b6   :  { %6087 = vmatmul.mubr.f32.vlgmr.msra.gmra.mxu1 %v6424_v20 }
0x3976   :  { %v5152_v62 = vpop.f32.mrf.mxu1 }
0x3977   :  { %v5153_v15 = vadd.f32 %v5453_v7, %v5152_v62 }
0x3978   :  { %v6088_v55 = vpop.f32.mrf.mxu1 }
0x3979   :  { %6425 = vtanh.f32 %v5153_v15 }
0x3986   :  { %v6426_v30 = vpop.eup %6425 }
0x3987   :  { %6122 = vmatmul.mubr.f32.vlgmr.msra.gmra.mxu0 %v6426_v30 }
0x3a47   :  { %v5246_v13 = vpop.f32.mrf.mxu0 }
0x3a48   :  { %v5247_v35 = vadd.f32 %v5454_v36, %v5246_v13 }
0x3a49   :  { %v6123_v40 = vpop.f32.mrf.mxu0 }
0x3a4a   :  { %v5250_v50 = vadd.f32 %v5247_v35, %v8405_v42 }
0x3a4c   :  { %5255 = vrot.lane.b32.xlu0 %v5250_v50, %s6920_s11  ;;  %5252 = vrot.lane.b32.xlu1 %v5250_v50, %s6921_s25 }
0x3a50   :  { %5261 = vrot.lane.b32.xlu0 %v5250_v50, %s6922_s12  ;;  %5258 = vrot.lane.b32.xlu1 %v5250_v50, %s6923_s14 }
0x3a54   :  { %5267 = vrot.lane.b32.xlu0 %v5250_v50, %s6924_s8  ;;  %5264 = vrot.lane.b32.xlu1 %v5250_v50, %s6925_s7 }
0x3a58   :  { %5325 = vrot.lane.b32.xlu0 %v8358_v14, %s6890_s18  ;;  %5270 = vrot.lane.b32.xlu1 %v5250_v50, %s6926_s9 }
0x3a5c   :  { %5327 = vrot.lane.b32.xlu1 %v8350_v11, %s6890_s18 }
0x3abe   :  { %v5256_v41 = vpop.permute.xlu0 %5255  ;;  %v5253_v42 = vpop.permute.xlu1 %5252 }
0x3abf   :  { %v5273_v3 = vcombine.low %v5250_v50, %v5256_v41 }
0x3ac1   :  { %v5280_v9 = vrot.slane %v5273_v3, %v8353_v47 }
0x3ac2   :  { %v5262_v54 = vpop.permute.xlu0 %5261  ;;  %v5259_v52 = vpop.permute.xlu1 %5258 }
0x3ac3   :  { %v5281_v60 = vcombine.low %v5253_v42, %v5259_v52 }
0x3ac5   :  { %v5288_v22 = vrot.slane %v5281_v60, %v8353_v47 }
0x3ac6   :  { %v5268_v45 = vpop.permute.xlu0 %5267  ;;  %v5265_v46 = vpop.permute.xlu1 %5264 }
0x3ac7   :  { %v5289_v56 = vcombine.low %v5262_v54, %v5268_v45  ;;  %v5305_v49 = vcombine.low %v5280_v9, %v5288_v22 }
0x3ac9   :  { %v5296_v43 = vrot.slane %v5289_v56, %v8353_v47  ;;  %v5312_v29 = vrot.slane %v5305_v49, %v8368_v37 }
0x3aca   :  { %v5271_v16 = vpop.permute.xlu1 %5270  ;;  %v5326_v44 = vpop.permute.xlu0 %5325 }
0x3acb   :  { %v5297_v14 = vcombine.low %v5265_v46, %v5271_v16 }
0x3acd   :  { %v5304_v11 = vrot.slane %v5297_v14, %v8353_v47 }
0x3ace   :  { %v5328_v23 = vpop.permute.xlu1 %5327 }
0x3acf   :  { %v5313_v48 = vcombine.low %v5296_v43, %v5304_v11 }
0x3ad1   :  { %v5320_v8 = vrot.slane %v5313_v48, %v8368_v37 }
0x3ad3   :  { %v5321_v24 = vcombine.low %v5312_v29, %v5320_v8  ;;  %v5322_v27 = vcombine.high %v5312_v29, %v5320_v8 }
0x3ad5   :  { %v5332_v21 = vsel %vm456_vm0, %v5322_v27, %v5328_v23  ;;  %v5331_v63 = vsel %vm456_vm0, %v5321_v24, %v5326_v44 }
0x3ad6   :  { %v5334_v17 = vsel %vm546_vm1, %v5332_v21, %v5328_v23  ;;  %v5333_v47 = vsel %vm546_vm1, %v5331_v63, %v5326_v44 }
0x3ad7   :  { %5336 = vst.msk [vmem:[#allocation30] sm:$0xff] %vm5335_vm2, %v5333_v47  ;;  %5337 = vst.msk [vmem:[#allocation30 + $0x8] sm:$0xff] %vm5335_vm2, %v5334_v17 }
0x3ad8   :  { %6829 = shalt.err (!%p6826_p5)
}
0x3ad9   :  { %5349 = dma.vmem_to_hbm [thread:$0]  %s5344_s3, 256, %s7079_s4, [#allocation5], %s6889_s0, %s6889_s0, %s6890_s18  }
0x3ada   :  { %6856 = dma.done.wait [#allocation5], 256  }
0x3adb   :  { %6857 = vsyncadd [#allocation5], 4294967040 }
0x3adc   :  { %5353 = vsyncpa [#allocation4], 1 }
0x3add   :  { %5354 = vsyncpa [#allocation7], 1 }
0x3ade   :  { %5355 = vsyncpa [#allocation10], 1 }
0x3adf   :  { %5356 = vsyncpa [#allocation13], 1 }
0x3ae0   :  { %5357 = vsyncpa [#allocation16], 1 }
0x3ae1   :  { %5358 = vsyncpa [#allocation19], 1 }
0x3ae2   :  { %5359 = vsyncpa [#allocation22], 1 }
0x3ae3   :  { %5360 = vsyncpa [#allocation25], 1 }
0x3ae4   :  { %5361 = vsyncpa [#allocation28], 1 }
0x3ae5   :  { %5362 = vsyncpa [#allocation5], 1 }

</bundles_post_ra>
